<compile_context>
chip_gen: v7x
topology: tpu7x:2x2x1
jax: 0.10.0
libtpu: 0.0.40
codegen_flags: <defaults>
</compile_context>

<pallas_src>
import functools
import math

import jax
import jax.numpy as jnp
from jax.experimental import pallas as pl
from jax.experimental.pallas import tpu as pltpu


def _round_up(x, m):
    return (x + m - 1) // m * m


# ----------------------------- TPU generation ------------------------------

_TPU_GEN = None


def _tpu_gen():
    """First digit of device_kind (5 for v5e, 6 for v6e, 7 for v7x, ...)."""
    global _TPU_GEN
    if _TPU_GEN is None:
        gen = 7  # conservative default (dual-core policy, 48 MiB VMEM cap)
        try:
            kind = jax.devices()[0].device_kind.lower()
            digits = [int(ch) for ch in kind if ch.isdigit()]
            if digits:
                gen = digits[0]
        except Exception:
            pass
        _TPU_GEN = gen
    return _TPU_GEN


# ----------------------------- matmul kernel -------------------------------

def _matmul_bias_act_kernel(a_ref, b_ref, bias_ref, o_ref, acc_ref, *, activation):
    @pl.when(pl.program_id(2) == 0)
    def _():
        acc_ref[...] = jnp.zeros_like(acc_ref)

    acc_ref[...] += jnp.dot(a_ref[...], b_ref[...],
                            preferred_element_type=jnp.float32)

    @pl.when(pl.program_id(2) == pl.num_programs(2) - 1)
    def _():
        r = acc_ref[...] + bias_ref[...]
        if activation == "tanh":
            r = jnp.tanh(r)
        o_ref[...] = r.astype(o_ref.dtype)


def _matmul_tiles(M, K, Np, single_tc):
    """Pick (tm, tk, tn, Mp).  Np must be a multiple of 128."""
    # N (lane) tile: big when M is tiny (step overhead dominates); on
    # single-TC parts trade parallel blocks for fewer, larger grid steps.
    tn_target = 2048 if M <= 16 else (1024 if single_tc else 256)
    tn = max(math.gcd(tn_target, Np), 128)
    j_blocks = Np // tn

    # K (reduction) tile.
    tk_cap = 2048 if single_tc else 1024
    tk = math.gcd(tk_cap, K) if K % 128 == 0 else K

    # M tile: minimal padding (multiple of 16 for bf16 sublanes); on megacore
    # parts split M in two when the lane axis alone has < 2 parallel blocks.
    Mp = _round_up(M, 16)
    if (not single_tc) and j_blocks < 2 and 32 <= Mp <= 1024:
        tm = _round_up((Mp + 1) // 2, 16)
        Mp = 2 * tm
    elif Mp <= 512:
        tm = Mp
    else:
        tm = 16
        for cand in (512, 256, 128, 64, 32):
            if Mp % cand == 0:
                tm = cand
                break
    return tm, tk, tn, Mp


def _rhs_spec(tk, tn, triple_buffer):
    index_map = lambda i, j, k: (k, j)
    if triple_buffer:
        try:
            return pl.BlockSpec((tk, tn), index_map,
                                pipeline_mode=pl.Buffered(3)), 3
        except TypeError:        # BlockSpec without pipeline_mode support
            pass
    return pl.BlockSpec((tk, tn), index_map), 2


def matmul_bias_act(a, w, bias, activation="none", out_dtype=jnp.float32):
    """(M,K) @ (K,Np) + bias[1,Np], optional tanh epilogue.

    `w` is a pre-packed bf16 weight slab with Np % 128 == 0; `bias` is the
    matching f32 (1, Np) row.  bf16 MXU feed, f32 resident accumulator."""
    M, K = a.shape
    Kw, Np = w.shape
    assert K == Kw and Np % 128 == 0

    gen = _tpu_gen()
    single_tc = gen in (5, 6)
    tm, tk, tn, Mp = _matmul_tiles(M, K, Np, single_tc)
    if Mp != M:
        a = jnp.pad(a, ((0, Mp - M), (0, 0)))
    a = a.astype(jnp.bfloat16)

    grid = (Mp // tm, Np // tn, K // tk)
    rhs_spec, nbuf_rhs = _rhs_spec(tk, tn, triple_buffer=(gen == 5))

    # VMEM budget from the actual tile footprint; 48 MiB cap on megacore
    # parts (64 MiB physical), 96 MiB on single-TC 128 MiB parts.
    out_bytes = jnp.dtype(out_dtype).itemsize
    est = (2 * 2 * tm * tk + nbuf_rhs * 2 * tk * tn
           + 2 * out_bytes * tm * tn + 4 * tm * tn + 2 * 4 * tn)
    cap = (96 if single_tc else 48) * 1024 * 1024
    vmem_limit = int(min(max(2 * est, 32 * 1024 * 1024), cap))

    out = pl.pallas_call(
        functools.partial(_matmul_bias_act_kernel, activation=activation),
        out_shape=jax.ShapeDtypeStruct((Mp, Np), out_dtype),
        grid_spec=pltpu.PrefetchScalarGridSpec(
            num_scalar_prefetch=0,
            grid=grid,
            in_specs=[
                pl.BlockSpec((tm, tk), lambda i, j, k: (i, k)),
                rhs_spec,
                pl.BlockSpec((1, tn), lambda i, j, k: (0, j)),
            ],
            out_specs=pl.BlockSpec((tm, tn), lambda i, j, k: (i, j)),
            scratch_shapes=[pltpu.VMEM((tm, tn), jnp.float32)],
        ),
        compiler_params=pltpu.CompilerParams(
            dimension_semantics=("parallel", "parallel", "arbitrary"),
            vmem_limit_bytes=vmem_limit,
        ),
    )(a, w, bias)
    return out[:M] if Mp != M else out


# ----------------------- BatchNorm(batch stats) + ReLU ---------------------

def _bn_stats_kernel(x_ref, s_ref, q_ref):
    @pl.when(pl.program_id(1) == 0)
    def _():
        s_ref[...] = jnp.zeros_like(s_ref)
        q_ref[...] = jnp.zeros_like(q_ref)
    x = x_ref[...].astype(jnp.float32)
    s_ref[...] += jnp.sum(x, axis=0, keepdims=True)
    q_ref[...] += jnp.sum(x * x, axis=0, keepdims=True)


def _bn_apply_kernel(x_ref, scale_ref, shift_ref, o_ref):
    x = x_ref[...].astype(jnp.float32)
    o_ref[...] = jnp.maximum(x * scale_ref[...] + shift_ref[...],
                             0.0).astype(o_ref.dtype)


def bn_relu(x2d):
    """PyTorch BatchNorm2d training-mode batch stats (biased var, eps=1e-5,
    gamma=1/beta=0) + ReLU over a (M=B*H*W, C) slab.  Channel-parallel,
    row-tiled stats (resident sum/sumsq accumulator), then normalize+ReLU."""
    # TODO(synk): fusing the stats into the deconv matmul epilogue (masking the
    # phantom 1-px border) would remove one full activation pass per layer.
    M, C = x2d.shape
    tc = 256 if C % 256 == 0 else C          # >=2 channel blocks on megacore
    Mp = _round_up(M, 16)
    if Mp <= 512:
        tmb = Mp
    else:
        tmb = 512
        Mp = _round_up(Mp, tmb)
    xpad = jnp.pad(x2d, ((0, Mp - M), (0, 0))) if Mp != M else x2d
    grid = (C // tc, Mp // tmb)
    vmem = int(min(max(6 * tmb * tc * x2d.dtype.itemsize, 8 << 20), 48 << 20))

    s, q = pl.pallas_call(
        _bn_stats_kernel,
        out_shape=(jax.ShapeDtypeStruct((1, C), jnp.float32),
                   jax.ShapeDtypeStruct((1, C), jnp.float32)),
        grid=grid,
        in_specs=[pl.BlockSpec((tmb, tc), lambda c, i: (i, c))],
        out_specs=[pl.BlockSpec((1, tc), lambda c, i: (0, c)),
                   pl.BlockSpec((1, tc), lambda c, i: (0, c))],
        compiler_params=pltpu.CompilerParams(
            dimension_semantics=("parallel", "arbitrary"),
            vmem_limit_bytes=vmem),
    )(xpad)

    mean = s / M                       # padded zero rows contribute nothing
    var = q / M - mean * mean          # biased variance (batch statistics)
    scale = jax.lax.rsqrt(var + 1e-5)
    shift = -mean * scale

    y = pl.pallas_call(
        _bn_apply_kernel,
        out_shape=jax.ShapeDtypeStruct((Mp, C), x2d.dtype),
        grid=grid,
        in_specs=[pl.BlockSpec((tmb, tc), lambda c, i: (i, c)),
                  pl.BlockSpec((1, tc), lambda c, i: (0, c)),
                  pl.BlockSpec((1, tc), lambda c, i: (0, c))],
        out_specs=pl.BlockSpec((tmb, tc), lambda c, i: (i, c)),
        compiler_params=pltpu.CompilerParams(
            dimension_semantics=("parallel", "parallel"),
            vmem_limit_bytes=vmem),
    )(xpad, scale, shift)
    return y[:M] if Mp != M else y


def bn_relu_nhwc(x):
    B, H, Wd, C = x.shape
    return bn_relu(x.reshape(B * H * Wd, C)).reshape(B, H, Wd, C)


# --------------------------- weight pre-packing ----------------------------

def _pack_deconv1(W, b):
    """ConvTranspose2d(100, C, k=4, s=1, p=0) on a 1x1 input == one matmul.
    Columns ordered (kh, kw, co); K padded to 128."""
    Cin, Cout, kh, kw = W.shape
    N = kh * kw * Cout
    Wmat = W.transpose(0, 2, 3, 1).reshape(Cin, N)
    bias = jnp.tile(b, kh * kw)
    Kp = _round_up(Cin, 128)
    Np = _round_up(N, 128)
    Wmat = jnp.pad(Wmat, ((0, Kp - Cin), (0, Np - N))).astype(jnp.bfloat16)
    bias = jnp.pad(bias, (0, Np - N)).astype(jnp.float32).reshape(1, Np)
    return (Wmat, bias), (kh, kw, Cout)


def _pack_s2(W, b):
    """Stride-2 phase decomposition weights: rows (dh, dw, ci), columns
    (s, t, co) so each phase is a contiguous lane-dense Cout slab."""
    Cin, Cout, _, _ = W.shape
    N = 4 * Cout
    subs = [W[:, :, 2 - 2 * dh:4 - 2 * dh, 2 - 2 * dw:4 - 2 * dw]
                .transpose(0, 2, 3, 1).reshape(Cin, N)     # (ci, s, t, co)
            for dh in (0, 1) for dw in (0, 1)]
    W_col = jnp.concatenate(subs, axis=0)                   # (4*Cin, 4*Cout)
    bias = jnp.tile(b, 4)
    Np = _round_up(N, 128)
    W_col = jnp.pad(W_col, ((0, 0), (0, Np - N))).astype(jnp.bfloat16)
    bias = jnp.pad(bias, (0, Np - N)).astype(jnp.float32).reshape(1, Np)
    return (W_col, bias), Cout


def prepack_params(params):
    """One-time packing (bf16 cast, K/N padding, bias tiling) of all layers."""
    d1, d1_meta = _pack_deconv1(*params["deconv1"])
    mids, mid_meta = [], []
    for (W, b) in params["mid"]:
        p, m = _pack_s2(W, b)
        mids.append(p)
        mid_meta.append(m)
    last, last_meta = _pack_s2(*params["last"])
    packed = (d1, tuple(mids), last)
    meta = (d1_meta, tuple(mid_meta), last_meta)   # static (hashable) ints
    return packed, meta


# ----------------------------- deconv wrappers -----------------------------

def deconv1_1x1(latent, w, bias, kh, kw, cout):
    B = latent.shape[0]
    Kp = w.shape[0]
    lat = jnp.pad(latent, ((0, 0), (0, Kp - latent.shape[1])))
    out = matmul_bias_act(lat, w, bias, out_dtype=jnp.bfloat16)
    return out[:, :kh * kw * cout].reshape(B, kh, kw, cout)   # NHWC


def deconv_s2_p1_k4(x_nhwc, w_col, bias, cout, activation="none",
                    out_dtype=jnp.bfloat16):
    """ConvTranspose2d(Cin, Cout, k=4, s=2, p=1): one (B*(H+1)*(W+1), 4*Cin)
    @ (4*Cin, 4*Cout) matmul, depth-to-space, 1-px border crop."""
    B, H, Wd, Cin = x_nhwc.shape
    Ah, Aw = H + 1, Wd + 1
    xp = jnp.pad(x_nhwc, ((0, 0), (1, 1), (1, 1), (0, 0)))
    # TODO(synk): the 4x im2col still materializes (B*Ah*Aw, 4*Cin) in HBM;
    # feeding xp directly via element-offset index maps would cut activation
    # traffic roughly in half per layer.
    pats = jnp.concatenate(
        [xp[:, dh:dh + Ah, dw:dw + Aw, :] for dh in (0, 1) for dw in (0, 1)],
        axis=-1)
    a = pats.reshape(B * Ah * Aw, 4 * Cin)

    out = matmul_bias_act(a, w_col, bias, activation=activation,
                          out_dtype=out_dtype)[:, :4 * cout]

    # (s, t, co) column order -> depth-to-space is a major-dim interleave:
    # the lane (channel) axis never moves.
    out = out.reshape(B, Ah, Aw, 2, 2, cout).transpose(0, 1, 3, 2, 4, 5)
    out = out.reshape(B, 2 * Ah, 2 * Aw, cout)
    return out[:, 1:1 + 2 * H, 1:1 + 2 * Wd, :]


# ------------------------------- the model ---------------------------------

def init_params(key, res):
    max_scale = res.bit_length() - 1
    assert res == 2 ** max_scale
    params = {}
    c = 1024
    key, k1, k2 = jax.random.split(key, 3)
    params["deconv1"] = (0.05 * jax.random.normal(k1, (100, c, 4, 4), jnp.float32),
                         0.05 * jax.random.normal(k2, (c,), jnp.float32))
    mids = []
    for _scale in range(3, max_scale):
        key, k1, k2 = jax.random.split(key, 3)
        mids.append((0.05 * jax.random.normal(k1, (c, c // 2, 4, 4), jnp.float32),
                     0.05 * jax.random.normal(k2, (c // 2,), jnp.float32)))
        c //= 2
    params["mid"] = mids
    key, k1, k2 = jax.random.split(key, 3)
    params["last"] = (0.05 * jax.random.normal(k1, (c, 3, 4, 4), jnp.float32),
                      0.05 * jax.random.normal(k2, (3,), jnp.float32))
    return params


def g_basic_forward(latent, packed, meta):
    """latent: (B, 100) -> (B, 3, res, res) NCHW.  Matches forward(label=None);
    the `if label:` branch of the PyTorch forward is skipped (label is None)."""
    (w1, b1), mids, (wl, bl) = packed
    (kh, kw, c1), mid_couts, cout_last = meta

    x = deconv1_1x1(latent, w1, b1, kh, kw, c1)           # (B, 4, 4, 1024) NHWC
    x = bn_relu_nhwc(x)
    for (wm, bm), cm in zip(mids, mid_couts):
        x = deconv_s2_p1_k4(x, wm, bm, cm)                # upsample x2, halve C
        x = bn_relu_nhwc(x)
    x = deconv_s2_p1_k4(x, wl, bl, cout_last, activation="tanh",
                        out_dtype=jnp.float32)            # (B, res, res, 3)
    # TODO(synk): the final channel un-pad + NHWC->NCHW transpose could be
    # folded into the last matmul's epilogue store; negligible at these sizes.
    return x.transpose(0, 3, 1, 2)                        # -> NCHW


# --------------------------- pure-JAX reference ----------------------------

def _bf(x):
    """Round to bf16 (where the kernel path stores bf16), compute in f32."""
    return x.astype(jnp.bfloat16).astype(jnp.float32)


def _ref_bn_relu(x_nchw):
    x = _bf(x_nchw)
    mean = x.mean(axis=(0, 2, 3), keepdims=True)
    var = x.var(axis=(0, 2, 3), keepdims=True)
    y = jnp.maximum((x - mean) * jax.lax.rsqrt(var + 1e-5), 0.0)
    return _bf(y)


def _ref_deconv_s2(x_nchw, W, b):
    # ConvTranspose2d(k=4, s=2, p=1) == dilated conv with the flipped kernel.
    kern = jnp.flip(W, axis=(2, 3)).transpose(1, 0, 2, 3)   # (Cout, Cin, kh, kw)
    y = jax.lax.conv_general_dilated(
        _bf(x_nchw), _bf(kern), window_strides=(1, 1),
        padding=[(2, 2), (2, 2)], lhs_dilation=(2, 2),
        dimension_numbers=("NCHW", "OIHW", "NCHW"))
    return y + b[None, :, None, None]


def _ref_forward(latent, params):
    W1, b1 = params["deconv1"]
    x = jnp.einsum("bc,cohw->bohw", _bf(latent), _bf(W1)) + b1[None, :, None, None]
    x = _ref_bn_relu(x)
    for (W, b) in params["mid"]:
        x = _ref_bn_relu(_ref_deconv_s2(x, W, b))
    Wl, bl = params["last"]
    return jnp.tanh(_ref_deconv_s2(x, Wl, bl))


# ---------------------------------- main ------------------------------------

if __name__ == "__main__":
    res = 16      # max_scale = 4: deconv1 (4x4) -> 1 mid layer (8x8) -> last (16x16)
    batch = 2
    key = jax.random.PRNGKey(0)
    k_params, k_latent = jax.random.split(key)
    params = init_params(k_params, res)
    latent = jax.random.normal(k_latent, (batch, 100), jnp.float32)

    packed, meta = prepack_params(params)            # one-time weight packing
    fwd = jax.jit(g_basic_forward, static_argnums=2)
    out = jax.block_until_ready(fwd(latent, packed, meta))

    assert out.shape == (batch, 3, res, res), out.shape
    assert bool(jnp.isfinite(out).all())
    assert bool((jnp.abs(out) <= 1.0).all())          # tanh output range

    # Numerical reference check (bf16-matched lax conv_transpose path).
    ref = jax.block_until_ready(jax.jit(_ref_forward)(latent, params))
    err = float(jnp.max(jnp.abs(out - ref)))
    assert err < 0.1, f"max |pallas - reference| = {err}"

    print("KERNEL_OK")
</pallas_src>

<mosaic_0001>
module attributes {stable_mosaic.version = 11 : i64} {
  func.func @_matmul_bias_act_kernel(%arg0: i32, %arg1: i32, %arg2: i32, %arg3: memref<16x128xbf16, #tpu.memory_space<vmem>>, %arg4: memref<128x2048xbf16, #tpu.memory_space<vmem>>, %arg5: memref<1x2048xf32, #tpu.memory_space<vmem>>, %arg6: memref<16x2048xbf16, #tpu.memory_space<vmem>>, %arg7: memref<16x2048xf32, #tpu.memory_space<vmem>>) attributes {dimension_semantics = [#tpu.dimension_semantics<parallel>, #tpu.dimension_semantics<parallel>, #tpu.dimension_semantics<arbitrary>], iteration_bounds = array<i64: 1, 8, 1>, scalar_prefetch = 0 : i64, scratch_operands = 1 : i64, tpu.core_type = #tpu.core_type<tc>, window_params = [{transform_indices = @transform_0, window_bounds = array<i64: 16, 128>}, {transform_indices = @transform_1, window_bounds = array<i64: 128, 2048>}, {transform_indices = @transform_2, window_bounds = array<i64: 1, 2048>}, {transform_indices = @transform_3, window_bounds = array<i64: 16, 2048>}]} {
    %c0_i32 = arith.constant 0 : i32
    %0 = arith.cmpi eq, %arg2, %c0_i32 : i32
    %1 = arith.extui %0 : i1 to i32
    %c0_i32_0 = arith.constant 0 : i32
    %2 = arith.cmpi ne, %1, %c0_i32_0 : i32
    scf.if %2 {
      %cst_10 = arith.constant 0.000000e+00 : f32
      %12 = vector.broadcast %cst_10 : f32 to vector<16x2048xf32>
      %c0_11 = arith.constant 0 : index
      %c0_12 = arith.constant 0 : index
      %13 = vector.load %arg7[%c0_11, %c0_12] : memref<16x2048xf32, #tpu.memory_space<vmem>>, vector<16x2048xf32>
      tpu.vector_store %arg7[%c0_11, %c0_12], %12 {strides = array<i32>} : memref<16x2048xf32, #tpu.memory_space<vmem>>, vector<16x2048xf32>,
    } else {
    }
    %c0 = arith.constant 0 : index
    %c0_1 = arith.constant 0 : index
    %3 = vector.load %arg7[%c0, %c0_1] : memref<16x2048xf32, #tpu.memory_space<vmem>>, vector<16x2048xf32>
    %c0_2 = arith.constant 0 : index
    %c0_3 = arith.constant 0 : index
    %4 = vector.load %arg3[%c0_2, %c0_3] : memref<16x128xbf16, #tpu.memory_space<vmem>>, vector<16x128xbf16>
    %c0_4 = arith.constant 0 : index
    %c0_5 = arith.constant 0 : index
    %5 = vector.load %arg4[%c0_4, %c0_5] : memref<128x2048xbf16, #tpu.memory_space<vmem>>, vector<128x2048xbf16>
    %cst = arith.constant dense<0.000000e+00> : vector<16x2048xf32>
    %6 = tpu.matmul %4, %5, %cst {dimension_numbers = #tpu.dot_dimension_numbers<[1], [0], [0], [1], [0, 0, 1, 1], [], []>} : vector<16x128xbf16>, vector<128x2048xbf16>, vector<16x2048xf32> -> vector<16x2048xf32>
    %7 = arith.addf %3, %6 : vector<16x2048xf32>
    %c0_6 = arith.constant 0 : index
    %c0_7 = arith.constant 0 : index
    %8 = vector.load %arg7[%c0_6, %c0_7] : memref<16x2048xf32, #tpu.memory_space<vmem>>, vector<16x2048xf32>
    tpu.vector_store %arg7[%c0_6, %c0_7], %7 {strides = array<i32>} : memref<16x2048xf32, #tpu.memory_space<vmem>>, vector<16x2048xf32>,
    %c0_i32_8 = arith.constant 0 : i32
    %9 = arith.cmpi eq, %arg2, %c0_i32_8 : i32
    %10 = arith.extui %9 : i1 to i32
    %c0_i32_9 = arith.constant 0 : i32
    %11 = arith.cmpi ne, %10, %c0_i32_9 : i32
    scf.if %11 {
      %c0_10 = arith.constant 0 : index
      %c0_11 = arith.constant 0 : index
      %12 = vector.load %arg7[%c0_10, %c0_11] : memref<16x2048xf32, #tpu.memory_space<vmem>>, vector<16x2048xf32>
      %c0_12 = arith.constant 0 : index
      %c0_13 = arith.constant 0 : index
      %13 = vector.load %arg5[%c0_12, %c0_13] : memref<1x2048xf32, #tpu.memory_space<vmem>>, vector<1x2048xf32>
      %14 = vector.broadcast %13 : vector<1x2048xf32> to vector<16x2048xf32>
      %15 = arith.addf %12, %14 : vector<16x2048xf32>
      %16 = arith.truncf %15 : vector<16x2048xf32> to vector<16x2048xbf16>
      %c0_14 = arith.constant 0 : index
      %c0_15 = arith.constant 0 : index
      %17 = vector.load %arg6[%c0_14, %c0_15] : memref<16x2048xbf16, #tpu.memory_space<vmem>>, vector<16x2048xbf16>
      tpu.vector_store %arg6[%c0_14, %c0_15], %16 {strides = array<i32>} : memref<16x2048xbf16, #tpu.memory_space<vmem>>, vector<16x2048xbf16>,
    } else {
    }
    return
  }
  func.func @transform_0(%arg0: i32, %arg1: i32, %arg2: i32) -> (i32, i32) {
    %c0_i32 = arith.constant 0 : i32
    return %arg0, %arg2 : i32, i32
  }
  func.func @transform_1(%arg0: i32, %arg1: i32, %arg2: i32) -> (i32, i32) {
    %c0_i32 = arith.constant 0 : i32
    return %arg2, %arg1 : i32, i32
  }
  func.func @transform_2(%arg0: i32, %arg1: i32, %arg2: i32) -> (i32, i32) {
    %c0_i32 = arith.constant 0 : i32
    %c0_i32_0 = arith.constant 0 : i32
    return %c0_i32, %arg1 : i32, i32
  }
  func.func @transform_3(%arg0: i32, %arg1: i32, %arg2: i32) -> (i32, i32) {
    %c0_i32 = arith.constant 0 : i32
    return %arg0, %arg1 : i32, i32
  }
}

module attributes {stable_mosaic.version = 11 : i64} {
  func.func @_bn_stats_kernel(%arg0: i32, %arg1: i32, %arg2: memref<32x256xbf16, #tpu.memory_space<vmem>>, %arg3: memref<1x256xf32, #tpu.memory_space<vmem>>, %arg4: memref<1x256xf32, #tpu.memory_space<vmem>>) attributes {dimension_semantics = [#tpu.dimension_semantics<parallel>, #tpu.dimension_semantics<arbitrary>], iteration_bounds = array<i64: 4, 1>, scalar_prefetch = 0 : i64, scratch_operands = 0 : i64, tpu.core_type = #tpu.core_type<tc>, window_params = [{transform_indices = @transform_0, window_bounds = array<i64: 32, 256>}, {transform_indices = @transform_1, window_bounds = array<i64: 1, 256>}, {transform_indices = @transform_2, window_bounds = array<i64: 1, 256>}]} {
    %c0_i32 = arith.constant 0 : i32
    %0 = arith.cmpi eq, %arg1, %c0_i32 : i32
    %1 = arith.extui %0 : i1 to i32
    %c0_i32_0 = arith.constant 0 : i32
    %2 = arith.cmpi ne, %1, %c0_i32_0 : i32
    scf.if %2 {
      %cst_11 = arith.constant 0.000000e+00 : f32
      %16 = vector.broadcast %cst_11 : f32 to vector<1x256xf32>
      %c0_12 = arith.constant 0 : index
      %c0_13 = arith.constant 0 : index
      %17 = vector.load %arg3[%c0_12, %c0_13] : memref<1x256xf32, #tpu.memory_space<vmem>>, vector<1x256xf32>
      tpu.vector_store %arg3[%c0_12, %c0_13], %16 {strides = array<i32>} : memref<1x256xf32, #tpu.memory_space<vmem>>, vector<1x256xf32>,
      %cst_14 = arith.constant 0.000000e+00 : f32
      %18 = vector.broadcast %cst_14 : f32 to vector<1x256xf32>
      %c0_15 = arith.constant 0 : index
      %c0_16 = arith.constant 0 : index
      %19 = vector.load %arg4[%c0_15, %c0_16] : memref<1x256xf32, #tpu.memory_space<vmem>>, vector<1x256xf32>
      tpu.vector_store %arg4[%c0_15, %c0_16], %18 {strides = array<i32>} : memref<1x256xf32, #tpu.memory_space<vmem>>, vector<1x256xf32>,
    } else {
    }
    %c0 = arith.constant 0 : index
    %c0_1 = arith.constant 0 : index
    %3 = vector.load %arg2[%c0, %c0_1] : memref<32x256xbf16, #tpu.memory_space<vmem>>, vector<32x256xbf16>
    %4 = arith.extf %3 : vector<32x256xbf16> to vector<32x256xf32>
    %c0_2 = arith.constant 0 : index
    %c0_3 = arith.constant 0 : index
    %5 = vector.load %arg3[%c0_2, %c0_3] : memref<1x256xf32, #tpu.memory_space<vmem>>, vector<1x256xf32>
    %cst = arith.constant dense<0.000000e+00> : vector<256xf32>
    %6 = vector.multi_reduction <add>, %4, %cst [0] : vector<32x256xf32> to vector<256xf32>
    %7 = vector.shape_cast %6 : vector<256xf32> to vector<1x256xf32>
    %8 = arith.addf %5, %7 : vector<1x256xf32>
    %c0_4 = arith.constant 0 : index
    %c0_5 = arith.constant 0 : index
    %9 = vector.load %arg3[%c0_4, %c0_5] : memref<1x256xf32, #tpu.memory_space<vmem>>, vector<1x256xf32>
    tpu.vector_store %arg3[%c0_4, %c0_5], %8 {strides = array<i32>} : memref<1x256xf32, #tpu.memory_space<vmem>>, vector<1x256xf32>,
    %c0_6 = arith.constant 0 : index
    %c0_7 = arith.constant 0 : index
    %10 = vector.load %arg4[%c0_6, %c0_7] : memref<1x256xf32, #tpu.memory_space<vmem>>, vector<1x256xf32>
    %11 = arith.mulf %4, %4 : vector<32x256xf32>
    %cst_8 = arith.constant dense<0.000000e+00> : vector<256xf32>
    %12 = vector.multi_reduction <add>, %11, %cst_8 [0] : vector<32x256xf32> to vector<256xf32>
    %13 = vector.shape_cast %12 : vector<256xf32> to vector<1x256xf32>
    %14 = arith.addf %10, %13 : vector<1x256xf32>
    %c0_9 = arith.constant 0 : index
    %c0_10 = arith.constant 0 : index
    %15 = vector.load %arg4[%c0_9, %c0_10] : memref<1x256xf32, #tpu.memory_space<vmem>>, vector<1x256xf32>
    tpu.vector_store %arg4[%c0_9, %c0_10], %14 {strides = array<i32>} : memref<1x256xf32, #tpu.memory_space<vmem>>, vector<1x256xf32>,
    return
  }
  func.func @transform_0(%arg0: i32, %arg1: i32) -> (i32, i32) {
    %c0_i32 = arith.constant 0 : i32
    return %arg1, %arg0 : i32, i32
  }
  func.func @transform_1(%arg0: i32, %arg1: i32) -> (i32, i32) {
    %c0_i32 = arith.constant 0 : i32
    %c0_i32_0 = arith.constant 0 : i32
    return %c0_i32, %arg0 : i32, i32
  }
  func.func @transform_2(%arg0: i32, %arg1: i32) -> (i32, i32) {
    %c0_i32 = arith.constant 0 : i32
    %c0_i32_0 = arith.constant 0 : i32
    return %c0_i32, %arg0 : i32, i32
  }
}

module attributes {stable_mosaic.version = 11 : i64} {
  func.func @_bn_apply_kernel(%arg0: i32, %arg1: i32, %arg2: memref<32x256xbf16, #tpu.memory_space<vmem>>, %arg3: memref<1x256xf32, #tpu.memory_space<vmem>>, %arg4: memref<1x256xf32, #tpu.memory_space<vmem>>, %arg5: memref<32x256xbf16, #tpu.memory_space<vmem>>) attributes {dimension_semantics = [#tpu.dimension_semantics<parallel>, #tpu.dimension_semantics<parallel>], iteration_bounds = array<i64: 4, 1>, scalar_prefetch = 0 : i64, scratch_operands = 0 : i64, tpu.core_type = #tpu.core_type<tc>, window_params = [{transform_indices = @transform_0, window_bounds = array<i64: 32, 256>}, {transform_indices = @transform_1, window_bounds = array<i64: 1, 256>}, {transform_indices = @transform_2, window_bounds = array<i64: 1, 256>}, {transform_indices = @transform_3, window_bounds = array<i64: 32, 256>}]} {
    %c0 = arith.constant 0 : index
    %c0_0 = arith.constant 0 : index
    %0 = vector.load %arg2[%c0, %c0_0] : memref<32x256xbf16, #tpu.memory_space<vmem>>, vector<32x256xbf16>
    %1 = arith.extf %0 : vector<32x256xbf16> to vector<32x256xf32>
    %c0_1 = arith.constant 0 : index
    %c0_2 = arith.constant 0 : index
    %2 = vector.load %arg3[%c0_1, %c0_2] : memref<1x256xf32, #tpu.memory_space<vmem>>, vector<1x256xf32>
    %3 = vector.broadcast %2 : vector<1x256xf32> to vector<32x256xf32>
    %4 = arith.mulf %1, %3 : vector<32x256xf32>
    %c0_3 = arith.constant 0 : index
    %c0_4 = arith.constant 0 : index
    %5 = vector.load %arg4[%c0_3, %c0_4] : memref<1x256xf32, #tpu.memory_space<vmem>>, vector<1x256xf32>
    %6 = vector.broadcast %5 : vector<1x256xf32> to vector<32x256xf32>
    %7 = arith.addf %4, %6 : vector<32x256xf32>
    %cst = arith.constant 0.000000e+00 : f32
    %8 = vector.broadcast %cst : f32 to vector<32x256xf32>
    %9 = arith.maximumf %7, %8 : vector<32x256xf32>
    %10 = arith.truncf %9 : vector<32x256xf32> to vector<32x256xbf16>
    %c0_5 = arith.constant 0 : index
    %c0_6 = arith.constant 0 : index
    %11 = vector.load %arg5[%c0_5, %c0_6] : memref<32x256xbf16, #tpu.memory_space<vmem>>, vector<32x256xbf16>
    tpu.vector_store %arg5[%c0_5, %c0_6], %10 {strides = array<i32>} : memref<32x256xbf16, #tpu.memory_space<vmem>>, vector<32x256xbf16>,
    return
  }
  func.func @transform_0(%arg0: i32, %arg1: i32) -> (i32, i32) {
    %c0_i32 = arith.constant 0 : i32
    return %arg1, %arg0 : i32, i32
  }
  func.func @transform_1(%arg0: i32, %arg1: i32) -> (i32, i32) {
    %c0_i32 = arith.constant 0 : i32
    %c0_i32_0 = arith.constant 0 : i32
    return %c0_i32, %arg0 : i32, i32
  }
  func.func @transform_2(%arg0: i32, %arg1: i32) -> (i32, i32) {
    %c0_i32 = arith.constant 0 : i32
    %c0_i32_0 = arith.constant 0 : i32
    return %c0_i32, %arg0 : i32, i32
  }
  func.func @transform_3(%arg0: i32, %arg1: i32) -> (i32, i32) {
    %c0_i32 = arith.constant 0 : i32
    return %arg1, %arg0 : i32, i32
  }
}

module attributes {stable_mosaic.version = 11 : i64} {
  func.func @_matmul_bias_act_kernel(%arg0: i32, %arg1: i32, %arg2: i32, %arg3: memref<64x1024xbf16, #tpu.memory_space<vmem>>, %arg4: memref<1024x256xbf16, #tpu.memory_space<vmem>>, %arg5: memref<1x256xf32, #tpu.memory_space<vmem>>, %arg6: memref<64x256xbf16, #tpu.memory_space<vmem>>, %arg7: memref<64x256xf32, #tpu.memory_space<vmem>>) attributes {dimension_semantics = [#tpu.dimension_semantics<parallel>, #tpu.dimension_semantics<parallel>, #tpu.dimension_semantics<arbitrary>], iteration_bounds = array<i64: 1, 8, 4>, scalar_prefetch = 0 : i64, scratch_operands = 1 : i64, tpu.core_type = #tpu.core_type<tc>, window_params = [{transform_indices = @transform_0, window_bounds = array<i64: 64, 1024>}, {transform_indices = @transform_1, window_bounds = array<i64: 1024, 256>}, {transform_indices = @transform_2, window_bounds = array<i64: 1, 256>}, {transform_indices = @transform_3, window_bounds = array<i64: 64, 256>}]} {
    %c0_i32 = arith.constant 0 : i32
    %0 = arith.cmpi eq, %arg2, %c0_i32 : i32
    %1 = arith.extui %0 : i1 to i32
    %c0_i32_0 = arith.constant 0 : i32
    %2 = arith.cmpi ne, %1, %c0_i32_0 : i32
    scf.if %2 {
      %cst_9 = arith.constant 0.000000e+00 : f32
      %12 = vector.broadcast %cst_9 : f32 to vector<64x256xf32>
      %c0_10 = arith.constant 0 : index
      %c0_11 = arith.constant 0 : index
      %13 = vector.load %arg7[%c0_10, %c0_11] : memref<64x256xf32, #tpu.memory_space<vmem>>, vector<64x256xf32>
      tpu.vector_store %arg7[%c0_10, %c0_11], %12 {strides = array<i32>} : memref<64x256xf32, #tpu.memory_space<vmem>>, vector<64x256xf32>,
    } else {
    }
    %c0 = arith.constant 0 : index
    %c0_1 = arith.constant 0 : index
    %3 = vector.load %arg7[%c0, %c0_1] : memref<64x256xf32, #tpu.memory_space<vmem>>, vector<64x256xf32>
    %c0_2 = arith.constant 0 : index
    %c0_3 = arith.constant 0 : index
    %4 = vector.load %arg3[%c0_2, %c0_3] : memref<64x1024xbf16, #tpu.memory_space<vmem>>, vector<64x1024xbf16>
    %c0_4 = arith.constant 0 : index
    %c0_5 = arith.constant 0 : index
    %5 = vector.load %arg4[%c0_4, %c0_5] : memref<1024x256xbf16, #tpu.memory_space<vmem>>, vector<1024x256xbf16>
    %cst = arith.constant dense<0.000000e+00> : vector<64x256xf32>
    %6 = tpu.matmul %4, %5, %cst {dimension_numbers = #tpu.dot_dimension_numbers<[1], [0], [0], [1], [0, 0, 1, 1], [], []>} : vector<64x1024xbf16>, vector<1024x256xbf16>, vector<64x256xf32> -> vector<64x256xf32>
    %7 = arith.addf %3, %6 : vector<64x256xf32>
    %c0_6 = arith.constant 0 : index
    %c0_7 = arith.constant 0 : index
    %8 = vector.load %arg7[%c0_6, %c0_7] : memref<64x256xf32, #tpu.memory_space<vmem>>, vector<64x256xf32>
    tpu.vector_store %arg7[%c0_6, %c0_7], %7 {strides = array<i32>} : memref<64x256xf32, #tpu.memory_space<vmem>>, vector<64x256xf32>,
    %c3_i32 = arith.constant 3 : i32
    %9 = arith.cmpi eq, %arg2, %c3_i32 : i32
    %10 = arith.extui %9 : i1 to i32
    %c0_i32_8 = arith.constant 0 : i32
    %11 = arith.cmpi ne, %10, %c0_i32_8 : i32
    scf.if %11 {
      %c0_9 = arith.constant 0 : index
      %c0_10 = arith.constant 0 : index
      %12 = vector.load %arg7[%c0_9, %c0_10] : memref<64x256xf32, #tpu.memory_space<vmem>>, vector<64x256xf32>
      %c0_11 = arith.constant 0 : index
      %c0_12 = arith.constant 0 : index
      %13 = vector.load %arg5[%c0_11, %c0_12] : memref<1x256xf32, #tpu.memory_space<vmem>>, vector<1x256xf32>
      %14 = vector.broadcast %13 : vector<1x256xf32> to vector<64x256xf32>
      %15 = arith.addf %12, %14 : vector<64x256xf32>
      %16 = arith.truncf %15 : vector<64x256xf32> to vector<64x256xbf16>
      %c0_13 = arith.constant 0 : index
      %c0_14 = arith.constant 0 : index
      %17 = vector.load %arg6[%c0_13, %c0_14] : memref<64x256xbf16, #tpu.memory_space<vmem>>, vector<64x256xbf16>
      tpu.vector_store %arg6[%c0_13, %c0_14], %16 {strides = array<i32>} : memref<64x256xbf16, #tpu.memory_space<vmem>>, vector<64x256xbf16>,
    } else {
    }
    return
  }
  func.func @transform_0(%arg0: i32, %arg1: i32, %arg2: i32) -> (i32, i32) {
    %c0_i32 = arith.constant 0 : i32
    return %arg0, %arg2 : i32, i32
  }
  func.func @transform_1(%arg0: i32, %arg1: i32, %arg2: i32) -> (i32, i32) {
    %c0_i32 = arith.constant 0 : i32
    return %arg2, %arg1 : i32, i32
  }
  func.func @transform_2(%arg0: i32, %arg1: i32, %arg2: i32) -> (i32, i32) {
    %c0_i32 = arith.constant 0 : i32
    %c0_i32_0 = arith.constant 0 : i32
    return %c0_i32, %arg1 : i32, i32
  }
  func.func @transform_3(%arg0: i32, %arg1: i32, %arg2: i32) -> (i32, i32) {
    %c0_i32 = arith.constant 0 : i32
    return %arg0, %arg1 : i32, i32
  }
}

module attributes {stable_mosaic.version = 11 : i64} {
  func.func @_bn_stats_kernel(%arg0: i32, %arg1: i32, %arg2: memref<128x256xbf16, #tpu.memory_space<vmem>>, %arg3: memref<1x256xf32, #tpu.memory_space<vmem>>, %arg4: memref<1x256xf32, #tpu.memory_space<vmem>>) attributes {dimension_semantics = [#tpu.dimension_semantics<parallel>, #tpu.dimension_semantics<arbitrary>], iteration_bounds = array<i64: 2, 1>, scalar_prefetch = 0 : i64, scratch_operands = 0 : i64, tpu.core_type = #tpu.core_type<tc>, window_params = [{transform_indices = @transform_0, window_bounds = array<i64: 128, 256>}, {transform_indices = @transform_1, window_bounds = array<i64: 1, 256>}, {transform_indices = @transform_2, window_bounds = array<i64: 1, 256>}]} {
    %c0_i32 = arith.constant 0 : i32
    %0 = arith.cmpi eq, %arg1, %c0_i32 : i32
    %1 = arith.extui %0 : i1 to i32
    %c0_i32_0 = arith.constant 0 : i32
    %2 = arith.cmpi ne, %1, %c0_i32_0 : i32
    scf.if %2 {
      %cst_11 = arith.constant 0.000000e+00 : f32
      %16 = vector.broadcast %cst_11 : f32 to vector<1x256xf32>
      %c0_12 = arith.constant 0 : index
      %c0_13 = arith.constant 0 : index
      %17 = vector.load %arg3[%c0_12, %c0_13] : memref<1x256xf32, #tpu.memory_space<vmem>>, vector<1x256xf32>
      tpu.vector_store %arg3[%c0_12, %c0_13], %16 {strides = array<i32>} : memref<1x256xf32, #tpu.memory_space<vmem>>, vector<1x256xf32>,
      %cst_14 = arith.constant 0.000000e+00 : f32
      %18 = vector.broadcast %cst_14 : f32 to vector<1x256xf32>
      %c0_15 = arith.constant 0 : index
      %c0_16 = arith.constant 0 : index
      %19 = vector.load %arg4[%c0_15, %c0_16] : memref<1x256xf32, #tpu.memory_space<vmem>>, vector<1x256xf32>
      tpu.vector_store %arg4[%c0_15, %c0_16], %18 {strides = array<i32>} : memref<1x256xf32, #tpu.memory_space<vmem>>, vector<1x256xf32>,
    } else {
    }
    %c0 = arith.constant 0 : index
    %c0_1 = arith.constant 0 : index
    %3 = vector.load %arg2[%c0, %c0_1] : memref<128x256xbf16, #tpu.memory_space<vmem>>, vector<128x256xbf16>
    %4 = arith.extf %3 : vector<128x256xbf16> to vector<128x256xf32>
    %c0_2 = arith.constant 0 : index
    %c0_3 = arith.constant 0 : index
    %5 = vector.load %arg3[%c0_2, %c0_3] : memref<1x256xf32, #tpu.memory_space<vmem>>, vector<1x256xf32>
    %cst = arith.constant dense<0.000000e+00> : vector<256xf32>
    %6 = vector.multi_reduction <add>, %4, %cst [0] : vector<128x256xf32> to vector<256xf32>
    %7 = vector.shape_cast %6 : vector<256xf32> to vector<1x256xf32>
    %8 = arith.addf %5, %7 : vector<1x256xf32>
    %c0_4 = arith.constant 0 : index
    %c0_5 = arith.constant 0 : index
    %9 = vector.load %arg3[%c0_4, %c0_5] : memref<1x256xf32, #tpu.memory_space<vmem>>, vector<1x256xf32>
    tpu.vector_store %arg3[%c0_4, %c0_5], %8 {strides = array<i32>} : memref<1x256xf32, #tpu.memory_space<vmem>>, vector<1x256xf32>,
    %c0_6 = arith.constant 0 : index
    %c0_7 = arith.constant 0 : index
    %10 = vector.load %arg4[%c0_6, %c0_7] : memref<1x256xf32, #tpu.memory_space<vmem>>, vector<1x256xf32>
    %11 = arith.mulf %4, %4 : vector<128x256xf32>
    %cst_8 = arith.constant dense<0.000000e+00> : vector<256xf32>
    %12 = vector.multi_reduction <add>, %11, %cst_8 [0] : vector<128x256xf32> to vector<256xf32>
    %13 = vector.shape_cast %12 : vector<256xf32> to vector<1x256xf32>
    %14 = arith.addf %10, %13 : vector<1x256xf32>
    %c0_9 = arith.constant 0 : index
    %c0_10 = arith.constant 0 : index
    %15 = vector.load %arg4[%c0_9, %c0_10] : memref<1x256xf32, #tpu.memory_space<vmem>>, vector<1x256xf32>
    tpu.vector_store %arg4[%c0_9, %c0_10], %14 {strides = array<i32>} : memref<1x256xf32, #tpu.memory_space<vmem>>, vector<1x256xf32>,
    return
  }
  func.func @transform_0(%arg0: i32, %arg1: i32) -> (i32, i32) {
    %c0_i32 = arith.constant 0 : i32
    return %arg1, %arg0 : i32, i32
  }
  func.func @transform_1(%arg0: i32, %arg1: i32) -> (i32, i32) {
    %c0_i32 = arith.constant 0 : i32
    %c0_i32_0 = arith.constant 0 : i32
    return %c0_i32, %arg0 : i32, i32
  }
  func.func @transform_2(%arg0: i32, %arg1: i32) -> (i32, i32) {
    %c0_i32 = arith.constant 0 : i32
    %c0_i32_0 = arith.constant 0 : i32
    return %c0_i32, %arg0 : i32, i32
  }
}

module attributes {stable_mosaic.version = 11 : i64} {
  func.func @_bn_apply_kernel(%arg0: i32, %arg1: i32, %arg2: memref<128x256xbf16, #tpu.memory_space<vmem>>, %arg3: memref<1x256xf32, #tpu.memory_space<vmem>>, %arg4: memref<1x256xf32, #tpu.memory_space<vmem>>, %arg5: memref<128x256xbf16, #tpu.memory_space<vmem>>) attributes {dimension_semantics = [#tpu.dimension_semantics<parallel>, #tpu.dimension_semantics<parallel>], iteration_bounds = array<i64: 2, 1>, scalar_prefetch = 0 : i64, scratch_operands = 0 : i64, tpu.core_type = #tpu.core_type<tc>, window_params = [{transform_indices = @transform_0, window_bounds = array<i64: 128, 256>}, {transform_indices = @transform_1, window_bounds = array<i64: 1, 256>}, {transform_indices = @transform_2, window_bounds = array<i64: 1, 256>}, {transform_indices = @transform_3, window_bounds = array<i64: 128, 256>}]} {
    %c0 = arith.constant 0 : index
    %c0_0 = arith.constant 0 : index
    %0 = vector.load %arg2[%c0, %c0_0] : memref<128x256xbf16, #tpu.memory_space<vmem>>, vector<128x256xbf16>
    %1 = arith.extf %0 : vector<128x256xbf16> to vector<128x256xf32>
    %c0_1 = arith.constant 0 : index
    %c0_2 = arith.constant 0 : index
    %2 = vector.load %arg3[%c0_1, %c0_2] : memref<1x256xf32, #tpu.memory_space<vmem>>, vector<1x256xf32>
    %3 = vector.broadcast %2 : vector<1x256xf32> to vector<128x256xf32>
    %4 = arith.mulf %1, %3 : vector<128x256xf32>
    %c0_3 = arith.constant 0 : index
    %c0_4 = arith.constant 0 : index
    %5 = vector.load %arg4[%c0_3, %c0_4] : memref<1x256xf32, #tpu.memory_space<vmem>>, vector<1x256xf32>
    %6 = vector.broadcast %5 : vector<1x256xf32> to vector<128x256xf32>
    %7 = arith.addf %4, %6 : vector<128x256xf32>
    %cst = arith.constant 0.000000e+00 : f32
    %8 = vector.broadcast %cst : f32 to vector<128x256xf32>
    %9 = arith.maximumf %7, %8 : vector<128x256xf32>
    %10 = arith.truncf %9 : vector<128x256xf32> to vector<128x256xbf16>
    %c0_5 = arith.constant 0 : index
    %c0_6 = arith.constant 0 : index
    %11 = vector.load %arg5[%c0_5, %c0_6] : memref<128x256xbf16, #tpu.memory_space<vmem>>, vector<128x256xbf16>
    tpu.vector_store %arg5[%c0_5, %c0_6], %10 {strides = array<i32>} : memref<128x256xbf16, #tpu.memory_space<vmem>>, vector<128x256xbf16>,
    return
  }
  func.func @transform_0(%arg0: i32, %arg1: i32) -> (i32, i32) {
    %c0_i32 = arith.constant 0 : i32
    return %arg1, %arg0 : i32, i32
  }
  func.func @transform_1(%arg0: i32, %arg1: i32) -> (i32, i32) {
    %c0_i32 = arith.constant 0 : i32
    %c0_i32_0 = arith.constant 0 : i32
    return %c0_i32, %arg0 : i32, i32
  }
  func.func @transform_2(%arg0: i32, %arg1: i32) -> (i32, i32) {
    %c0_i32 = arith.constant 0 : i32
    %c0_i32_0 = arith.constant 0 : i32
    return %c0_i32, %arg0 : i32, i32
  }
  func.func @transform_3(%arg0: i32, %arg1: i32) -> (i32, i32) {
    %c0_i32 = arith.constant 0 : i32
    return %arg1, %arg0 : i32, i32
  }
}

module attributes {stable_mosaic.version = 11 : i64} {
  func.func @_matmul_bias_act_kernel(%arg0: i32, %arg1: i32, %arg2: i32, %arg3: memref<96x1024xbf16, #tpu.memory_space<vmem>>, %arg4: memref<1024x128xbf16, #tpu.memory_space<vmem>>, %arg5: memref<1x128xf32, #tpu.memory_space<vmem>>, %arg6: memref<96x128xf32, #tpu.memory_space<vmem>>, %arg7: memref<96x128xf32, #tpu.memory_space<vmem>>) attributes {dimension_semantics = [#tpu.dimension_semantics<parallel>, #tpu.dimension_semantics<parallel>, #tpu.dimension_semantics<arbitrary>], iteration_bounds = array<i64: 2, 1, 2>, scalar_prefetch = 0 : i64, scratch_operands = 1 : i64, tpu.core_type = #tpu.core_type<tc>, window_params = [{transform_indices = @transform_0, window_bounds = array<i64: 96, 1024>}, {transform_indices = @transform_1, window_bounds = array<i64: 1024, 128>}, {transform_indices = @transform_2, window_bounds = array<i64: 1, 128>}, {transform_indices = @transform_3, window_bounds = array<i64: 96, 128>}]} {
    %c0_i32 = arith.constant 0 : i32
    %0 = arith.cmpi eq, %arg2, %c0_i32 : i32
    %1 = arith.extui %0 : i1 to i32
    %c0_i32_0 = arith.constant 0 : i32
    %2 = arith.cmpi ne, %1, %c0_i32_0 : i32
    scf.if %2 {
      %cst_9 = arith.constant 0.000000e+00 : f32
      %12 = vector.broadcast %cst_9 : f32 to vector<96x128xf32>
      %c0_10 = arith.constant 0 : index
      %c0_11 = arith.constant 0 : index
      %13 = vector.load %arg7[%c0_10, %c0_11] : memref<96x128xf32, #tpu.memory_space<vmem>>, vector<96x128xf32>
      tpu.vector_store %arg7[%c0_10, %c0_11], %12 {strides = array<i32>} : memref<96x128xf32, #tpu.memory_space<vmem>>, vector<96x128xf32>,
    } else {
    }
    %c0 = arith.constant 0 : index
    %c0_1 = arith.constant 0 : index
    %3 = vector.load %arg7[%c0, %c0_1] : memref<96x128xf32, #tpu.memory_space<vmem>>, vector<96x128xf32>
    %c0_2 = arith.constant 0 : index
    %c0_3 = arith.constant 0 : index
    %4 = vector.load %arg3[%c0_2, %c0_3] : memref<96x1024xbf16, #tpu.memory_space<vmem>>, vector<96x1024xbf16>
    %c0_4 = arith.constant 0 : index
    %c0_5 = arith.constant 0 : index
    %5 = vector.load %arg4[%c0_4, %c0_5] : memref<1024x128xbf16, #tpu.memory_space<vmem>>, vector<1024x128xbf16>
    %cst = arith.constant dense<0.000000e+00> : vector<96x128xf32>
    %6 = tpu.matmul %4, %5, %cst {dimension_numbers = #tpu.dot_dimension_numbers<[1], [0], [0], [1], [0, 0, 1, 1], [], []>} : vector<96x1024xbf16>, vector<1024x128xbf16>, vector<96x128xf32> -> vector<96x128xf32>
    %7 = arith.addf %3, %6 : vector<96x128xf32>
    %c0_6 = arith.constant 0 : index
    %c0_7 = arith.constant 0 : index
    %8 = vector.load %arg7[%c0_6, %c0_7] : memref<96x128xf32, #tpu.memory_space<vmem>>, vector<96x128xf32>
    tpu.vector_store %arg7[%c0_6, %c0_7], %7 {strides = array<i32>} : memref<96x128xf32, #tpu.memory_space<vmem>>, vector<96x128xf32>,
    %c1_i32 = arith.constant 1 : i32
    %9 = arith.cmpi eq, %arg2, %c1_i32 : i32
    %10 = arith.extui %9 : i1 to i32
    %c0_i32_8 = arith.constant 0 : i32
    %11 = arith.cmpi ne, %10, %c0_i32_8 : i32
    scf.if %11 {
      %c0_9 = arith.constant 0 : index
      %c0_10 = arith.constant 0 : index
      %12 = vector.load %arg7[%c0_9, %c0_10] : memref<96x128xf32, #tpu.memory_space<vmem>>, vector<96x128xf32>
      %c0_11 = arith.constant 0 : index
      %c0_12 = arith.constant 0 : index
      %13 = vector.load %arg5[%c0_11, %c0_12] : memref<1x128xf32, #tpu.memory_space<vmem>>, vector<1x128xf32>
      %14 = vector.broadcast %13 : vector<1x128xf32> to vector<96x128xf32>
      %15 = arith.addf %12, %14 : vector<96x128xf32>
      %16 = math.tanh %15 : vector<96x128xf32>
      %c0_13 = arith.constant 0 : index
      %c0_14 = arith.constant 0 : index
      %17 = vector.load %arg6[%c0_13, %c0_14] : memref<96x128xf32, #tpu.memory_space<vmem>>, vector<96x128xf32>
      tpu.vector_store %arg6[%c0_13, %c0_14], %16 {strides = array<i32>} : memref<96x128xf32, #tpu.memory_space<vmem>>, vector<96x128xf32>,
    } else {
    }
    return
  }
  func.func @transform_0(%arg0: i32, %arg1: i32, %arg2: i32) -> (i32, i32) {
    %c0_i32 = arith.constant 0 : i32
    return %arg0, %arg2 : i32, i32
  }
  func.func @transform_1(%arg0: i32, %arg1: i32, %arg2: i32) -> (i32, i32) {
    %c0_i32 = arith.constant 0 : i32
    return %arg2, %arg1 : i32, i32
  }
  func.func @transform_2(%arg0: i32, %arg1: i32, %arg2: i32) -> (i32, i32) {
    %c0_i32 = arith.constant 0 : i32
    %c0_i32_0 = arith.constant 0 : i32
    return %c0_i32, %arg1 : i32, i32
  }
  func.func @transform_3(%arg0: i32, %arg1: i32, %arg2: i32) -> (i32, i32) {
    %c0_i32 = arith.constant 0 : i32
    return %arg0, %arg1 : i32, i32
  }
}

</mosaic_0001>

<bundles_post_ra>
// kernel: g_basic_forward.8
= control target key start
LH: loop header
LB: loop body
LE: loop exit
PB: predicated region body
PF: predicated region fallthrough
CT: control target
= control target key end

     0   :  { %s563_s9 = smov 0   ;;  %s565_s10 = smov 0   ;;  %s653_s0 = inlined_call_operand.vmem [shape: bf16[32,1024], index: 0, kind: input, shape index: {}]   ;;  %s654_s1 = inlined_call_operand.vmem [shape: f32[1,1024], index: 1, kind: output, shape index: {0}]   ;;  %s655_s2 = inlined_call_operand.vmem [shape: f32[1,1024], index: 2, kind: output, shape index: {1}]  }
   0x1   :  { %s567_s11 = smov 0   ;;  %s569_s12 = smov 0  }
   0x2   :  { %s571_s13 = smov 0  }
   0x3 LB: > { %s25_s14 = sadd.s32 1, %s539_s12  ;;  %p41_p1 = scmp.ne.s32.totalorder %s531_s10, %s527_s9  ;;  %s543_s13 = sphi %s571_s13, %s13_s13   ;;  %s539_s12 = sphi %s569_s12, %s661_s12   ;;  %s535_s11 = sphi %s567_s11, %s660_s11   ;;  %s531_s10 = sphi %s565_s10, %s659_s10   ;;  %s527_s9 = sphi %s563_s9, %s658_s9  }
   0x4   : > { %p27_p0 = scmp.ge.s32.totalorder %s25_s14, 4  ;;  %p42_p2 = scmp.eq.s32.totalorder %s543_s13, 0 }
   0x5   : > { %s34_s16 = sadd.s32 1, %s531_s10  ;;  %p432_p5 = scmp.ge.s32.totalorder %s543_s13, 4 }
   0x6   : > { %s663_s14 = smov (%p27_p0, %s25_s14), 0  ;;  %p43_p3 = por %p42_p2, %p41_p1 }
   0x7   : > { %s30_s15 = ssub.s32 %s539_s12, %s663_s14  ;;  %119 = sbr.rel (%p432_p5) target bundleno = 22 (0x16), region = 16 }
   0x8   : > { %p32_p4 = scmp.eq.s32.totalorder %s30_s15, 0 }
   0xa   : > { %s598_s17 = scalar_select %p32_p4, %s531_s10, %s34_s16  }
   0xe   : > { %122 = sbr.rel (!%p43_p3) target bundleno = 22 (0x16), region = 20  ;;  %s124_s18 = sand.u32 (%p43_p3), 1, %s531_s10  }
   0xf   : > { %s442_s19 = sshll.u32 (%p43_p3), %s539_s12, 3  ;;  %s433_s20 = sshll.u32 (%p43_p3), %s124_s18, 5 }
  0x10   : > { %s132_s23 = scalar_lea.vmem (%p43_p3), %s653_s0, %s442_s19  ;;  %s126_s24 = scalar_lea.vmem (%p43_p3), [#allocation2], %s433_s20 }
  0x11   : > { %v166_v0 = vld [vmem:[%s132_s23] sm:$0xff] (%p43_p3) }
  0x12   : > { %v168_v1 = vld [vmem:[%s132_s23 + $0x20] sm:$0xff] (%p43_p3)  ;;  %167 = vst [vmem:[%s126_s24] sm:$0xff] (%p43_p3), %v166_v0 }
  0x13   : > { %v170_v2 = vld [vmem:[%s132_s23 + $0x40] sm:$0xff] (%p43_p3)  ;;  %169 = vst [vmem:[%s126_s24 + $0x8] sm:$0xff] (%p43_p3), %v168_v1 }
  0x14   : > { %171 = vst [vmem:[%s126_s24 + $0x10] sm:$0xff] (%p43_p3), %v170_v2  ;;  %v172_v3 = vld [vmem:[%s132_s23 + $0x60] sm:$0xff] (%p43_p3) }
  0x15   : > { %173 = vst [vmem:[%s126_s24 + $0x18] sm:$0xff] %v172_v3 }
  0x16 PF: > { %p436_p6 = scmp.ge.s32.totalorder %s543_s13, 1  ;;  %p178_p7 = scmp.lt.s32.totalorder %s543_s13, 5 }
  0x18   : > { %p179_p8 = pnand %p436_p6, %p178_p7 }
  0x19   : > { %s185_s25 = sand.u32 (!%p179_p8), 1, %s527_s9   ;;  %s438_s26 = sshll.u32 (!%p179_p8), %s535_s11, 1  ;;  %v225_v4 = vlaneseq (!%p179_p8)  ;;  %v545_v18 = vmov (!%p179_p8), 0.0   ;;  %v546_v31 = vmov (!%p179_p8), 1935823168  }
  0x1a   : > { %182 = sbr.rel (%p179_p8) target bundleno = 64 (0x40), region = 58  ;;  %s437_s27 = sshll.u32 (!%p179_p8), %s185_s25, 5  ;;  %v513_v32 = vunpack.c.l.s4 (!%p179_p8), %v546_v31  ;;  %v547_v40 = vmov (!%p179_p8), 1966171168  }
  0x1b   : > { %p212_p9 = scmp.lt.s32.totalorder (!%p179_p8), %s438_s26, 7  ;;  %vm610_vm0 = vcmp.lt.s32.totalorder (!%p179_p8), %v225_v4, 256  ;;  %s187_s28 = scalar_lea.vmem (!%p179_p8), [#allocation2], %s437_s27  ;;  %v516_v34 = vshrl.u32 (!%p179_p8), %v225_v4, 7  ;;  %v266_v41 = vunpack.c.l.s4 (!%p179_p8), %v547_v40 }
  0x1c   : > { %v231_v6 = vld [vmem:[%s187_s28] sm:$0xff] (!%p179_p8)  ;;  %v232_v7 = vld [vmem:[%s187_s28 + $0x8] sm:$0xff] (!%p179_p8)  ;;  %v233_v8 = vld [vmem:[%s187_s28 + $0x10] sm:$0xff] (!%p179_p8)  ;;  %v514_v33 = vunpack.c.0.s8 (!%p179_p8), %v513_v32 }
  0x1d   : > { %v234_v9 = vld [vmem:[%s187_s28 + $0x18] sm:$0xff] (!%p179_p8)  ;;  %v235_v10 = vunpack.c.l.bf16 (!%p179_p8), %v231_v6  ;;  %v236_v11 = vunpack.c.h.bf16 (!%p179_p8), %v231_v6  ;;  %v237_v12 = vunpack.c.l.bf16 (!%p179_p8), %v232_v7  ;;  %v238_v13 = vunpack.c.h.bf16 (!%p179_p8), %v232_v7 }
  0x1e   : > { %v239_v14 = vunpack.c.l.bf16 (!%p179_p8), %v233_v8  ;;  %v240_v15 = vunpack.c.h.bf16 (!%p179_p8), %v233_v8  ;;  %v241_v16 = vunpack.c.l.bf16 (!%p179_p8), %v234_v9  ;;  %v242_v17 = vunpack.c.h.bf16 (!%p179_p8), %v234_v9 }
  0x1f   : > { %v244_v19 = vadd.f32 (!%p179_p8), %v237_v12, %v235_v10  ;;  %v253_v20 = vadd.f32 (!%p179_p8), %v238_v13, %v236_v11  ;;  %505 = vmul.bf16.f32.vacc0 (!%p179_p8), %v231_v6, %v231_v6  ;;  %v517_v35 = vsub.s32 (!%p179_p8), %v514_v33, %v516_v34 }
  0x20   : > { %506 = vmac.bf16.f32.vacc0 (!%p179_p8), %v232_v7, %v232_v7  ;;  %v267_v50 = vunpack.c.0.s8 (!%p179_p8), %v266_v41 }
  0x21   : > { %s665_s26 = smov (!%p212_p9, %s438_s26), 7  ;;  %v245_v21 = vadd.f32 %v244_v19, %v239_v14  ;;  %v254_v22 = vadd.f32 %v253_v20, %v240_v15  ;;  %507 = vmac.bf16.f32.vacc0 %v233_v8, %v233_v8 }
  0x22   : > { %s617_s3 = scalar_lea.vmem %s654_s1, %s665_s26  ;;  %s622_s6 = scalar_lea.vmem %s655_s2, %s665_s26  ;;  %508 = vmac.bf16.f32.vacc0 %v234_v9, %v234_v9  ;;  %v270_v59 = vsub.s32 %v267_v50, %v516_v34 }
  0x23   : > { %229 = vst.msk [vmem:[%s617_s3] sm:$0x3] %vm610_vm0, %v545_v18  ;;  %230 = vst.msk [vmem:[%s622_s6] sm:$0x3] %vm610_vm0, %v545_v18  ;;  %v246_v23 = vadd.f32 %v245_v21, %v241_v16  ;;  %v255_v24 = vadd.f32 %v254_v22, %v242_v17 }
  0x24   : > { %v509_v27 = vmovacc.add.low.vacc0 }
  0x25   : > { %v247_v25 = vrot.slane %v246_v23, 4  ;;  %v256_v26 = vrot.slane %v255_v24, 4  ;;  %v510_v28 = vmovacc.add.high.vacc0 }
  0x27   : > { %v511_v29 = vcombine.low %v509_v27, %v510_v28  ;;  %v512_v30 = vcombine.high %v509_v27, %v510_v28  ;;  %v248_v38 = vadd.f32 %v247_v25, %v246_v23  ;;  %v257_v39 = vadd.f32 %v256_v26, %v255_v24 }
  0x29   : > { %v518_v36 = vrot.slane %v511_v29, %v517_v35  ;;  %v524_v37 = vrot.slane %v512_v30, %v517_v35  ;;  %v249_v44 = vrot.slane %v248_v38, 2  ;;  %v258_v45 = vrot.slane %v257_v39, 2 }
  0x2a   : > { %v243_v2 = vld [vmem:[%s617_s3] sm:$0x3] }
  0x2b   : > { %v298_v42 = vrot.slane %v518_v36, 4  ;;  %v307_v43 = vrot.slane %v524_v37, 4  ;;  %v250_v48 = vadd.f32 %v249_v44, %v248_v38  ;;  %v259_v49 = vadd.f32 %v258_v45, %v257_v39  ;;  %v286_v8 = vld [vmem:[%s622_s6] sm:$0x3] }
  0x2d   : > { %v299_v46 = vadd.f32 %v518_v36, %v298_v42  ;;  %v308_v47 = vadd.f32 %v524_v37, %v307_v43  ;;  %v251_v53 = vrot.slane %v250_v48, 1  ;;  %v260_v54 = vrot.slane %v259_v49, 1 }
  0x2f   : > { %v300_v51 = vrot.slane %v299_v46, 2  ;;  %v309_v52 = vrot.slane %v308_v47, 2  ;;  %v252_v57 = vadd.f32 %v251_v53, %v250_v48  ;;  %v261_v58 = vadd.f32 %v260_v54, %v259_v49 }
  0x31   : > { %v301_v55 = vadd.f32 %v300_v51, %v299_v46  ;;  %v310_v56 = vadd.f32 %v309_v52, %v308_v47  ;;  %v264_v62 = vcombine.low %v252_v57, %v261_v58 }
  0x33   : > { %v302_v60 = vrot.slane %v301_v55, 1  ;;  %v311_v61 = vrot.slane %v310_v56, 1  ;;  %v271_v1 = vrot.slane %v264_v62, %v270_v59 }
  0x35   : > { %v303_v63 = vadd.f32 %v302_v60, %v301_v55  ;;  %v312_v0 = vadd.f32 %v311_v61, %v310_v56  ;;  %v278_v4 = vrot.slane %v271_v1, %v270_v59 }
  0x37   : > { %v315_v3 = vcombine.low %v303_v63, %v312_v0  ;;  %v280_v7 = vadd.f32 %v278_v4, %v243_v2 }
  0x39   : > { %v322_v6 = vrot.slane %v315_v3, %v270_v59  ;;  %285 = vst.msk [vmem:[%s617_s3] sm:$0x3] %vm610_vm0, %v280_v7 }
  0x3b   : > { %v329_v9 = vrot.slane %v322_v6, %v270_v59 }
  0x3d   : > { %v331_v10 = vadd.f32 %v329_v9, %v286_v8 }
  0x3f   : > { %332 = vst.msk [vmem:[%s622_s6] sm:$0x3] %vm610_vm0, %v331_v10 }
  0x40 PF: > { %s13_s13 = sadd.s32 1, %s543_s13   ;;  %s658_s9 = smov %s531_s10 }
  0x41   : > { %p10_p10 = scmp.ge.s32.totalorder %s13_s13, 6   ;;  %s659_s10 = smov %s598_s17 }
  0x42   : > { %s660_s11 = smov %s539_s12  ;;  %s661_s12 = smov %s663_s14 }
  0x43   :  { %12 = sbr.rel (!%p10_p10) target bundleno = 3 (0x3), region = 113 }

// kernel: g_basic_forward.9
= control target key start
LH: loop header
LB: loop body
LE: loop exit
PB: predicated region body
PF: predicated region fallthrough
CT: control target
= control target key end

     0   :  { %s634_s12 = smov 0   ;;  %s636_s13 = smov 0   ;;  %s717_s0 = inlined_call_operand.vmem [shape: bf16[32,1024], index: 0, kind: input, shape index: {}]   ;;  %s718_s1 = inlined_call_operand.vmem [shape: f32[1,1024], index: 1, kind: input, shape index: {}]   ;;  %s719_s2 = inlined_call_operand.vmem [shape: f32[1,1024], index: 2, kind: input, shape index: {}]   ;;  %s720_s3 = inlined_call_operand.vmem [shape: bf16[32,1024], index: 3, kind: output, shape index: {}]  }
   0x1   :  { %s638_s14 = smov 0   ;;  %s640_s15 = smov 0  }
   0x2   :  { %s642_s16 = smov 0  }
   0x3 LB: > { %s25_s17 = sadd.s32 1, %s608_s15  ;;  %s507_s18 = sadd.s32 4294967295, %s612_s16   ;;  %s612_s16 = sphi %s642_s16, %s13_s16   ;;  %s608_s15 = sphi %s640_s15, %s725_s15   ;;  %s604_s14 = sphi %s638_s14, %s724_s14   ;;  %s600_s13 = sphi %s636_s13, %s723_s13   ;;  %s596_s12 = sphi %s634_s12, %s722_s12  }
   0x4   : > { %p27_p0 = scmp.ge.s32.totalorder %s25_s17, 4  ;;  %p41_p1 = scmp.ne.s32.totalorder %s600_s13, %s596_s12 }
   0x5   : > { %p42_p2 = scmp.eq.s32.totalorder %s612_s16, 0  ;;  %p125_p4 = scmp.eq.s32.totalorder %s507_s18, 3 }
   0x6   : > { %s727_s17 = smov (%p27_p0, %s25_s17), 0  ;;  %s34_s20 = sadd.s32 1, %s600_s13 }
   0x7   : > { %p43_p3 = por %p42_p2, %p41_p1  ;;  %s30_s19 = ssub.s32 %s608_s15, %s727_s17 }
   0x8   : > { %p32_p5 = scmp.eq.s32.totalorder %s30_s19, 0  ;;  %p669_p6 = por %p125_p4, %p41_p1 }
   0x9   : > { %p510_p7 = scmp.ge.s32.totalorder %s612_s16, 4 }
   0xa   : > { %s674_s22 = scalar_select %p32_p5, %s600_s13, %s34_s20  }
   0xb   : > { %147 = sbr.rel (%p510_p7) target bundleno = 26 (0x1a), region = 16 }
  0x12   : > { %150 = sbr.rel (!%p43_p3) target bundleno = 26 (0x1a), region = 20  ;;  %s152_s23 = sand.u32 (%p43_p3), 1, %s600_s13  }
  0x13   : > { %s528_s24 = sshll.u32 (%p43_p3), %s608_s15, 3  ;;  %s511_s25 = sshll.u32 (%p43_p3), %s152_s23, 5 }
  0x14   : > { %s160_s28 = scalar_lea.vmem (%p43_p3), %s717_s0, %s528_s24  ;;  %s154_s29 = scalar_lea.vmem (%p43_p3), [#allocation2], %s511_s25 }
  0x15   : > { %v194_v0 = vld [vmem:[%s160_s28] sm:$0xff] (%p43_p3) }
  0x16   : > { %v196_v1 = vld [vmem:[%s160_s28 + $0x20] sm:$0xff] (%p43_p3)  ;;  %195 = vst [vmem:[%s154_s29] sm:$0xff] (%p43_p3), %v194_v0 }
  0x17   : > { %v198_v2 = vld [vmem:[%s160_s28 + $0x40] sm:$0xff] (%p43_p3)  ;;  %197 = vst [vmem:[%s154_s29 + $0x8] sm:$0xff] (%p43_p3), %v196_v1 }
  0x18   : > { %199 = vst [vmem:[%s154_s29 + $0x10] sm:$0xff] (%p43_p3), %v198_v2  ;;  %v200_v3 = vld [vmem:[%s160_s28 + $0x60] sm:$0xff] (%p43_p3) }
  0x19   : > { %201 = vst [vmem:[%s154_s29 + $0x18] sm:$0xff] %v200_v3 }
  0x1a PF: > { %p514_p8 = scmp.ge.s32.totalorder %s612_s16, 1  ;;  %p222_p9 = scmp.lt.s32.totalorder %s612_s16, 5 }
  0x1c   : > { %p223_p10 = pnand %p514_p8, %p222_p9 }
  0x1d   : > { %s229_s30 = sand.u32 (!%p223_p10), 1, %s596_s12   ;;  %s517_s4 = sshll.u32 (!%p223_p10), %s604_s14, 1  ;;  %v287_v4 = vlaneseq (!%p223_p10) }
  0x1e   : > { %226 = sbr.rel (%p223_p10) target bundleno = 60 (0x3c), region = 66  ;;  %s686_s5 = sshll.u32 (!%p223_p10), %s229_s30, 5 }
  0x1f   : > { %p262_p11 = scmp.lt.s32.totalorder (!%p223_p10), %s517_s4, 7  ;;  %v288_v5 = vshrl.u32 (!%p223_p10), %v287_v4, 7  ;;  %s231_s6 = scalar_lea.vmem (!%p223_p10), [#allocation2], %s686_s5 }
  0x20   : > { %v273_v6 = vld [vmem:[%s231_s6] sm:$0xff] (!%p223_p10)  ;;  %v274_v7 = vld [vmem:[%s231_s6 + $0x8] sm:$0xff] (!%p223_p10)  ;;  %v275_v8 = vld [vmem:[%s231_s6 + $0x10] sm:$0xff] (!%p223_p10)  ;;  %s258_s18 = scalar_lea.vmem (!%p223_p10), [#allocation3], %s686_s5 }
  0x21   : > { %v289_v9 = vsub.s32 (!%p223_p10), 0, %v288_v5  ;;  %v293_v10 = vsub.s32 (!%p223_p10), 1, %v288_v5  ;;  %v276_v11 = vld [vmem:[%s231_s6 + $0x18] sm:$0xff] (!%p223_p10)  ;;  %v277_v12 = vunpack.c.l.bf16 (!%p223_p10), %v273_v6  ;;  %v278_v13 = vunpack.c.h.bf16 (!%p223_p10), %v273_v6 }
  0x22   : > { %v279_v14 = vunpack.c.l.bf16 (!%p223_p10), %v274_v7  ;;  %v280_v15 = vunpack.c.h.bf16 (!%p223_p10), %v274_v7  ;;  %v281_v18 = vunpack.c.l.bf16 (!%p223_p10), %v275_v8  ;;  %v282_v19 = vunpack.c.h.bf16 (!%p223_p10), %v275_v8 }
  0x23   : > { %v283_v20 = vunpack.c.l.bf16 (!%p223_p10), %v276_v11  ;;  %v284_v21 = vunpack.c.h.bf16 (!%p223_p10), %v276_v11 }
  0x25   : > { %s729_s4 = smov (!%p262_p11, %s517_s4), 7  ;;  %s533_s19 = sshll.u32 (%p669_p6), %s604_s14, 3 }
  0x26   : > { %s264_s9 = scalar_lea.vmem %s718_s1, %s729_s4  ;;  %s269_s12 = scalar_lea.vmem %s719_s2, %s729_s4 }
  0x27   : > { %v285_v16 = vld [vmem:[%s264_s9] sm:$0x3]  ;;  %s373_s24 = scalar_lea.vmem (%p669_p6), %s720_s3, %s533_s19 }
  0x28   : > { %v305_v17 = vld [vmem:[%s269_s12] sm:$0x3]  ;;  %v290_v22 = vrot.slane %v285_v16, %v289_v9  ;;  %v294_v23 = vrot.slane %v285_v16, %v293_v10 }
  0x29   : > { %v310_v24 = vrot.slane %v305_v17, %v289_v9  ;;  %v314_v25 = vrot.slane %v305_v17, %v293_v10 }
  0x2a   : > { %v297_v26 = vmul.f32 %v290_v22, %v277_v12  ;;  %v298_v27 = vmul.f32 %v294_v23, %v278_v13  ;;  %v299_v28 = vmul.f32 %v290_v22, %v279_v14  ;;  %v300_v29 = vmul.f32 %v294_v23, %v280_v15 }
  0x2b   : > { %v301_v30 = vmul.f32 %v290_v22, %v281_v18  ;;  %v302_v31 = vmul.f32 %v294_v23, %v282_v19  ;;  %v303_v32 = vmul.f32 %v290_v22, %v283_v20  ;;  %v304_v33 = vmul.f32 %v294_v23, %v284_v21 }
  0x2c   : > { %v317_v34 = vadd.f32 %v310_v24, %v297_v26  ;;  %v318_v35 = vadd.f32 %v314_v25, %v298_v27  ;;  %v319_v36 = vadd.f32 %v310_v24, %v299_v28  ;;  %v320_v37 = vadd.f32 %v314_v25, %v300_v29 }
  0x2d   : > { %v321_v38 = vadd.f32 %v310_v24, %v301_v30  ;;  %v322_v39 = vadd.f32 %v314_v25, %v302_v31  ;;  %v323_v40 = vadd.f32 %v310_v24, %v303_v32  ;;  %v324_v41 = vadd.f32 %v314_v25, %v304_v33  ;;  %367 = sbr.rel (!%p669_p6) target bundleno = 60 (0x3c), region = 74 }
  0x2e   : > { %v325_v42 = vmax.f32 %v317_v34, 0.0  ;;  %v326_v43 = vmax.f32 %v318_v35, 0.0  ;;  %v327_v44 = vmax.f32 %v319_v36, 0.0  ;;  %v328_v45 = vmax.f32 %v320_v37, 0.0 }
  0x2f   : > { %v329_v46 = vmax.f32 %v321_v38, 0.0  ;;  %v330_v47 = vmax.f32 %v322_v39, 0.0  ;;  %v331_v48 = vmax.f32 %v323_v40, 0.0  ;;  %v332_v49 = vmax.f32 %v324_v41, 0.0 }
  0x30   : > { %v529_v50 = vpack.c.bf16 %v326_v43, %v325_v42  ;;  %v530_v51 = vpack.c.bf16 %v328_v45, %v327_v44 }
  0x31   : > { %v531_v52 = vpack.c.bf16 %v330_v47, %v329_v46  ;;  %v532_v53 = vpack.c.bf16 %v332_v49, %v331_v48 }
  0x32   : > { %357 = vst [vmem:[%s258_s18] sm:$0xff] %v529_v50  ;;  %358 = vst [vmem:[%s258_s18 + $0x8] sm:$0xff] %v530_v51 }
  0x33   : > { %359 = vst [vmem:[%s258_s18 + $0x10] sm:$0xff] %v531_v52  ;;  %360 = vst [vmem:[%s258_s18 + $0x18] sm:$0xff] %v532_v53 }
  0x39   : > { %v407_v54 = vld [vmem:[%s258_s18] sm:$0xff]  ;;  %v409_v55 = vld [vmem:[%s258_s18 + $0x8] sm:$0xff] }
  0x3a   : > { %v411_v56 = vld [vmem:[%s258_s18 + $0x10] sm:$0xff]  ;;  %v413_v57 = vld [vmem:[%s258_s18 + $0x18] sm:$0xff]  ;;  %408 = vst [vmem:[%s373_s24] sm:$0xff] %v407_v54  ;;  %410 = vst [vmem:[%s373_s24 + $0x20] sm:$0xff] %v409_v55 }
  0x3b   : > { %412 = vst [vmem:[%s373_s24 + $0x40] sm:$0xff] %v411_v56  ;;  %414 = vst [vmem:[%s373_s24 + $0x60] sm:$0xff] %v413_v57 }
  0x3c PF: > { %s13_s16 = sadd.s32 1, %s612_s16   ;;  %s722_s12 = smov %s600_s13 }
  0x3d   : > { %p10_p12 = scmp.ge.s32.totalorder %s13_s16, 6   ;;  %s723_s13 = smov %s674_s22 }
  0x3e   : > { %s724_s14 = smov %s608_s15  ;;  %s725_s15 = smov %s727_s17 }
  0x3f   :  { %12 = sbr.rel (!%p10_p12) target bundleno = 3 (0x3), region = 149 }

// kernel: g_basic_forward.7
= control target key start
LH: loop header
LB: loop body
LE: loop exit
PB: predicated region body
PF: predicated region fallthrough
CT: control target
= control target key end

     0   :  { %8 = vsyncpa [#allocation4], 0  ;;  %s2767_s0 = inlined_call_operand.vmem [shape: bf16[16,128], index: 0, kind: input, shape index: {}]   ;;  %s2768_s1 = inlined_call_operand.hbm [shape: bf16[128,16384], index: 1, kind: input, shape index: {}]   ;;  %s2769_s2 = inlined_call_operand.hbm [shape: f32[1,16384], index: 2, kind: input, shape index: {}]   ;;  %s2770_s3 = inlined_call_operand.vmem [shape: bf16[16,16384], index: 3, kind: output, shape index: {}]  }
   0x1   :  { %10 = vsyncpa [#allocation4 + $0x1], 0 }
   0x2   :  { %11 = vsyncpa [#allocation6], 0 }
   0x3   :  { %13 = vsyncpa [#allocation6 + $0x1], 0  ;;  %s2374_s12 = smov 0   ;;  %s2376_s13 = smov 0  }
   0x4   :  { %s2378_s14 = smov 0   ;;  %s2380_s15 = smov 0  }
   0x5   :  { %s2382_s16 = smov 0   ;;  %s2384_s17 = smov 0  }
   0x6 LB: > { %s1983_s18 = sadd.s32 4294967295, %s2346_s17   ;;  %s34_s19 = sadd.s32 1, %s2342_s16  ;;  %s2346_s17 = sphi %s2384_s17, %s19_s17   ;;  %s2342_s16 = sphi %s2382_s16, %s2785_s16   ;;  %s2338_s15 = sphi %s2380_s15, %s2784_s15   ;;  %s2334_s14 = sphi %s2378_s14, %s2783_s14   ;;  %s2330_s13 = sphi %s2376_s13, %s2782_s13   ;;  %s2326_s12 = sphi %s2374_s12, %s2781_s12  }
   0x7   : > { %p36_p0 = scmp.ge.s32.totalorder %s34_s19, 8  ;;  %s75_s20 = sadd.s32 1, %s2334_s14 }
   0x8   : > { %p82_p1 = scmp.ne.s32.totalorder %s2334_s14, %s2330_s13  ;;  %p83_p2 = scmp.eq.s32.totalorder %s2346_s17, 0 }
   0x9   : > { %s2787_s19 = smov (%p36_p0, %s34_s19), 0  ;;  %p88_p4 = scmp.ne.s32.totalorder %s2330_s13, %s2326_s12 }
   0xa   : > { %p2410_p3 = por %p83_p2, %p82_p1  ;;  %s71_s22 = ssub.s32 %s2342_s16, %s2787_s19 }
   0xb   : > { %p89_p5 = scmp.eq.s32.totalorder %s1983_s18, 0  ;;  %p73_p6 = scmp.eq.s32.totalorder %s71_s22, 0 }
   0xc   : > { %p140_p7 = scmp.eq.s32.totalorder %s1983_s18, 7  ;;  %p2178_p10 = scmp.lt.s32.totalorder %s2346_s17, 8 }
   0xd   : > { %p2417_p8 = por %p89_p5, %p88_p4  ;;  %s2430_s26 = sand.u32 1, %s2334_s14  }
   0xe   : > { %s2422_s24 = scalar_select %p73_p6, %s2334_s14, %s75_s20  }
   0xf   : > { %s2773_s23 = scalar_select %p2417_p8, 1, 0 }
  0x10   : > { %p2424_p9 = por %p140_p7, %p82_p1  ;;  %s2148_s27 = sshll.u32 %s2342_s16, 10 }
  0x11   : > { %s1988_s28 = sshll.u32 %s2430_s26, 10  ;;  %s2437_s4 = scalar_lea.hbm %s2768_s1, %s2148_s27 }
  0x12   : > { %s2774_s25 = scalar_select %p2424_p9, 1, 0 }
  0x13   : > { %s182_s5 = scalar_lea.vmem [#allocation3], %s1988_s28  ;;  %p2441_p11 = pnand %p2178_p10, %p2410_p3 }
  0x14   : > { %s192_s6 = sshll.u32 %s182_s5, 4  ;;  %s179_s8 = scalar_lea.sflag [#allocation4], %s2430_s26  ;;  %s2445_s6 = int_to_ptr.vmem [resolvable:$true] %s192_s6 }
  0x15   : > { %s2232_s9 = scalar_lea.hbm %s2437_s4, 16384  ;;  %p2234_p0 = pneg %p2441_p11 }
  0x16   : > { %p2233_p13 = scmp.ne.s32.totalorder %s2437_s4, %s2232_s9  ;;  %s2237_s12 = scalar_lea.hbm %s2768_s1, 131072 }
  0x17   : > { %p2238_p3 = scmp.lt.u32.totalorder %s2437_s4, %s2768_s1  ;;  %p2239_p4 = scmp.lt.u32.totalorder %s2237_s12, %s2232_s9 }
  0x18   : > { %p2235_p1 = pnand %p2234_p0, %p2233_p13  ;;  %p2241_p6 = scmp.lt.u32.totalorder %s2232_s9, %s2437_s4 }
  0x19   : > { %p2240_p5 = por %p2239_p4, %p2238_p3 }
  0x1a   : > { %p2236_p2 = pneg %p2235_p1 }
  0x1b   : > { %p2242_p7 = por %p2241_p6, %p2240_p5 }
  0x1d   : > { %p2243_p10 = pnand %p2242_p7, %p2236_p2 }
  0x1f   : > { %2246 = shalt.err (!%p2243_p10)
}
  0x20   : > { %s2247_s21 = scalar_lea.vmem %s2445_s6, 16384  ;;  %s2348_s22 = smov [#allocation3]  }
  0x21   : > { %p2248_p13 = scmp.ne.s32.totalorder %s2445_s6, %s2247_s21  ;;  %s2252_s27 = sshll.u32 %s2348_s22, 4  ;;  %s2253_s27 = int_to_ptr.vmem [resolvable:$false] %s2252_s27 }
  0x22   : > { %s2254_s28 = scalar_lea.vmem %s2253_s27, 32768  ;;  %p2255_p9 = scmp.lt.s32.totalorder %s2445_s6, %s2253_s27 }
  0x23   : > { %p2250_p1 = pnand %p2248_p13, %p2234_p0  ;;  %p2256_p3 = scmp.lt.s32.totalorder %s2254_s28, %s2247_s21 }
  0x25   : > { %p2251_p12 = pneg %p2250_p1  ;;  %p2257_p4 = por %p2256_p3, %p2255_p9 }
  0x27   : > { %p2258_p5 = pnand %p2257_p4, %p2251_p12 }
  0x29   : > { %2261 = shalt.err (!%p2258_p5)
}
  0x2a   : > { %s2349_s29 = smov 8192   ;;  %s2350_s30 = smov 1024  }
  0x2b   : > { %s2351_s5 = smov 64   ;;  %p219_p2 = scmp.lt.s32.totalorder %s2346_s17, 9 }
  0x2c   : > { %2174 = dma.hbm_to_vmem [thread:$0]  (!%p2441_p11), %s2437_s4, 16384, %s2445_s6, %s179_s8, %s2349_s29, %s2350_s30, %s2351_s5  }
  0x2d   : > { %s1991_s9 = sshll.u32 %s2430_s26, 4  ;;  %s2149_s10 = sshll.u32 %s2342_s16, 8 }
  0x2e   : > { %p2776_p9 = scmp.ge.s32.totalorder %s2346_s17, 1  ;;  %s2488_s20 = scalar_lea.hbm %s2769_s2, %s2149_s10 }
  0x2f   : > { %s206_s21 = scalar_lea.vmem [#allocation5], %s1991_s9  ;;  %s203_s4 = scalar_lea.sflag [#allocation6], %s2430_s26 }
  0x30   : > { %p2481_p12 = pnand %p2776_p9, %p219_p2  ;;  %s214_s22 = sshll.u32 %s206_s21, 4  ;;  %s215_s22 = int_to_ptr.vmem [resolvable:$true] %s214_s22 }
  0x31   : > { %s2262_s6 = scalar_lea.hbm %s2488_s20, 256  ;;  %s2267_s28 = scalar_lea.hbm %s2769_s2, 2048 }
  0x32   : > { %s2777_s11 = scalar_select %p2481_p12, 1, 0 }
  0x33   : > { %p2263_p6 = scmp.ne.s32.totalorder %s2488_s20, %s2262_s6  ;;  %p2268_p13 = scmp.lt.u32.totalorder %s2488_s20, %s2769_s2 }
  0x34   : > { %p2269_p1 = scmp.lt.u32.totalorder %s2267_s28, %s2262_s6  ;;  %p2271_p4 = scmp.lt.u32.totalorder %s2262_s6, %s2488_s20 }
  0x35   : > { %p2265_p7 = pnand %p2263_p6, %p2234_p0 }
  0x36   : > { %p2270_p3 = por %p2269_p1, %p2268_p13 }
  0x37   : > { %p2266_p10 = pneg %p2265_p7 }
  0x38   : > { %p2272_p5 = por %p2271_p4, %p2270_p3 }
  0x3a   : > { %p2273_p2 = pnand %p2272_p5, %p2266_p10 }
  0x3c   : > { %2276 = shalt.err (!%p2273_p2)
}
  0x3d   : > { %s2277_s26 = scalar_lea.vmem %s215_s22, 256  ;;  %s2352_s5 = smov [#allocation5]  }
  0x3e   : > { %p2278_p9 = scmp.ne.s32.totalorder %s215_s22, %s2277_s26  ;;  %s2282_s9 = sshll.u32 %s2352_s5, 4  ;;  %s2283_s9 = int_to_ptr.vmem [resolvable:$false] %s2282_s9 }
  0x3f   : > { %s2284_s10 = scalar_lea.vmem %s2283_s9, 512  ;;  %p2285_p8 = scmp.lt.s32.totalorder %s215_s22, %s2283_s9 }
  0x40   : > { %p2280_p6 = pnand %p2278_p9, %p2234_p0  ;;  %p2286_p12 = scmp.lt.s32.totalorder %s2284_s10, %s2277_s26 }
  0x42   : > { %p2281_p7 = pneg %p2280_p6  ;;  %p2287_p1 = por %p2286_p12, %p2285_p8 }
  0x44   : > { %p2288_p13 = pnand %p2287_p1, %p2281_p7 }
  0x46   : > { %2291 = shalt.err (!%p2288_p13)
}
  0x47   : > { %2177 = dma.hbm_to_vmem [thread:$0]  (!%p2441_p11), %s2488_s20, 256, %s215_s22, %s203_s4  }
  0x48   : > { %p2778_p10 = scmp.ne.s32.totalorder %s2777_s11, 0 }
  0x49   : > { %s2513_s12 = sand.u32 (!%p2778_p10), 1, %s2330_s13   ;;  %p2779_p8 = scmp.ne.s32.totalorder (!%p2778_p10), %s2773_s23, 0 }
  0x4a   : > { %223 = sbr.rel (%p2778_p10) target bundleno = 445 (0x1bd), region = 32  ;;  %s1995_s18 = sshll.u32 (!%p2778_p10), %s2513_s12, 10 }
  0x4b   : > { %s226_s21 = scalar_lea.sflag (!%p2778_p10), [#allocation4], %s2513_s12  ;;  %s2517_s6 = scalar_lea.vmem (!%p2778_p10), [#allocation3], %s1995_s18 }
  0x51   : > { %2317 = dma.done.wait (%p2779_p8), %s226_s21, 16384  }
  0x52   : > { %2319 = vsyncadd (%p2779_p8), %s226_s21, 4294950912  ;;  %s1996_s7 = sshll.u32 %s2513_s12, 4  ;;  %s235_s11 = scalar_lea.sflag [#allocation6], %s2513_s12 }
  0x53   : > { %s2525_s20 = scalar_lea.vmem [#allocation5], %s1996_s7 }
  0x54   : > { %2321 = dma.done.wait (%p2779_p8), %s235_s11, 256  }
  0x55   : > { %2323 = vsyncadd (%p2779_p8), %s235_s11, 4294967040  ;;  %v2353_v0 = vmov 0   ;;  %v358_v1 = vld [vmem:[%s2517_s6] sm:$0xff]  ;;  %v359_v3 = vld [vmem:[%s2517_s6 + $0x8] sm:$0xff]  ;;  %s1997_s4 = sshll.u32 %s2513_s12, 7  ;;  %p2780_p11 = scmp.ne.s32.totalorder %s2774_s25, 0 }
  0x56   : > { %1164 = vmatprep.mubr.bf16.mxu0 %v2353_v0  ;;  %1207 = vmatprep.mubr.bf16.mxu1 %v2353_v0  ;;  %v366_v2 = vld [vmem:[%s2517_s6 + $0x40] sm:$0xff]  ;;  %v367_v5 = vld [vmem:[%s2517_s6 + $0x48] sm:$0xff]  ;;  %v360_v63 = vld [vmem:[%s2517_s6 + $0x10] sm:$0xff]  ;;  %s2696_s8 = scalar_lea.vmem [#allocation7], %s1997_s4  ;;  %s2166_s27 = sshll.u32 (%p2780_p11), %s2338_s15, 6 }
  0x57   : > { %v2000_v4 = vcombine.high %v358_v1, %v366_v2  ;;  %v1999_v6 = vcombine.low %v358_v1, %v366_v2  ;;  %v374_v7 = vld [vmem:[%s2517_s6 + $0x80] sm:$0xff]  ;;  %v2002_v9 = vcombine.high %v359_v3, %v367_v5  ;;  %v2001_v10 = vcombine.low %v359_v3, %v367_v5  ;;  %v375_v12 = vld [vmem:[%s2517_s6 + $0x88] sm:$0xff]  ;;  %v368_v1 = vld [vmem:[%s2517_s6 + $0x50] sm:$0xff]  ;;  %s1815_s30 = scalar_lea.vmem (%p2780_p11), %s2770_s3, %s2166_s27 }
  0x58   : > { %v382_v8 = vld [vmem:[%s2517_s6 + $0xc0] sm:$0xff]  ;;  %v383_v13 = vld [vmem:[%s2517_s6 + $0xc8] sm:$0xff]  ;;  %v361_v2 = vld [vmem:[%s2517_s6 + $0x18] sm:$0xff] }
  0x59   : > { %v2016_v11 = vcombine.high %v374_v7, %v382_v8  ;;  %v390_v14 = vld [vmem:[%s2517_s6 + $0x100] sm:$0xff]  ;;  %1132 = vmatprep.subr.bf16.mxu0 %v2000_v4  ;;  %v2018_v15 = vcombine.high %v375_v12, %v383_v13  ;;  %v391_v17 = vld [vmem:[%s2517_s6 + $0x108] sm:$0xff]  ;;  %1175 = vmatprep.subr.bf16.mxu1 %v2002_v9  ;;  %v2015_v19 = vcombine.low %v374_v7, %v382_v8  ;;  %v369_v3 = vld [vmem:[%s2517_s6 + $0x58] sm:$0xff] }
  0x5a   : > { %v398_v16 = vld [vmem:[%s2517_s6 + $0x140] sm:$0xff]  ;;  %v399_v18 = vld [vmem:[%s2517_s6 + $0x148] sm:$0xff]  ;;  %1133 = vmatpush1.bf16.msra.mxu0 %v1999_v6  ;;  %1176 = vmatpush1.bf16.msra.mxu1 %v2001_v10  ;;  %v2017_v20 = vcombine.low %v375_v12, %v383_v13  ;;  %v2004_v6 = vcombine.high %v360_v63, %v368_v1  ;;  %v2006_v7 = vcombine.high %v361_v2, %v369_v3  ;;  %v376_v8 = vld [vmem:[%s2517_s6 + $0x90] sm:$0xff] }
  0x5b   : > { %1134 = vmatprep.subr.bf16.mxu0 %v2016_v11  ;;  %v2032_v21 = vcombine.high %v390_v14, %v398_v16  ;;  %1177 = vmatprep.subr.bf16.mxu1 %v2018_v15  ;;  %v2034_v22 = vcombine.high %v391_v17, %v399_v18  ;;  %v406_v23 = vld [vmem:[%s2517_s6 + $0x180] sm:$0xff]  ;;  %v407_v25 = vld [vmem:[%s2517_s6 + $0x188] sm:$0xff]  ;;  %v2031_v27 = vcombine.low %v390_v14, %v398_v16  ;;  %v384_v9 = vld [vmem:[%s2517_s6 + $0xd0] sm:$0xff] }
  0x5c   : > { %v414_v24 = vld [vmem:[%s2517_s6 + $0x1c0] sm:$0xff]  ;;  %v415_v26 = vld [vmem:[%s2517_s6 + $0x1c8] sm:$0xff]  ;;  %v2033_v28 = vcombine.low %v391_v17, %v399_v18  ;;  %v377_v11 = vld [vmem:[%s2517_s6 + $0x98] sm:$0xff]  ;;  %v2003_v13 = vcombine.low %v360_v63, %v368_v1  ;;  %v2005_v14 = vcombine.low %v361_v2, %v369_v3  ;;  %v2020_v15 = vcombine.high %v376_v8, %v384_v9 }
  0x5d   : > { %v2048_v29 = vcombine.high %v406_v23, %v414_v24  ;;  %v2050_v30 = vcombine.high %v407_v25, %v415_v26  ;;  %v422_v31 = vld [vmem:[%s2517_s6 + $0x200] sm:$0xff]  ;;  %v423_v33 = vld [vmem:[%s2517_s6 + $0x208] sm:$0xff]  ;;  %v2047_v35 = vcombine.low %v406_v23, %v414_v24  ;;  %v2049_v36 = vcombine.low %v407_v25, %v415_v26  ;;  %v385_v12 = vld [vmem:[%s2517_s6 + $0xd8] sm:$0xff] }
  0x5e   : > { %1135 = vmatpush1.bf16.msra.mxu0 %v2015_v19  ;;  %1178 = vmatpush1.bf16.msra.mxu1 %v2017_v20  ;;  %v430_v32 = vld [vmem:[%s2517_s6 + $0x240] sm:$0xff]  ;;  %v431_v34 = vld [vmem:[%s2517_s6 + $0x248] sm:$0xff]  ;;  %v2022_v16 = vcombine.high %v377_v11, %v385_v12  ;;  %v392_v17 = vld [vmem:[%s2517_s6 + $0x110] sm:$0xff] }
  0x5f   : > { %1136 = vmatprep.subr.bf16.mxu0 %v2032_v21  ;;  %1179 = vmatprep.subr.bf16.mxu1 %v2034_v22  ;;  %v2064_v37 = vcombine.high %v422_v31, %v430_v32  ;;  %v2066_v38 = vcombine.high %v423_v33, %v431_v34  ;;  %v438_v39 = vld [vmem:[%s2517_s6 + $0x280] sm:$0xff]  ;;  %v439_v41 = vld [vmem:[%s2517_s6 + $0x288] sm:$0xff]  ;;  %v2063_v43 = vcombine.low %v422_v31, %v430_v32  ;;  %v400_v18 = vld [vmem:[%s2517_s6 + $0x150] sm:$0xff] }
  0x60   : > { %v446_v40 = vld [vmem:[%s2517_s6 + $0x2c0] sm:$0xff]  ;;  %v447_v42 = vld [vmem:[%s2517_s6 + $0x2c8] sm:$0xff]  ;;  %v2065_v44 = vcombine.low %v423_v33, %v431_v34  ;;  %v393_v19 = vld [vmem:[%s2517_s6 + $0x118] sm:$0xff]  ;;  %v2019_v21 = vcombine.low %v376_v8, %v384_v9  ;;  %v2021_v22 = vcombine.low %v377_v11, %v385_v12  ;;  %v2036_v23 = vcombine.high %v392_v17, %v400_v18 }
  0x61   : > { %v2080_v45 = vcombine.high %v438_v39, %v446_v40  ;;  %v2082_v46 = vcombine.high %v439_v41, %v447_v42  ;;  %v454_v47 = vld [vmem:[%s2517_s6 + $0x300] sm:$0xff]  ;;  %v455_v49 = vld [vmem:[%s2517_s6 + $0x308] sm:$0xff]  ;;  %v2079_v51 = vcombine.low %v438_v39, %v446_v40  ;;  %v2081_v52 = vcombine.low %v439_v41, %v447_v42  ;;  %v401_v20 = vld [vmem:[%s2517_s6 + $0x158] sm:$0xff] }
  0x62   : > { %1137 = vmatpush1.bf16.msra.mxu0 %v2031_v27  ;;  %1180 = vmatpush1.bf16.msra.mxu1 %v2033_v28  ;;  %v462_v48 = vld [vmem:[%s2517_s6 + $0x340] sm:$0xff]  ;;  %v463_v50 = vld [vmem:[%s2517_s6 + $0x348] sm:$0xff]  ;;  %v2038_v24 = vcombine.high %v393_v19, %v401_v20  ;;  %v408_v25 = vld [vmem:[%s2517_s6 + $0x190] sm:$0xff] }
  0x63   : > { %1138 = vmatprep.subr.bf16.mxu0 %v2048_v29  ;;  %1181 = vmatprep.subr.bf16.mxu1 %v2050_v30  ;;  %v2096_v53 = vcombine.high %v454_v47, %v462_v48  ;;  %v2098_v54 = vcombine.high %v455_v49, %v463_v50  ;;  %v470_v55 = vld [vmem:[%s2517_s6 + $0x380] sm:$0xff]  ;;  %v471_v57 = vld [vmem:[%s2517_s6 + $0x388] sm:$0xff]  ;;  %v2095_v59 = vcombine.low %v454_v47, %v462_v48  ;;  %v416_v26 = vld [vmem:[%s2517_s6 + $0x1d0] sm:$0xff] }
  0x64   : > { %v478_v56 = vld [vmem:[%s2517_s6 + $0x3c0] sm:$0xff]  ;;  %v479_v58 = vld [vmem:[%s2517_s6 + $0x3c8] sm:$0xff]  ;;  %v2097_v60 = vcombine.low %v455_v49, %v463_v50  ;;  %v409_v27 = vld [vmem:[%s2517_s6 + $0x198] sm:$0xff]  ;;  %v2035_v29 = vcombine.low %v392_v17, %v400_v18  ;;  %v2037_v30 = vcombine.low %v393_v19, %v401_v20  ;;  %v2052_v31 = vcombine.high %v408_v25, %v416_v26 }
  0x65   : > { %v2112_v61 = vcombine.high %v470_v55, %v478_v56  ;;  %v2114_v62 = vcombine.high %v471_v57, %v479_v58  ;;  %v2111_v4 = vcombine.low %v470_v55, %v478_v56  ;;  %v2113_v5 = vcombine.low %v471_v57, %v479_v58  ;;  %v2574_v10 = vld [vmem:[%s2767_s0] sm:$0xff]   ;;  %v417_v28 = vld [vmem:[%s2517_s6 + $0x1d8] sm:$0xff]  ;;  %v424_v33 = vld [vmem:[%s2517_s6 + $0x210] sm:$0xff] }
  0x66   : > { %1139 = vmatpush1.bf16.msra.mxu0 %v2047_v35  ;;  %1182 = vmatpush1.bf16.msra.mxu1 %v2049_v36  ;;  %v2054_v32 = vcombine.high %v409_v27, %v417_v28  ;;  %v432_v34 = vld [vmem:[%s2517_s6 + $0x250] sm:$0xff]  ;;  %v425_v35 = vld [vmem:[%s2517_s6 + $0x218] sm:$0xff]  ;;  %v362_v2 = vld [vmem:[%s2517_s6 + $0x20] sm:$0xff] }
  0x67   : > { %1140 = vmatprep.subr.bf16.mxu0 %v2064_v37  ;;  %1183 = vmatprep.subr.bf16.mxu1 %v2066_v38  ;;  %v433_v36 = vld [vmem:[%s2517_s6 + $0x258] sm:$0xff]  ;;  %v2051_v37 = vcombine.low %v408_v25, %v416_v26  ;;  %v2053_v38 = vcombine.low %v409_v27, %v417_v28  ;;  %v2068_v39 = vcombine.high %v424_v33, %v432_v34  ;;  %v440_v41 = vld [vmem:[%s2517_s6 + $0x290] sm:$0xff]  ;;  %v370_v3 = vld [vmem:[%s2517_s6 + $0x60] sm:$0xff] }
  0x68   : > { %v2070_v40 = vcombine.high %v425_v35, %v433_v36  ;;  %v448_v42 = vld [vmem:[%s2517_s6 + $0x2d0] sm:$0xff]  ;;  %v2008_v8 = vcombine.high %v362_v2, %v370_v3  ;;  %v378_v11 = vld [vmem:[%s2517_s6 + $0xa0] sm:$0xff] }
  0x69   : > { %v2084_v47 = vcombine.high %v440_v41, %v448_v42  ;;  %v456_v49 = vld [vmem:[%s2517_s6 + $0x310] sm:$0xff]  ;;  %v386_v12 = vld [vmem:[%s2517_s6 + $0xe0] sm:$0xff] }
  0x6a   : > { %1141 = vmatpush1.bf16.msra.mxu0 %v2063_v43  ;;  %1184 = vmatpush1.bf16.msra.mxu1 %v2065_v44  ;;  %v441_v43 = vld [vmem:[%s2517_s6 + $0x298] sm:$0xff]  ;;  %v464_v50 = vld [vmem:[%s2517_s6 + $0x350] sm:$0xff]  ;;  %v2024_v17 = vcombine.high %v378_v11, %v386_v12  ;;  %v394_v19 = vld [vmem:[%s2517_s6 + $0x120] sm:$0xff] }
  0x6b   : > { %1142 = vmatprep.subr.bf16.mxu0 %v2080_v45  ;;  %1185 = vmatprep.subr.bf16.mxu1 %v2082_v46  ;;  %v449_v44 = vld [vmem:[%s2517_s6 + $0x2d8] sm:$0xff]  ;;  %v2067_v45 = vcombine.low %v424_v33, %v432_v34  ;;  %v2069_v46 = vcombine.low %v425_v35, %v433_v36  ;;  %v2100_v55 = vcombine.high %v456_v49, %v464_v50  ;;  %v472_v57 = vld [vmem:[%s2517_s6 + $0x390] sm:$0xff]  ;;  %v402_v20 = vld [vmem:[%s2517_s6 + $0x160] sm:$0xff] }
  0x6c   : > { %v2086_v48 = vcombine.high %v441_v43, %v449_v44  ;;  %v480_v58 = vld [vmem:[%s2517_s6 + $0x3d0] sm:$0xff]  ;;  %v2040_v25 = vcombine.high %v394_v19, %v402_v20  ;;  %v410_v27 = vld [vmem:[%s2517_s6 + $0x1a0] sm:$0xff] }
  0x6d   : > { %v2116_v63 = vcombine.high %v472_v57, %v480_v58  ;;  %v418_v28 = vld [vmem:[%s2517_s6 + $0x1e0] sm:$0xff] }
  0x6e   : > { %1143 = vmatpush1.bf16.msra.mxu0 %v2079_v51  ;;  %1186 = vmatpush1.bf16.msra.mxu1 %v2081_v52  ;;  %v457_v51 = vld [vmem:[%s2517_s6 + $0x318] sm:$0xff]  ;;  %v2056_v33 = vcombine.high %v410_v27, %v418_v28  ;;  %v426_v35 = vld [vmem:[%s2517_s6 + $0x220] sm:$0xff] }
  0x6f   : > { %1144 = vmatprep.subr.bf16.mxu0 %v2096_v53  ;;  %1187 = vmatprep.subr.bf16.mxu1 %v2098_v54  ;;  %v465_v52 = vld [vmem:[%s2517_s6 + $0x358] sm:$0xff]  ;;  %v2083_v53 = vcombine.low %v440_v41, %v448_v42  ;;  %v2085_v54 = vcombine.low %v441_v43, %v449_v44  ;;  %v434_v36 = vld [vmem:[%s2517_s6 + $0x260] sm:$0xff] }
  0x70   : > { %v2102_v56 = vcombine.high %v457_v51, %v465_v52  ;;  %v2072_v41 = vcombine.high %v426_v35, %v434_v36  ;;  %v442_v43 = vld [vmem:[%s2517_s6 + $0x2a0] sm:$0xff] }
  0x71   : > { %v450_v44 = vld [vmem:[%s2517_s6 + $0x2e0] sm:$0xff] }
  0x72   : > { %1145 = vmatpush1.bf16.msra.mxu0 %v2095_v59  ;;  %1188 = vmatpush1.bf16.msra.mxu1 %v2097_v60  ;;  %v473_v59 = vld [vmem:[%s2517_s6 + $0x398] sm:$0xff] }
  0x73   : > { %1146 = vmatprep.subr.bf16.mxu0 %v2112_v61  ;;  %1189 = vmatprep.subr.bf16.mxu1 %v2114_v62  ;;  %v481_v60 = vld [vmem:[%s2517_s6 + $0x3d8] sm:$0xff]  ;;  %v2099_v61 = vcombine.low %v456_v49, %v464_v50  ;;  %v2101_v62 = vcombine.low %v457_v51, %v465_v52  ;;  %v2088_v49 = vcombine.high %v442_v43, %v450_v44  ;;  %v458_v51 = vld [vmem:[%s2517_s6 + $0x320] sm:$0xff] }
  0x74   : > { %v2118_v1 = vcombine.high %v473_v59, %v481_v60  ;;  %v466_v52 = vld [vmem:[%s2517_s6 + $0x360] sm:$0xff] }
  0x76   : > { %1147 = vmatpush1.bf16.msra.mxu0 %v2111_v4  ;;  %1190 = vmatpush1.bf16.msra.mxu1 %v2113_v5  ;;  %v363_v4 = vld [vmem:[%s2517_s6 + $0x28] sm:$0xff] }
  0x77   : > { %1218 = vmatprep.subr.bf16.mxu0 %v2004_v6  ;;  %1261 = vmatprep.subr.bf16.mxu1 %v2006_v7  ;;  %v371_v5 = vld [vmem:[%s2517_s6 + $0x68] sm:$0xff]  ;;  %v2115_v6 = vcombine.low %v472_v57, %v480_v58  ;;  %v2117_v7 = vcombine.low %v473_v59, %v481_v60  ;;  %v2104_v57 = vcombine.high %v458_v51, %v466_v52  ;;  %v474_v59 = vld [vmem:[%s2517_s6 + $0x3a0] sm:$0xff] }
  0x78   : > { %v2010_v9 = vcombine.high %v363_v4, %v371_v5  ;;  %v482_v60 = vld [vmem:[%s2517_s6 + $0x3e0] sm:$0xff] }
  0x79   : > { %1165 = vmatmul.mubr.bf16.vlgmr.msra.gmra.mrb[0].mxu0 %v2574_v10  ;;  %1208 = vmatmul.mubr.bf16.vlgmr.msra.gmra.mrb[0].mxu1 %v2574_v10 }
  0x7a   : > { %1219 = vmatpush1.bf16.msra.mxu0 %v2003_v13  ;;  %1262 = vmatpush1.bf16.msra.mxu1 %v2005_v14  ;;  %v379_v13 = vld [vmem:[%s2517_s6 + $0xa8] sm:$0xff] }
  0x7b   : > { %1220 = vmatprep.subr.bf16.mxu0 %v2020_v15  ;;  %1263 = vmatprep.subr.bf16.mxu1 %v2022_v16  ;;  %v387_v14 = vld [vmem:[%s2517_s6 + $0xe8] sm:$0xff]  ;;  %v2007_v15 = vcombine.low %v362_v2, %v370_v3  ;;  %v2009_v16 = vcombine.low %v363_v4, %v371_v5  ;;  %v2120_v2 = vcombine.high %v474_v59, %v482_v60  ;;  %v364_v4 = vld [vmem:[%s2517_s6 + $0x30] sm:$0xff] }
  0x7c   : > { %1250 = vmatprep.mubr.bf16.mxu0 %v2353_v0  ;;  %1293 = vmatprep.mubr.bf16.mxu1 %v2353_v0  ;;  %v2026_v18 = vcombine.high %v379_v13, %v387_v14  ;;  %v372_v5 = vld [vmem:[%s2517_s6 + $0x70] sm:$0xff] }
  0x7e   : > { %1221 = vmatpush1.bf16.msra.mxu0 %v2019_v21  ;;  %1264 = vmatpush1.bf16.msra.mxu1 %v2021_v22  ;;  %v395_v21 = vld [vmem:[%s2517_s6 + $0x128] sm:$0xff] }
  0x7f   : > { %1222 = vmatprep.subr.bf16.mxu0 %v2036_v23  ;;  %1265 = vmatprep.subr.bf16.mxu1 %v2038_v24  ;;  %v403_v22 = vld [vmem:[%s2517_s6 + $0x168] sm:$0xff]  ;;  %v2023_v23 = vcombine.low %v378_v11, %v386_v12  ;;  %v2025_v24 = vcombine.low %v379_v13, %v387_v14  ;;  %v2012_v11 = vcombine.high %v364_v4, %v372_v5  ;;  %v380_v13 = vld [vmem:[%s2517_s6 + $0xb0] sm:$0xff] }
  0x80   : > { %v2042_v26 = vcombine.high %v395_v21, %v403_v22  ;;  %v388_v14 = vld [vmem:[%s2517_s6 + $0xf0] sm:$0xff] }
  0x82   : > { %1223 = vmatpush1.bf16.msra.mxu0 %v2035_v29  ;;  %1266 = vmatpush1.bf16.msra.mxu1 %v2037_v30  ;;  %v411_v29 = vld [vmem:[%s2517_s6 + $0x1a8] sm:$0xff] }
  0x83   : > { %1224 = vmatprep.subr.bf16.mxu0 %v2052_v31  ;;  %1267 = vmatprep.subr.bf16.mxu1 %v2054_v32  ;;  %v419_v30 = vld [vmem:[%s2517_s6 + $0x1e8] sm:$0xff]  ;;  %v2039_v31 = vcombine.low %v394_v19, %v402_v20  ;;  %v2041_v32 = vcombine.low %v395_v21, %v403_v22  ;;  %v2028_v19 = vcombine.high %v380_v13, %v388_v14  ;;  %v396_v21 = vld [vmem:[%s2517_s6 + $0x130] sm:$0xff] }
  0x84   : > { %v2058_v34 = vcombine.high %v411_v29, %v419_v30  ;;  %v404_v22 = vld [vmem:[%s2517_s6 + $0x170] sm:$0xff] }
  0x86   : > { %1225 = vmatpush1.bf16.msra.mxu0 %v2051_v37  ;;  %1268 = vmatpush1.bf16.msra.mxu1 %v2053_v38  ;;  %v427_v37 = vld [vmem:[%s2517_s6 + $0x228] sm:$0xff] }
  0x87   : > { %1226 = vmatprep.subr.bf16.mxu0 %v2068_v39  ;;  %1269 = vmatprep.subr.bf16.mxu1 %v2070_v40  ;;  %v435_v38 = vld [vmem:[%s2517_s6 + $0x268] sm:$0xff]  ;;  %v2055_v39 = vcombine.low %v410_v27, %v418_v28  ;;  %v2057_v40 = vcombine.low %v411_v29, %v419_v30  ;;  %v2044_v27 = vcombine.high %v396_v21, %v404_v22  ;;  %v412_v29 = vld [vmem:[%s2517_s6 + $0x1b0] sm:$0xff] }
  0x88   : > { %v2074_v42 = vcombine.high %v427_v37, %v435_v38  ;;  %v420_v30 = vld [vmem:[%s2517_s6 + $0x1f0] sm:$0xff] }
  0x8a   : > { %1227 = vmatpush1.bf16.msra.mxu0 %v2067_v45  ;;  %1270 = vmatpush1.bf16.msra.mxu1 %v2069_v46  ;;  %v443_v45 = vld [vmem:[%s2517_s6 + $0x2a8] sm:$0xff] }
  0x8b   : > { %1228 = vmatprep.subr.bf16.mxu0 %v2084_v47  ;;  %1271 = vmatprep.subr.bf16.mxu1 %v2086_v48  ;;  %v451_v46 = vld [vmem:[%s2517_s6 + $0x2e8] sm:$0xff]  ;;  %v2071_v47 = vcombine.low %v426_v35, %v434_v36  ;;  %v2073_v48 = vcombine.low %v427_v37, %v435_v38  ;;  %v2060_v35 = vcombine.high %v412_v29, %v420_v30  ;;  %v428_v37 = vld [vmem:[%s2517_s6 + $0x230] sm:$0xff] }
  0x8c   : > { %v2090_v50 = vcombine.high %v443_v45, %v451_v46  ;;  %v436_v38 = vld [vmem:[%s2517_s6 + $0x270] sm:$0xff] }
  0x8e   : > { %1229 = vmatpush1.bf16.msra.mxu0 %v2083_v53  ;;  %1272 = vmatpush1.bf16.msra.mxu1 %v2085_v54  ;;  %v459_v53 = vld [vmem:[%s2517_s6 + $0x328] sm:$0xff] }
  0x8f   : > { %1230 = vmatprep.subr.bf16.mxu0 %v2100_v55  ;;  %1273 = vmatprep.subr.bf16.mxu1 %v2102_v56  ;;  %v467_v54 = vld [vmem:[%s2517_s6 + $0x368] sm:$0xff]  ;;  %v2087_v55 = vcombine.low %v442_v43, %v450_v44  ;;  %v2089_v56 = vcombine.low %v443_v45, %v451_v46  ;;  %v444_v44 = vld [vmem:[%s2517_s6 + $0x2b0] sm:$0xff]  ;;  %v445_v46 = vld [vmem:[%s2517_s6 + $0x2b8] sm:$0xff] }
  0x90   : > { %v2106_v58 = vcombine.high %v459_v53, %v467_v54  ;;  %v452_v45 = vld [vmem:[%s2517_s6 + $0x2f0] sm:$0xff] }
  0x92   : > { %1231 = vmatpush1.bf16.msra.mxu0 %v2099_v61  ;;  %1274 = vmatpush1.bf16.msra.mxu1 %v2101_v62  ;;  %v475_v61 = vld [vmem:[%s2517_s6 + $0x3a8] sm:$0xff] }
  0x93   : > { %1232 = vmatprep.subr.bf16.mxu0 %v2116_v63  ;;  %1275 = vmatprep.subr.bf16.mxu1 %v2118_v1  ;;  %v483_v62 = vld [vmem:[%s2517_s6 + $0x3e8] sm:$0xff]  ;;  %v2103_v63 = vcombine.low %v458_v51, %v466_v52  ;;  %v2105_v1 = vcombine.low %v459_v53, %v467_v54  ;;  %v460_v52 = vld [vmem:[%s2517_s6 + $0x330] sm:$0xff]  ;;  %v461_v54 = vld [vmem:[%s2517_s6 + $0x338] sm:$0xff] }
  0x94   : > { %v2122_v3 = vcombine.high %v475_v61, %v483_v62  ;;  %v468_v53 = vld [vmem:[%s2517_s6 + $0x370] sm:$0xff] }
  0x96   : > { %1233 = vmatpush1.bf16.msra.mxu0 %v2115_v6  ;;  %1276 = vmatpush1.bf16.msra.mxu1 %v2117_v7  ;;  %v365_v6 = vld [vmem:[%s2517_s6 + $0x38] sm:$0xff] }
  0x97   : > { %1304 = vmatprep.subr.bf16.mxu0 %v2008_v8  ;;  %1347 = vmatprep.subr.bf16.mxu1 %v2010_v9  ;;  %v373_v7 = vld [vmem:[%s2517_s6 + $0x78] sm:$0xff]  ;;  %v2119_v8 = vcombine.low %v474_v59, %v482_v60  ;;  %v2121_v9 = vcombine.low %v475_v61, %v483_v62  ;;  %v476_v60 = vld [vmem:[%s2517_s6 + $0x3b0] sm:$0xff] }
  0x98   : > { %v2014_v12 = vcombine.high %v365_v6, %v373_v7  ;;  %v484_v61 = vld [vmem:[%s2517_s6 + $0x3f0] sm:$0xff]  ;;  %v477_v62 = vld [vmem:[%s2517_s6 + $0x3b8] sm:$0xff] }
  0x99   : > { %1251 = vmatmul.mubr.bf16.vlgmr.msra.gmra.mrb[4].mxu0 %v2574_v10  ;;  %1294 = vmatmul.mubr.bf16.vlgmr.msra.gmra.mrb[4].mxu1 %v2574_v10 }
  0x9a   : > { %1305 = vmatpush1.bf16.msra.mxu0 %v2007_v15  ;;  %1348 = vmatpush1.bf16.msra.mxu1 %v2009_v16  ;;  %v381_v15 = vld [vmem:[%s2517_s6 + $0xb8] sm:$0xff] }
  0x9b   : > { %1306 = vmatprep.subr.bf16.mxu0 %v2024_v17  ;;  %1349 = vmatprep.subr.bf16.mxu1 %v2026_v18  ;;  %v389_v16 = vld [vmem:[%s2517_s6 + $0xf8] sm:$0xff]  ;;  %v2011_v17 = vcombine.low %v364_v4, %v372_v5  ;;  %v2013_v18 = vcombine.low %v365_v6, %v373_v7  ;;  %v2123_v5 = vcombine.low %v476_v60, %v484_v61  ;;  %v1579_v7 = vlaneseq }
  0x9c   : > { %1336 = vmatprep.mubr.bf16.mxu0 %v2353_v0  ;;  %1379 = vmatprep.mubr.bf16.mxu1 %v2353_v0  ;;  %v2030_v20 = vcombine.high %v381_v15, %v389_v16 }
  0x9e   : > { %1307 = vmatpush1.bf16.msra.mxu0 %v2023_v23  ;;  %1350 = vmatpush1.bf16.msra.mxu1 %v2025_v24  ;;  %v397_v23 = vld [vmem:[%s2517_s6 + $0x138] sm:$0xff] }
  0x9f   : > { %1308 = vmatprep.subr.bf16.mxu0 %v2040_v25  ;;  %1351 = vmatprep.subr.bf16.mxu1 %v2042_v26  ;;  %v405_v24 = vld [vmem:[%s2517_s6 + $0x178] sm:$0xff]  ;;  %v2027_v25 = vcombine.low %v380_v13, %v388_v14  ;;  %v2029_v26 = vcombine.low %v381_v15, %v389_v16 }
  0xa0   : > { %v2046_v28 = vcombine.high %v397_v23, %v405_v24 }
  0xa2   : > { %1309 = vmatpush1.bf16.msra.mxu0 %v2039_v31  ;;  %1352 = vmatpush1.bf16.msra.mxu1 %v2041_v32  ;;  %v413_v31 = vld [vmem:[%s2517_s6 + $0x1b8] sm:$0xff] }
  0xa3   : > { %1310 = vmatprep.subr.bf16.mxu0 %v2056_v33  ;;  %1353 = vmatprep.subr.bf16.mxu1 %v2058_v34  ;;  %v421_v32 = vld [vmem:[%s2517_s6 + $0x1f8] sm:$0xff]  ;;  %v2043_v33 = vcombine.low %v396_v21, %v404_v22  ;;  %v2045_v34 = vcombine.low %v397_v23, %v405_v24 }
  0xa4   : > { %v2062_v36 = vcombine.high %v413_v31, %v421_v32 }
  0xa6   : > { %1311 = vmatpush1.bf16.msra.mxu0 %v2055_v39  ;;  %1354 = vmatpush1.bf16.msra.mxu1 %v2057_v40  ;;  %v429_v39 = vld [vmem:[%s2517_s6 + $0x238] sm:$0xff] }
  0xa7   : > { %1312 = vmatprep.subr.bf16.mxu0 %v2072_v41  ;;  %1355 = vmatprep.subr.bf16.mxu1 %v2074_v42  ;;  %v437_v40 = vld [vmem:[%s2517_s6 + $0x278] sm:$0xff]  ;;  %v2059_v41 = vcombine.low %v412_v29, %v420_v30  ;;  %v2076_v42 = vcombine.high %v428_v37, %v436_v38 }
  0xa8   : > { %v2078_v43 = vcombine.high %v429_v39, %v437_v40 }
  0xaa   : > { %1313 = vmatpush1.bf16.msra.mxu0 %v2071_v47  ;;  %1356 = vmatpush1.bf16.msra.mxu1 %v2073_v48  ;;  %v453_v47 = vld [vmem:[%s2517_s6 + $0x2f8] sm:$0xff]  ;;  %v2075_v48 = vcombine.low %v428_v37, %v436_v38 }
  0xab   : > { %1314 = vmatprep.subr.bf16.mxu0 %v2088_v49  ;;  %1357 = vmatprep.subr.bf16.mxu1 %v2090_v50  ;;  %v2077_v49 = vcombine.low %v429_v39, %v437_v40  ;;  %v2092_v50 = vcombine.high %v444_v44, %v452_v45  ;;  %v2094_v51 = vcombine.high %v445_v46, %v453_v47 }
  0xae   : > { %1315 = vmatpush1.bf16.msra.mxu0 %v2087_v55  ;;  %1358 = vmatpush1.bf16.msra.mxu1 %v2089_v56  ;;  %v469_v55 = vld [vmem:[%s2517_s6 + $0x378] sm:$0xff]  ;;  %v2091_v56 = vcombine.low %v444_v44, %v452_v45 }
  0xaf   : > { %1316 = vmatprep.subr.bf16.mxu0 %v2104_v57  ;;  %1359 = vmatprep.subr.bf16.mxu1 %v2106_v58  ;;  %v2093_v57 = vcombine.low %v445_v46, %v453_v47  ;;  %v2108_v58 = vcombine.high %v460_v52, %v468_v53  ;;  %v2110_v59 = vcombine.high %v461_v54, %v469_v55 }
  0xb2   : > { %1317 = vmatpush1.bf16.msra.mxu0 %v2103_v63  ;;  %1360 = vmatpush1.bf16.msra.mxu1 %v2105_v1  ;;  %v485_v63 = vld [vmem:[%s2517_s6 + $0x3f8] sm:$0xff]  ;;  %v2107_v1 = vcombine.low %v460_v52, %v468_v53 }
  0xb3   : > { %1318 = vmatprep.subr.bf16.mxu0 %v2120_v2  ;;  %1361 = vmatprep.subr.bf16.mxu1 %v2122_v3  ;;  %v2109_v2 = vcombine.low %v461_v54, %v469_v55  ;;  %v2124_v3 = vcombine.high %v476_v60, %v484_v61  ;;  %v2126_v4 = vcombine.high %v477_v62, %v485_v63 }
  0xb4   : > { %v2125_v6 = vcombine.low %v477_v62, %v485_v63 }
  0xb6   : > { %1319 = vmatpush1.bf16.msra.mxu0 %v2119_v8  ;;  %1362 = vmatpush1.bf16.msra.mxu1 %v2121_v9  ;;  %v2680_v8 = vshrl.u32 %v1579_v7, 7 }
  0xb7   : > { %1390 = vmatprep.subr.bf16.mxu0 %v2012_v11  ;;  %1433 = vmatprep.subr.bf16.mxu1 %v2014_v12  ;;  %v1575_v11 = vld [vmem:[%s2525_s20] sm:$0xff] }
  0xb8   : > { %v1581_v9 = vsub.s32 0, %v2680_v8  ;;  %v1589_v12 = vsub.s32 2, %v2680_v8  ;;  %v1585_v13 = vsub.s32 1, %v2680_v8  ;;  %v1593_v14 = vsub.s32 3, %v2680_v8 }
  0xb9   : > { %1337 = vmatmul.mubr.bf16.vlgmr.msra.gmra.mrb[8].mxu0 %v2574_v10  ;;  %1380 = vmatmul.mubr.bf16.vlgmr.msra.gmra.mrb[8].mxu1 %v2574_v10  ;;  %v1597_v38 = vsub.s32 4, %v2680_v8  ;;  %v1605_v39 = vsub.s32 6, %v2680_v8  ;;  %v1601_v40 = vsub.s32 5, %v2680_v8 }
  0xba   : > { %1391 = vmatpush1.bf16.msra.mxu0 %v2011_v17  ;;  %1434 = vmatpush1.bf16.msra.mxu1 %v2013_v18  ;;  %v1582_v15 = vrot.slane %v1575_v11, %v1581_v9  ;;  %v1590_v16 = vrot.slane %v1575_v11, %v1589_v12  ;;  %v1594_v17 = vrot.slane %v1575_v11, %v1593_v14 }
  0xbb   : > { %1392 = vmatprep.subr.bf16.mxu0 %v2028_v19  ;;  %1435 = vmatprep.subr.bf16.mxu1 %v2030_v20 }
  0xbc   : > { %1422 = vmatprep.mubr.bf16.mxu0 %v2353_v0  ;;  %1465 = vmatprep.mubr.bf16.mxu1 %v2353_v0  ;;  %v2061_v0 = vcombine.low %v413_v31, %v421_v32 }
  0xbe   : > { %1393 = vmatpush1.bf16.msra.mxu0 %v2027_v25  ;;  %1436 = vmatpush1.bf16.msra.mxu1 %v2029_v26 }
  0xbf   : > { %1394 = vmatprep.subr.bf16.mxu0 %v2044_v27  ;;  %1437 = vmatprep.subr.bf16.mxu1 %v2046_v28 }
  0xc2   : > { %1395 = vmatpush1.bf16.msra.mxu0 %v2043_v33  ;;  %1438 = vmatpush1.bf16.msra.mxu1 %v2045_v34 }
  0xc3   : > { %1396 = vmatprep.subr.bf16.mxu0 %v2060_v35  ;;  %1439 = vmatprep.subr.bf16.mxu1 %v2062_v36 }
  0xc6   : > { %1397 = vmatpush1.bf16.msra.mxu0 %v2059_v41  ;;  %1440 = vmatpush1.bf16.msra.mxu1 %v2061_v0  ;;  %v1609_v41 = vsub.s32 7, %v2680_v8  ;;  %v1598_v0 = vrot.slane %v1575_v11, %v1597_v38 }
  0xc7   : > { %1398 = vmatprep.subr.bf16.mxu0 %v2076_v42  ;;  %1441 = vmatprep.subr.bf16.mxu1 %v2078_v43  ;;  %v1606_v42 = vrot.slane %v1575_v11, %v1605_v39  ;;  %v1602_v43 = vrot.slane %v1575_v11, %v1601_v40 }
  0xc8   : > { %v1610_v44 = vrot.slane %v1575_v11, %v1609_v41 }
  0xca   : > { %1399 = vmatpush1.bf16.msra.mxu0 %v2075_v48  ;;  %1442 = vmatpush1.bf16.msra.mxu1 %v2077_v49 }
  0xcb   : > { %1400 = vmatprep.subr.bf16.mxu0 %v2092_v50  ;;  %1443 = vmatprep.subr.bf16.mxu1 %v2094_v51 }
  0xce   : > { %1401 = vmatpush1.bf16.msra.mxu0 %v2091_v56  ;;  %1444 = vmatpush1.bf16.msra.mxu1 %v2093_v57 }
  0xcf   : > { %1402 = vmatprep.subr.bf16.mxu0 %v2108_v58  ;;  %1445 = vmatprep.subr.bf16.mxu1 %v2110_v59 }
  0xd2   : > { %1403 = vmatpush1.bf16.msra.mxu0 %v2107_v1  ;;  %1446 = vmatpush1.bf16.msra.mxu1 %v2109_v2  ;;  %v1576_v2 = vld [vmem:[%s2525_s20 + $0x8] sm:$0xff] }
  0xd3   : > { %1404 = vmatprep.subr.bf16.mxu0 %v2124_v3  ;;  %1447 = vmatprep.subr.bf16.mxu1 %v2126_v4  ;;  %v1614_v3 = vrot.slane %v1576_v2, %v1581_v9  ;;  %v1622_v4 = vrot.slane %v1576_v2, %v1589_v12 }
  0xd6   : > { %1405 = vmatpush1.bf16.msra.mxu0 %v2123_v5  ;;  %1448 = vmatpush1.bf16.msra.mxu1 %v2125_v6  ;;  %v1618_v5 = vrot.slane %v1576_v2, %v1585_v13  ;;  %v1626_v6 = vrot.slane %v1576_v2, %v1593_v14 }
  0xd9   : > { %1423 = vmatmul.mubr.bf16.vlgmr.msra.gmra.mrb[12].mxu0 %v2574_v10  ;;  %1466 = vmatmul.mubr.bf16.vlgmr.msra.gmra.mrb[12].mxu1 %v2574_v10  ;;  %v1586_v10 = vrot.slane %v1575_v11, %v1585_v13 }
 0x14c   : > { %v1166_v18 = vpop.f32.mrb[0].mxu0  ;;  %v1209_v20 = vpop.f32.mrb[0].mxu1 }
 0x14d   : > { %v1659_v19 = vadd.f32 %v1582_v15, %v1166_v18  ;;  %v1168_v21 = vpop.f32.mrb[1].mxu0  ;;  %v1661_v22 = vadd.f32 %v1590_v16, %v1209_v20  ;;  %v1211_v24 = vpop.f32.mrb[1].mxu1 }
 0x14e   : > { %v1660_v23 = vadd.f32 %v1586_v10, %v1168_v21  ;;  %v1170_v25 = vpop.f32.mrb[2].mxu0  ;;  %v1662_v26 = vadd.f32 %v1594_v17, %v1211_v24  ;;  %v1213_v28 = vpop.f32.mrb[2].mxu1 }
 0x14f   : > { %v1675_v27 = vadd.f32 %v1582_v15, %v1170_v25  ;;  %v1172_v29 = vpop.f32.mrb[3].mxu0  ;;  %v1677_v31 = vadd.f32 %v1590_v16, %v1213_v28  ;;  %v1215_v33 = vpop.f32.mrb[3].mxu1  ;;  %v1638_v28 = vrot.slane %v1576_v2, %v1605_v39 }
 0x150   : > { %v2150_v30 = vpack.c.bf16 %v1660_v23, %v1659_v19  ;;  %v1676_v32 = vadd.f32 %v1586_v10, %v1172_v29  ;;  %v2151_v34 = vpack.c.bf16 %v1662_v26, %v1661_v22  ;;  %v1678_v35 = vadd.f32 %v1594_v17, %v1215_v33 }
 0x151   : > { %v1634_v29 = vrot.slane %v1576_v2, %v1601_v40 }
 0x152   : > { %1787 = vst [vmem:[%s2696_s8] sm:$0xff] %v2150_v30  ;;  %v2158_v36 = vpack.c.bf16 %v1676_v32, %v1675_v27  ;;  %1788 = vst [vmem:[%s2696_s8 + $0x8] sm:$0xff] %v2151_v34  ;;  %v2159_v37 = vpack.c.bf16 %v1678_v35, %v1677_v31  ;;  %v1630_v27 = vrot.slane %v1576_v2, %v1597_v38 }
 0x153   : > { %v1642_v30 = vrot.slane %v1576_v2, %v1609_v41 }
 0x154   : > { %1795 = vst [vmem:[%s2696_s8 + $0x40] sm:$0xff] %v2158_v36  ;;  %1796 = vst [vmem:[%s2696_s8 + $0x48] sm:$0xff] %v2159_v37 }
 0x16c   : > { %v1252_v45 = vpop.f32.mrb[4].mxu0  ;;  %v1295_v47 = vpop.f32.mrb[4].mxu1 }
 0x16d   : > { %v1663_v46 = vadd.f32 %v1598_v0, %v1252_v45  ;;  %v1254_v48 = vpop.f32.mrb[5].mxu0  ;;  %v1665_v49 = vadd.f32 %v1606_v42, %v1295_v47  ;;  %v1297_v51 = vpop.f32.mrb[5].mxu1 }
 0x16e   : > { %v1664_v50 = vadd.f32 %v1602_v43, %v1254_v48  ;;  %v1256_v52 = vpop.f32.mrb[6].mxu0  ;;  %v1666_v53 = vadd.f32 %v1610_v44, %v1297_v51  ;;  %v1299_v55 = vpop.f32.mrb[6].mxu1  ;;  %v1830_v51 = vld [vmem:[%s2696_s8 + $0x8] sm:$0xff] (%p2780_p11) }
 0x16f   : > { %v1679_v54 = vadd.f32 %v1598_v0, %v1256_v52  ;;  %v1258_v56 = vpop.f32.mrb[7].mxu0  ;;  %v1681_v58 = vadd.f32 %v1606_v42, %v1299_v55  ;;  %v1301_v60 = vpop.f32.mrb[7].mxu1  ;;  %1831 = vst [vmem:[%s1815_s30 + $0x8] sm:$0xff] (%p2780_p11), %v1830_v51 }
 0x170   : > { %v2152_v57 = vpack.c.bf16 %v1664_v50, %v1663_v46  ;;  %v1680_v59 = vadd.f32 %v1602_v43, %v1258_v56  ;;  %v2153_v61 = vpack.c.bf16 %v1666_v53, %v1665_v49  ;;  %v1682_v62 = vadd.f32 %v1610_v44, %v1301_v60  ;;  %v1828_v50 = vld [vmem:[%s2696_s8] sm:$0xff] (%p2780_p11) }
 0x171   : > { %1829 = vst [vmem:[%s1815_s30] sm:$0xff] (%p2780_p11), %v1828_v50 }
 0x172   : > { %1789 = vst [vmem:[%s2696_s8 + $0x10] sm:$0xff] %v2152_v57  ;;  %v2160_v63 = vpack.c.bf16 %v1680_v59, %v1679_v54  ;;  %1790 = vst [vmem:[%s2696_s8 + $0x18] sm:$0xff] %v2153_v61  ;;  %v2161_v1 = vpack.c.bf16 %v1682_v62, %v1681_v58  ;;  %v1844_v58 = vld [vmem:[%s2696_s8 + $0x40] sm:$0xff] (%p2780_p11)  ;;  %v1846_v59 = vld [vmem:[%s2696_s8 + $0x48] sm:$0xff] (%p2780_p11) }
 0x173   : > { %1845 = vst [vmem:[%s1815_s30 + $0x200] sm:$0xff] (%p2780_p11), %v1844_v58  ;;  %1847 = vst [vmem:[%s1815_s30 + $0x208] sm:$0xff] (%p2780_p11), %v1846_v59 }
 0x174   : > { %1797 = vst [vmem:[%s2696_s8 + $0x50] sm:$0xff] %v2160_v63  ;;  %1798 = vst [vmem:[%s2696_s8 + $0x58] sm:$0xff] %v2161_v1 }
 0x179   : > { %v1832_v52 = vld [vmem:[%s2696_s8 + $0x10] sm:$0xff] (%p2780_p11)  ;;  %v1834_v53 = vld [vmem:[%s2696_s8 + $0x18] sm:$0xff] (%p2780_p11) }
 0x17a   : > { %1833 = vst [vmem:[%s1815_s30 + $0x10] sm:$0xff] (%p2780_p11), %v1832_v52  ;;  %1835 = vst [vmem:[%s1815_s30 + $0x18] sm:$0xff] (%p2780_p11), %v1834_v53 }
 0x17b   : > { %v1848_v60 = vld [vmem:[%s2696_s8 + $0x50] sm:$0xff] (%p2780_p11)  ;;  %v1850_v61 = vld [vmem:[%s2696_s8 + $0x58] sm:$0xff] (%p2780_p11) }
 0x17c   : > { %1849 = vst [vmem:[%s1815_s30 + $0x210] sm:$0xff] (%p2780_p11), %v1848_v60  ;;  %1851 = vst [vmem:[%s1815_s30 + $0x218] sm:$0xff] (%p2780_p11), %v1850_v61 }
 0x18c   : > { %v1338_v7 = vpop.f32.mrb[8].mxu0  ;;  %v1381_v15 = vpop.f32.mrb[8].mxu1 }
 0x18d   : > { %v1667_v11 = vadd.f32 %v1614_v3, %v1338_v7  ;;  %v1340_v16 = vpop.f32.mrb[9].mxu0  ;;  %v1669_v10 = vadd.f32 %v1622_v4, %v1381_v15  ;;  %v1383_v18 = vpop.f32.mrb[9].mxu1 }
 0x18e   : > { %v1668_v17 = vadd.f32 %v1618_v5, %v1340_v16  ;;  %v1342_v9 = vpop.f32.mrb[10].mxu0  ;;  %v1670_v19 = vadd.f32 %v1626_v6, %v1383_v18  ;;  %v1385_v20 = vpop.f32.mrb[10].mxu1 }
 0x18f   : > { %v1683_v12 = vadd.f32 %v1614_v3, %v1342_v9  ;;  %v1344_v21 = vpop.f32.mrb[11].mxu0  ;;  %v1685_v22 = vadd.f32 %v1622_v4, %v1385_v20  ;;  %v1387_v14 = vpop.f32.mrb[11].mxu1 }
 0x190   : > { %v2154_v13 = vpack.c.bf16 %v1668_v17, %v1667_v11  ;;  %v1684_v8 = vadd.f32 %v1618_v5, %v1344_v21  ;;  %v2155_v23 = vpack.c.bf16 %v1670_v19, %v1669_v10  ;;  %v1686_v24 = vadd.f32 %v1626_v6, %v1387_v14 }
 0x192   : > { %1791 = vst [vmem:[%s2696_s8 + $0x20] sm:$0xff] %v2154_v13  ;;  %v2162_v25 = vpack.c.bf16 %v1684_v8, %v1683_v12  ;;  %1792 = vst [vmem:[%s2696_s8 + $0x28] sm:$0xff] %v2155_v23  ;;  %v2163_v26 = vpack.c.bf16 %v1686_v24, %v1685_v22 }
 0x194   : > { %1799 = vst [vmem:[%s2696_s8 + $0x60] sm:$0xff] %v2162_v25  ;;  %1800 = vst [vmem:[%s2696_s8 + $0x68] sm:$0xff] %v2163_v26 }
 0x199   : > { %v1836_v54 = vld [vmem:[%s2696_s8 + $0x20] sm:$0xff] (%p2780_p11)  ;;  %v1838_v55 = vld [vmem:[%s2696_s8 + $0x28] sm:$0xff] (%p2780_p11) }
 0x19a   : > { %1837 = vst [vmem:[%s1815_s30 + $0x20] sm:$0xff] (%p2780_p11), %v1836_v54  ;;  %1839 = vst [vmem:[%s1815_s30 + $0x28] sm:$0xff] (%p2780_p11), %v1838_v55 }
 0x19b   : > { %v1852_v62 = vld [vmem:[%s2696_s8 + $0x60] sm:$0xff] (%p2780_p11)  ;;  %v1854_v63 = vld [vmem:[%s2696_s8 + $0x68] sm:$0xff] (%p2780_p11) }
 0x19c   : > { %1853 = vst [vmem:[%s1815_s30 + $0x220] sm:$0xff] (%p2780_p11), %v1852_v62  ;;  %1855 = vst [vmem:[%s1815_s30 + $0x228] sm:$0xff] (%p2780_p11), %v1854_v63 }
 0x1ac   : > { %v1424_v31 = vpop.f32.mrb[12].mxu0  ;;  %v1467_v33 = vpop.f32.mrb[12].mxu1 }
 0x1ad   : > { %v1671_v32 = vadd.f32 %v1630_v27, %v1424_v31  ;;  %v1426_v34 = vpop.f32.mrb[13].mxu0  ;;  %v1673_v35 = vadd.f32 %v1638_v28, %v1467_v33  ;;  %v1469_v37 = vpop.f32.mrb[13].mxu1 }
 0x1ae   : > { %v1672_v36 = vadd.f32 %v1634_v29, %v1426_v34  ;;  %v1428_v0 = vpop.f32.mrb[14].mxu0  ;;  %v1674_v42 = vadd.f32 %v1642_v30, %v1469_v37  ;;  %v1471_v44 = vpop.f32.mrb[14].mxu1  ;;  %1809 = sbr.rel (!%p2780_p11) target bundleno = 445 (0x1bd), region = 52 }
 0x1af   : > { %v1687_v43 = vadd.f32 %v1630_v27, %v1428_v0  ;;  %v1430_v45 = vpop.f32.mrb[15].mxu0  ;;  %v1689_v39 = vadd.f32 %v1638_v28, %v1471_v44  ;;  %v1473_v41 = vpop.f32.mrb[15].mxu1 }
 0x1b0   : > { %v2156_v38 = vpack.c.bf16 %v1672_v36, %v1671_v32  ;;  %v1688_v40 = vadd.f32 %v1634_v29, %v1430_v45  ;;  %v2157_v46 = vpack.c.bf16 %v1674_v42, %v1673_v35  ;;  %v1690_v47 = vadd.f32 %v1642_v30, %v1473_v41 }
 0x1b2   : > { %1793 = vst [vmem:[%s2696_s8 + $0x30] sm:$0xff] %v2156_v38  ;;  %v2164_v48 = vpack.c.bf16 %v1688_v40, %v1687_v43  ;;  %1794 = vst [vmem:[%s2696_s8 + $0x38] sm:$0xff] %v2157_v46  ;;  %v2165_v49 = vpack.c.bf16 %v1690_v47, %v1689_v39 }
 0x1b4   : > { %1801 = vst [vmem:[%s2696_s8 + $0x70] sm:$0xff] %v2164_v48  ;;  %1802 = vst [vmem:[%s2696_s8 + $0x78] sm:$0xff] %v2165_v49 }
 0x1b9   : > { %v1840_v56 = vld [vmem:[%s2696_s8 + $0x30] sm:$0xff]  ;;  %v1842_v57 = vld [vmem:[%s2696_s8 + $0x38] sm:$0xff] }
 0x1ba   : > { %1841 = vst [vmem:[%s1815_s30 + $0x30] sm:$0xff] %v1840_v56  ;;  %1843 = vst [vmem:[%s1815_s30 + $0x38] sm:$0xff] %v1842_v57 }
 0x1bb   : > { %v1856_v1 = vld [vmem:[%s2696_s8 + $0x70] sm:$0xff]  ;;  %v1858_v2 = vld [vmem:[%s2696_s8 + $0x78] sm:$0xff] }
 0x1bc   : > { %1857 = vst [vmem:[%s1815_s30 + $0x230] sm:$0xff] %v1856_v1  ;;  %1859 = vst [vmem:[%s1815_s30 + $0x238] sm:$0xff] %v1858_v2 }
 0x1bd PF: > { %s19_s17 = sadd.s32 1, %s2346_s17   ;;  %s2781_s12 = smov %s2330_s13 }
 0x1be   : > { %p16_p0 = scmp.ge.s32.totalorder %s19_s17, 10   ;;  %s2782_s13 = smov %s2334_s14 }
 0x1bf   : > { %s2783_s14 = smov %s2422_s24  ;;  %s2784_s15 = smov %s2342_s16 }
 0x1c0   : > { %s2785_s16 = smov %s2787_s19  ;;  %18 = sbr.rel (!%p16_p0) target bundleno = 6 (0x6), region = 119 }
 0x1c7   :  { %1875 = vsyncpa [#allocation4], 1 }
 0x1c8   :  { %1877 = vsyncpa [#allocation4 + $0x1], 1 }
 0x1c9   :  { %1878 = vsyncpa [#allocation6], 1 }
 0x1ca   :  { %1880 = vsyncpa [#allocation6 + $0x1], 1 }

// kernel: g_basic_forward.10
= control target key start
LH: loop header
LB: loop body
LE: loop exit
PB: predicated region body
PF: predicated region fallthrough
CT: control target
= control target key end

     0   :  { %s3136_s0 = inlined_call_operand.vmem [shape: bf16[64,4096], index: 0, kind: input, shape index: {}]   ;;  %s3137_s1 = inlined_call_operand.hbm [shape: bf16[4096,2048], index: 1, kind: input, shape index: {}]   ;;  %s3138_s2 = inlined_call_operand.vmem [shape: f32[1,2048], index: 2, kind: input, shape index: {}]   ;;  %s3139_s3 = inlined_call_operand.vmem [shape: bf16[64,2048], index: 3, kind: output, shape index: {}]  }
   0x1   :  { %3143 = sst [smem:[#allocation12_spill]] %s3136_s0 }
   0x2   :  { %8 = vsyncpa [#allocation5], 0 }
   0x3   :  { %10 = vsyncpa [#allocation5 + $0x1], 0  ;;  %s2650_s12 = smov 0   ;;  %s2652_s13 = smov 0  }
   0x4   :  { %s2654_s14 = smov 0   ;;  %s2656_s15 = smov 0  }
   0x5   :  { %s2658_s16 = smov 0   ;;  %s2660_s17 = smov 0  }
   0x6   :  { %s2662_s18 = smov 0   ;;  %s2664_s19 = smov 0  }
   0x7   :  { %s2666_s20 = smov 0   ;;  %s2668_s21 = smov 0  }
   0x8   :  { %s2670_s22 = smov 0   ;;  %s2672_s23 = smov 0  }
   0x9 LB: > { %3144 = sst [smem:[#allocation8_spill]] %s2619_s22  ;;  %s1952_s24 = sadd.s32 4294967295, %s2623_s23   ;;  %s2623_s23 = sphi %s2672_s23, %s16_s23   ;;  %s2619_s22 = sphi %s2670_s22, %s3157_s22   ;;  %s2615_s21 = sphi %s2668_s21, %s3167_s21   ;;  %s2611_s20 = sphi %s2666_s20, %s3166_s20   ;;  %s2607_s19 = sphi %s2664_s19, %s3165_s19   ;;  %s2603_s18 = sphi %s2662_s18, %s3164_s18   ;;  %s2599_s17 = sphi %s2660_s17, %s3163_s17   ;;  %s2595_s16 = sphi %s2658_s16, %s3162_s16   ;;  %s2591_s15 = sphi %s2656_s15, %s3161_s15   ;;  %s2587_s14 = sphi %s2654_s14, %s3160_s14   ;;  %s2583_s13 = sphi %s2652_s13, %s3159_s13   ;;  %s2579_s12 = sphi %s2650_s12, %s3158_s12  }
   0xa   : > { %s28_s25 = sadd.s32 1, %s2615_s21  ;;  %s31_s26 = sadd.s32 1, %s2619_s22 }
   0xb   : > { %p29_p0 = scmp.ge.s32.totalorder %s28_s25, 4  ;;  %s44_s27 = sadd.s32 1, %s2603_s18 }
   0xc   : > { %p51_p1 = scmp.ne.s32.totalorder %s2603_s18, %s2599_s17  ;;  %p52_p2 = scmp.eq.s32.totalorder %s2623_s23, 0 }
   0xd   : > { %s3169_s25 = smov (%p29_p0, %s28_s25), 0  ;;  %s3171_s26 = smov (!%p29_p0, %s31_s26), %s2619_s22 }
   0xe   : > { %3145 = sst [smem:[#allocation9_spill]] %s3169_s25  ;;  %s40_s28 = ssub.s32 %s2615_s21, %s3169_s25 }
   0xf   : > { %p33_p3 = scmp.ge.s32.totalorder %s3171_s26, 8  ;;  %p42_p4 = scmp.eq.s32.totalorder %s40_s28, 0 }
  0x10   : > { %p2722_p5 = por %p52_p2, %p51_p1  ;;  %s72_s30 = sadd.s32 1, %s2595_s16 }
  0x11   : > { %s3173_s26 = smov (%p33_p3, %s3171_s26), 0  ;;  %p79_p6 = scmp.ne.s32.totalorder %s2595_s16, %s2591_s15 }
  0x12   : > { %3147 = sst [smem:[#allocation10_spill]] %s3173_s26  ;;  %s68_s5 = ssub.s32 %s2619_s22, %s3173_s26 }
  0x13   : > { %s2730_s4 = scalar_select %p42_p4, %s2603_s18, %s44_s27  }
  0x14   : > { %s69_s6 = sor.u32 %s68_s5, %s40_s28  ;;  %p85_p7 = scmp.ne.s32.totalorder %s2591_s15, %s2587_s14 }
  0x15   : > { %3148 = sst [smem:[#allocation11_spill]] %s2730_s4  ;;  %p70_p8 = scmp.eq.s32.totalorder %s69_s6, 0 }
  0x16   : > { %p2738_p9 = por %p79_p6, %p52_p2  ;;  %p86_p10 = scmp.eq.s32.totalorder %s1952_s24, 0 }
  0x17   : > { %p124_p11 = scmp.eq.s32.totalorder %s68_s5, 0  ;;  %s126_s10 = sadd.s32 1, %s2583_s13 }
  0x18   : > { %s2745_s8 = scalar_select %p70_p8, %s2595_s16, %s72_s30  }
  0x19   : > { %p2747_p12 = por %p86_p10, %p85_p7  ;;  %p136_p13 = scmp.ne.s32.totalorder %s2583_s13, %s2579_s12 }
  0x1a   : > { %s2753_s11 = scalar_select %p124_p11, %s2583_s13, %s126_s10  }
  0x1b   : > { %p137_p0 = scmp.eq.s32.totalorder %s1952_s24, 31  ;;  %p1955_p2 = scmp.ge.s32.totalorder %s2623_s23, 32 }
  0x1d   : > { %p2759_p1 = por %p137_p0, %p136_p13  ;;  %159 = sbr.rel (%p1955_p2) target bundleno = 91 (0x5b), region = 16 }
  0x1f   : > { %s3151_s14 = scalar_select %p2759_p1, 1, 0 }
  0x24   : > { %162 = sbr.rel (!%p2722_p5) target bundleno = 62 (0x3e), region = 20  ;;  %s164_s27 = sand.u32 (%p2722_p5), 1, %s2603_s18  }
  0x25   : > { %s2144_s28 = sshll.u32 (%p2722_p5), %s2615_s21, 5  ;;  %s1956_s30 = sshll.u32 (%p2722_p5), %s164_s27, 8 }
  0x26   : > { %s3152_s0 = sld [smem:[#allocation12_spill]] (%p2722_p5)  ;;  %s2776_s24 = scalar_lea.vmem (%p2722_p5), [#allocation3], %s1956_s30 }
  0x2c   : > { %s2771_s10 = scalar_lea.vmem %s3152_s0, %s2144_s28 }
  0x2d   : > { %v185_v0 = vld [vmem:[%s2771_s10] sm:$0xff]  ;;  %v187_v1 = vld [vmem:[%s2771_s10 + $0x8] sm:$0xff]  ;;  %v189_v2 = vld [vmem:[%s2771_s10 + $0x10] sm:$0xff] }
  0x2e   : > { %186 = vst [vmem:[%s2776_s24] sm:$0xff] %v185_v0  ;;  %188 = vst [vmem:[%s2776_s24 + $0x8] sm:$0xff] %v187_v1  ;;  %v191_v3 = vld [vmem:[%s2771_s10 + $0x18] sm:$0xff]  ;;  %v193_v4 = vld [vmem:[%s2771_s10 + $0x80] sm:$0xff] }
  0x2f   : > { %190 = vst [vmem:[%s2776_s24 + $0x10] sm:$0xff] %v189_v2  ;;  %v195_v5 = vld [vmem:[%s2771_s10 + $0x88] sm:$0xff]  ;;  %192 = vst [vmem:[%s2776_s24 + $0x18] sm:$0xff] %v191_v3  ;;  %v197_v6 = vld [vmem:[%s2771_s10 + $0x90] sm:$0xff] }
  0x30   : > { %194 = vst [vmem:[%s2776_s24 + $0x20] sm:$0xff] %v193_v4  ;;  %196 = vst [vmem:[%s2776_s24 + $0x28] sm:$0xff] %v195_v5  ;;  %v199_v7 = vld [vmem:[%s2771_s10 + $0x98] sm:$0xff]  ;;  %v201_v8 = vld [vmem:[%s2771_s10 + $0x100] sm:$0xff] }
  0x31   : > { %198 = vst [vmem:[%s2776_s24 + $0x30] sm:$0xff] %v197_v6  ;;  %200 = vst [vmem:[%s2776_s24 + $0x38] sm:$0xff] %v199_v7  ;;  %v203_v9 = vld [vmem:[%s2771_s10 + $0x108] sm:$0xff]  ;;  %v205_v10 = vld [vmem:[%s2771_s10 + $0x110] sm:$0xff] }
  0x32   : > { %202 = vst [vmem:[%s2776_s24 + $0x40] sm:$0xff] %v201_v8  ;;  %v207_v11 = vld [vmem:[%s2771_s10 + $0x118] sm:$0xff]  ;;  %204 = vst [vmem:[%s2776_s24 + $0x48] sm:$0xff] %v203_v9  ;;  %v209_v12 = vld [vmem:[%s2771_s10 + $0x180] sm:$0xff] }
  0x33   : > { %206 = vst [vmem:[%s2776_s24 + $0x50] sm:$0xff] %v205_v10  ;;  %208 = vst [vmem:[%s2776_s24 + $0x58] sm:$0xff] %v207_v11  ;;  %v211_v13 = vld [vmem:[%s2771_s10 + $0x188] sm:$0xff]  ;;  %v213_v14 = vld [vmem:[%s2771_s10 + $0x190] sm:$0xff] }
  0x34   : > { %210 = vst [vmem:[%s2776_s24 + $0x60] sm:$0xff] %v209_v12  ;;  %212 = vst [vmem:[%s2776_s24 + $0x68] sm:$0xff] %v211_v13  ;;  %v215_v15 = vld [vmem:[%s2771_s10 + $0x198] sm:$0xff]  ;;  %v217_v16 = vld [vmem:[%s2771_s10 + $0x200] sm:$0xff] }
  0x35   : > { %214 = vst [vmem:[%s2776_s24 + $0x70] sm:$0xff] %v213_v14  ;;  %v219_v17 = vld [vmem:[%s2771_s10 + $0x208] sm:$0xff]  ;;  %216 = vst [vmem:[%s2776_s24 + $0x78] sm:$0xff] %v215_v15  ;;  %v221_v18 = vld [vmem:[%s2771_s10 + $0x210] sm:$0xff] }
  0x36   : > { %218 = vst [vmem:[%s2776_s24 + $0x80] sm:$0xff] %v217_v16  ;;  %220 = vst [vmem:[%s2776_s24 + $0x88] sm:$0xff] %v219_v17  ;;  %v223_v19 = vld [vmem:[%s2771_s10 + $0x218] sm:$0xff]  ;;  %v225_v20 = vld [vmem:[%s2771_s10 + $0x280] sm:$0xff] }
  0x37   : > { %222 = vst [vmem:[%s2776_s24 + $0x90] sm:$0xff] %v221_v18  ;;  %224 = vst [vmem:[%s2776_s24 + $0x98] sm:$0xff] %v223_v19  ;;  %v227_v21 = vld [vmem:[%s2771_s10 + $0x288] sm:$0xff]  ;;  %v229_v22 = vld [vmem:[%s2771_s10 + $0x290] sm:$0xff] }
  0x38   : > { %226 = vst [vmem:[%s2776_s24 + $0xa0] sm:$0xff] %v225_v20  ;;  %v231_v23 = vld [vmem:[%s2771_s10 + $0x298] sm:$0xff]  ;;  %228 = vst [vmem:[%s2776_s24 + $0xa8] sm:$0xff] %v227_v21  ;;  %v233_v24 = vld [vmem:[%s2771_s10 + $0x300] sm:$0xff] }
  0x39   : > { %230 = vst [vmem:[%s2776_s24 + $0xb0] sm:$0xff] %v229_v22  ;;  %232 = vst [vmem:[%s2776_s24 + $0xb8] sm:$0xff] %v231_v23  ;;  %v235_v25 = vld [vmem:[%s2771_s10 + $0x308] sm:$0xff]  ;;  %v237_v26 = vld [vmem:[%s2771_s10 + $0x310] sm:$0xff] }
  0x3a   : > { %234 = vst [vmem:[%s2776_s24 + $0xc0] sm:$0xff] %v233_v24  ;;  %236 = vst [vmem:[%s2776_s24 + $0xc8] sm:$0xff] %v235_v25  ;;  %v239_v27 = vld [vmem:[%s2771_s10 + $0x318] sm:$0xff]  ;;  %v241_v28 = vld [vmem:[%s2771_s10 + $0x380] sm:$0xff] }
  0x3b   : > { %238 = vst [vmem:[%s2776_s24 + $0xd0] sm:$0xff] %v237_v26  ;;  %v243_v29 = vld [vmem:[%s2771_s10 + $0x388] sm:$0xff]  ;;  %240 = vst [vmem:[%s2776_s24 + $0xd8] sm:$0xff] %v239_v27  ;;  %v245_v30 = vld [vmem:[%s2771_s10 + $0x390] sm:$0xff] }
  0x3c   : > { %242 = vst [vmem:[%s2776_s24 + $0xe0] sm:$0xff] %v241_v28  ;;  %244 = vst [vmem:[%s2776_s24 + $0xe8] sm:$0xff] %v243_v29  ;;  %v247_v31 = vld [vmem:[%s2771_s10 + $0x398] sm:$0xff] }
  0x3d   : > { %246 = vst [vmem:[%s2776_s24 + $0xf0] sm:$0xff] %v245_v30  ;;  %248 = vst [vmem:[%s2776_s24 + $0xf8] sm:$0xff] %v247_v31 }
  0x3e PF: > { %s255_s29 = sand.u32 1, %s2595_s16   ;;  %s1961_s27 = sshll.u32 %s2619_s22, 1 }
  0x3f   : > { %s1959_s28 = sshll.u32 %s255_s29, 10  ;;  %s2145_s30 = sshll.u32 %s2615_s21, 11 }
  0x40   : > { %s266_s5 = sadd.s32 %s2145_s30, %s1961_s27  ;;  %s259_s6 = scalar_lea.vmem [#allocation4], %s1959_s28 }
  0x41   : > { %s269_s0 = sshll.u32 %s259_s6, 4  ;;  %s1963_s26 = sshll.u32 %s266_s5, 6  ;;  %s2842_s0 = int_to_ptr.vmem [resolvable:$true] %s269_s0 }
  0x42   : > { %s2847_s10 = scalar_lea.hbm %s3137_s1, %s1963_s26  ;;  %s2849_s24 = scalar_lea.sflag [#allocation5], %s255_s29 }
  0x43   : > { %s2497_s22 = scalar_lea.hbm %s2847_s10, 16384  ;;  %s2501_s30 = scalar_lea.hbm %s3137_s1, 524288 }
  0x44   : > { %p2498_p3 = scmp.ne.s32.totalorder %s2847_s10, %s2497_s22  ;;  %p2502_p6 = scmp.lt.u32.totalorder %s2847_s10, %s3137_s1 }
  0x45   : > { %p2503_p7 = scmp.lt.u32.totalorder %s2501_s30, %s2497_s22  ;;  %p2505_p10 = scmp.lt.u32.totalorder %s2497_s22, %s2847_s10 }
  0x46   : > { %p2499_p4 = pnand %p2498_p3, %p2738_p9 }
  0x47   : > { %p2504_p8 = por %p2503_p7, %p2502_p6 }
  0x48   : > { %p2500_p5 = pneg %p2499_p4 }
  0x49   : > { %p2506_p11 = por %p2505_p10, %p2504_p8 }
  0x4b   : > { %p2507_p13 = pnand %p2506_p11, %p2500_p5 }
  0x4d   : > { %2510 = shalt.err (!%p2507_p13)
}
  0x4e   : > { %s2511_s25 = scalar_lea.vmem %s2842_s0, 16384  ;;  %s2625_s26 = smov [#allocation4]  }
  0x4f   : > { %p2512_p0 = scmp.ne.s32.totalorder %s2842_s0, %s2511_s25  ;;  %s2515_s4 = sshll.u32 %s2625_s26, 4  ;;  %s2516_s4 = int_to_ptr.vmem [resolvable:$false] %s2515_s4 }
  0x50   : > { %s2517_s29 = scalar_lea.vmem %s2516_s4, 32768  ;;  %p2518_p4 = scmp.lt.s32.totalorder %s2842_s0, %s2516_s4 }
  0x51   : > { %p2513_p2 = pnand %p2512_p0, %p2738_p9  ;;  %p2519_p1 = scmp.lt.s32.totalorder %s2517_s29, %s2511_s25 }
  0x53   : > { %p2514_p3 = pneg %p2513_p2  ;;  %p2520_p6 = por %p2519_p1, %p2518_p4 }
  0x55   : > { %p2521_p7 = pnand %p2520_p6, %p2514_p3 }
  0x57   : > { %2524 = shalt.err (!%p2521_p7)
}
  0x58   : > { %s2626_s22 = smov 1024   ;;  %s2627_s27 = smov 128  }
  0x59   : > { %s2628_s28 = smov 8  }
  0x5a   : > { %2203 = dma.hbm_to_vmem [thread:$0]  (%p2738_p9), %s2847_s10, 16384, %s2842_s0, %s2849_s24, %s2626_s22, %s2627_s27, %s2628_s28  }
  0x5b PF: > { %p1964_p5 = scmp.ge.s32.totalorder %s2623_s23, 1  ;;  %p285_p8 = scmp.lt.s32.totalorder %s2623_s23, 33 }
  0x5d   : > { %p286_p10 = pnand %p1964_p5, %p285_p8 }
  0x5e   : > { %s292_s30 = sand.u32 (!%p286_p10), 1, %s2599_s17   ;;  %s298_s5 = sand.u32 (!%p286_p10), 1, %s2591_s15  }
  0x5f   : > { %289 = sbr.rel (%p286_p10) target bundleno = 510 (0x1fe), region = 51  ;;  %s1965_s6 = sshll.u32 (!%p286_p10), %s292_s30, 8 }
  0x60   : > { %s1966_s25 = sshll.u32 (!%p286_p10), %s298_s5, 10  ;;  %s2877_s26 = scalar_lea.vmem (!%p286_p10), [#allocation3], %s1965_s6 }
  0x61   : > { %s299_s4 = scalar_lea.sflag (!%p286_p10), [#allocation5], %s298_s5  ;;  %s2879_s29 = scalar_lea.vmem (!%p286_p10), [#allocation4], %s1966_s25 }
  0x66   : > { %2574 = dma.done.wait (%p2747_p12), %s299_s4, 16384  }
  0x67   : > { %2576 = vsyncadd (%p2747_p12), %s299_s4, 4294950912  ;;  %s329_s0 = sand.u32 1, %s2579_s12   ;;  %s1968_s7 = sshll.u32 %s2611_s20, 1 }
  0x68   : > { %s1967_s10 = sshll.u32 %s329_s0, 6  ;;  %p337_p9 = scmp.lt.s32.totalorder %s1968_s7, 15 }
  0x69   : > { %s2893_s27 = scalar_lea.vmem [#allocation6], %s1967_s10  ;;  %p1969_p1 = scmp.ne.s32.totalorder %s2607_s19, 0 }
  0x6a   : > { %s3175_s7 = smov (!%p337_p9, %s1968_s7), 15  ;;  %v2629_v32 = vmov (!%p1969_p1), 0.0  }
  0x6b   : > { %s339_s22 = scalar_lea.vmem %s3138_s2, %s3175_s7  ;;  %346 = sbr.rel (%p1969_p1) target bundleno = 115 (0x73), region = 63  ;;  %347 = vst [vmem:[#allocation2] sm:$0xff] (!%p1969_p1), %v2629_v32  ;;  %348 = vst [vmem:[#allocation2 + $0x8] sm:$0xff] (!%p1969_p1), %v2629_v32 }
  0x6c   : > { %349 = vst [vmem:[#allocation2 + $0x10] sm:$0xff] (!%p1969_p1), %v2629_v32  ;;  %350 = vst [vmem:[#allocation2 + $0x18] sm:$0xff] (!%p1969_p1), %v2629_v32 }
  0x6d   : > { %351 = vst [vmem:[#allocation2 + $0x20] sm:$0xff] (!%p1969_p1), %v2629_v32  ;;  %352 = vst [vmem:[#allocation2 + $0x28] sm:$0xff] (!%p1969_p1), %v2629_v32 }
  0x6e   : > { %353 = vst [vmem:[#allocation2 + $0x30] sm:$0xff] (!%p1969_p1), %v2629_v32  ;;  %354 = vst [vmem:[#allocation2 + $0x38] sm:$0xff] (!%p1969_p1), %v2629_v32 }
  0x6f   : > { %355 = vst [vmem:[#allocation2 + $0x40] sm:$0xff] (!%p1969_p1), %v2629_v32  ;;  %356 = vst [vmem:[#allocation2 + $0x48] sm:$0xff] (!%p1969_p1), %v2629_v32 }
  0x70   : > { %357 = vst [vmem:[#allocation2 + $0x50] sm:$0xff] (!%p1969_p1), %v2629_v32  ;;  %358 = vst [vmem:[#allocation2 + $0x58] sm:$0xff] (!%p1969_p1), %v2629_v32 }
  0x71   : > { %359 = vst [vmem:[#allocation2 + $0x60] sm:$0xff] (!%p1969_p1), %v2629_v32  ;;  %360 = vst [vmem:[#allocation2 + $0x68] sm:$0xff] (!%p1969_p1), %v2629_v32 }
  0x72   : > { %361 = vst [vmem:[#allocation2 + $0x70] sm:$0xff] %v2629_v32  ;;  %362 = vst [vmem:[#allocation2 + $0x78] sm:$0xff] %v2629_v32 }
  0x73 PF: > { %v2305_v33 = vld [vmem:[%s2879_s29 + $0x4] ss:$8 sps:$4 sm:$0xff]   ;;  %v2309_v35 = vld [vmem:[%s2879_s29] ss:$8 sps:$4 sm:$0xff]   ;;  %v2311_v37 = vld [vmem:[%s2879_s29 + $0x14] ss:$8 sps:$4 sm:$0xff]  }
  0x74   : > { %v2307_v34 = vld [vmem:[%s2879_s29 + $0x204] ss:$8 sps:$4 sm:$0xff]   ;;  %1339 = vmatprep.subr.bf16.mxu1 %v2305_v33  ;;  %v2310_v36 = vld [vmem:[%s2879_s29 + $0x200] ss:$8 sps:$4 sm:$0xff]   ;;  %v2313_v38 = vld [vmem:[%s2879_s29 + $0x214] ss:$8 sps:$4 sm:$0xff]  }
  0x75   : > { %1485 = vmatprep.subr.bf16.mxu0 %v2307_v34  ;;  %1340 = vmatpush1.bf16.msra.mxu1 %v2309_v35  ;;  %v2315_v39 = vld [vmem:[%s2879_s29 + $0x10] ss:$8 sps:$4 sm:$0xff]   ;;  %v2317_v41 = vld [vmem:[%s2879_s29 + $0x24] ss:$8 sps:$4 sm:$0xff]   ;;  %v2321_v43 = vld [vmem:[%s2879_s29 + $0x20] ss:$8 sps:$4 sm:$0xff]  }
  0x76   : > { %1486 = vmatpush1.bf16.msra.mxu0 %v2310_v36  ;;  %1341 = vmatprep.subr.bf16.mxu1 %v2311_v37  ;;  %v2316_v40 = vld [vmem:[%s2879_s29 + $0x210] ss:$8 sps:$4 sm:$0xff]   ;;  %v2319_v42 = vld [vmem:[%s2879_s29 + $0x224] ss:$8 sps:$4 sm:$0xff]   ;;  %v2322_v44 = vld [vmem:[%s2879_s29 + $0x220] ss:$8 sps:$4 sm:$0xff]  }
  0x77   : > { %1487 = vmatprep.subr.bf16.mxu0 %v2313_v38  ;;  %v2323_v45 = vld [vmem:[%s2879_s29 + $0x34] ss:$8 sps:$4 sm:$0xff]   ;;  %v2327_v47 = vld [vmem:[%s2879_s29 + $0x30] ss:$8 sps:$4 sm:$0xff]   ;;  %v2329_v49 = vld [vmem:[%s2879_s29 + $0x44] ss:$8 sps:$4 sm:$0xff]  }
  0x78   : > { %v2325_v46 = vld [vmem:[%s2879_s29 + $0x234] ss:$8 sps:$4 sm:$0xff]   ;;  %v2328_v48 = vld [vmem:[%s2879_s29 + $0x230] ss:$8 sps:$4 sm:$0xff]   ;;  %v2331_v50 = vld [vmem:[%s2879_s29 + $0x244] ss:$8 sps:$4 sm:$0xff]  }
  0x79   : > { %1342 = vmatpush1.bf16.msra.mxu1 %v2315_v39  ;;  %v2333_v51 = vld [vmem:[%s2879_s29 + $0x40] ss:$8 sps:$4 sm:$0xff]   ;;  %v2335_v53 = vld [vmem:[%s2879_s29 + $0x54] ss:$8 sps:$4 sm:$0xff]   ;;  %v2339_v55 = vld [vmem:[%s2879_s29 + $0x50] ss:$8 sps:$4 sm:$0xff]  }
  0x7a   : > { %1488 = vmatpush1.bf16.msra.mxu0 %v2316_v40  ;;  %1343 = vmatprep.subr.bf16.mxu1 %v2317_v41  ;;  %v2334_v52 = vld [vmem:[%s2879_s29 + $0x240] ss:$8 sps:$4 sm:$0xff]   ;;  %v2337_v54 = vld [vmem:[%s2879_s29 + $0x254] ss:$8 sps:$4 sm:$0xff]   ;;  %v2340_v56 = vld [vmem:[%s2879_s29 + $0x250] ss:$8 sps:$4 sm:$0xff]  }
  0x7b   : > { %1489 = vmatprep.subr.bf16.mxu0 %v2319_v42  ;;  %v2341_v57 = vld [vmem:[%s2879_s29 + $0x64] ss:$8 sps:$4 sm:$0xff]   ;;  %v2345_v59 = vld [vmem:[%s2879_s29 + $0x60] ss:$8 sps:$4 sm:$0xff]   ;;  %v2347_v61 = vld [vmem:[%s2879_s29 + $0x74] ss:$8 sps:$4 sm:$0xff]  }
  0x7c   : > { %v2343_v58 = vld [vmem:[%s2879_s29 + $0x264] ss:$8 sps:$4 sm:$0xff]   ;;  %v2346_v60 = vld [vmem:[%s2879_s29 + $0x260] ss:$8 sps:$4 sm:$0xff]   ;;  %v2349_v62 = vld [vmem:[%s2879_s29 + $0x274] ss:$8 sps:$4 sm:$0xff]  }
  0x7d   : > { %1344 = vmatpush1.bf16.msra.mxu1 %v2321_v43  ;;  %v2351_v63 = vld [vmem:[%s2879_s29 + $0x70] ss:$8 sps:$4 sm:$0xff]   ;;  %v2353_v1 = vld [vmem:[%s2879_s29 + $0x84] ss:$8 sps:$4 sm:$0xff]   ;;  %v2357_v3 = vld [vmem:[%s2879_s29 + $0x80] ss:$8 sps:$4 sm:$0xff]  }
  0x7e   : > { %1490 = vmatpush1.bf16.msra.mxu0 %v2322_v44  ;;  %1345 = vmatprep.subr.bf16.mxu1 %v2323_v45  ;;  %v2352_v0 = vld [vmem:[%s2879_s29 + $0x270] ss:$8 sps:$4 sm:$0xff]   ;;  %v2355_v2 = vld [vmem:[%s2879_s29 + $0x284] ss:$8 sps:$4 sm:$0xff]   ;;  %v2358_v4 = vld [vmem:[%s2879_s29 + $0x280] ss:$8 sps:$4 sm:$0xff]  }
  0x7f   : > { %1491 = vmatprep.subr.bf16.mxu0 %v2325_v46  ;;  %v2359_v5 = vld [vmem:[%s2879_s29 + $0x94] ss:$8 sps:$4 sm:$0xff]   ;;  %v2363_v7 = vld [vmem:[%s2879_s29 + $0x90] ss:$8 sps:$4 sm:$0xff]   ;;  %v2365_v9 = vld [vmem:[%s2879_s29 + $0xa4] ss:$8 sps:$4 sm:$0xff]  }
  0x80   : > { %v2361_v6 = vld [vmem:[%s2879_s29 + $0x294] ss:$8 sps:$4 sm:$0xff]   ;;  %v2364_v8 = vld [vmem:[%s2879_s29 + $0x290] ss:$8 sps:$4 sm:$0xff]   ;;  %v2367_v10 = vld [vmem:[%s2879_s29 + $0x2a4] ss:$8 sps:$4 sm:$0xff]  }
  0x81   : > { %1346 = vmatpush1.bf16.msra.mxu1 %v2327_v47  ;;  %v2369_v11 = vld [vmem:[%s2879_s29 + $0xa0] ss:$8 sps:$4 sm:$0xff]   ;;  %v2371_v13 = vld [vmem:[%s2879_s29 + $0xb4] ss:$8 sps:$4 sm:$0xff]   ;;  %v2375_v15 = vld [vmem:[%s2879_s29 + $0xb0] ss:$8 sps:$4 sm:$0xff]  }
  0x82   : > { %1492 = vmatpush1.bf16.msra.mxu0 %v2328_v48  ;;  %1347 = vmatprep.subr.bf16.mxu1 %v2329_v49  ;;  %v2370_v12 = vld [vmem:[%s2879_s29 + $0x2a0] ss:$8 sps:$4 sm:$0xff]   ;;  %v2373_v14 = vld [vmem:[%s2879_s29 + $0x2b4] ss:$8 sps:$4 sm:$0xff]   ;;  %v2376_v16 = vld [vmem:[%s2879_s29 + $0x2b0] ss:$8 sps:$4 sm:$0xff]  }
  0x83   : > { %1493 = vmatprep.subr.bf16.mxu0 %v2331_v50  ;;  %v379_v17 = vld [vmem:[%s2877_s26] sm:$0xff]  ;;  %v381_v22 = vld [vmem:[%s2877_s26 + $0x10] sm:$0xff]  ;;  %p2130_p12 = scmp.ne.s32.totalorder %s2607_s19, 3 }
  0x84   : > { %v383_v18 = vld [vmem:[%s2877_s26 + $0x20] sm:$0xff]  ;;  %v385_v23 = vld [vmem:[%s2877_s26 + $0x30] sm:$0xff] }
  0x85   : > { %1348 = vmatpush1.bf16.msra.mxu1 %v2333_v51  ;;  %v2377_v19 = vld [vmem:[%s2879_s29 + $0xc4] ss:$8 sps:$4 sm:$0xff]   ;;  %v1971_v21 = vcombine.high %v379_v17, %v383_v18  ;;  %v1975_v24 = vcombine.high %v381_v22, %v385_v23  ;;  %v2381_v25 = vld [vmem:[%s2879_s29 + $0xc0] ss:$8 sps:$4 sm:$0xff]   ;;  %v2383_v27 = vld [vmem:[%s2879_s29 + $0xd4] ss:$8 sps:$4 sm:$0xff]   ;;  %v1970_v41 = vcombine.low %v379_v17, %v383_v18  ;;  %v1974_v43 = vcombine.low %v381_v22, %v385_v23 }
  0x86   : > { %1494 = vmatpush1.bf16.msra.mxu0 %v2334_v52  ;;  %1349 = vmatprep.subr.bf16.mxu1 %v2335_v53  ;;  %v2379_v20 = vld [vmem:[%s2879_s29 + $0x2c4] ss:$8 sps:$4 sm:$0xff]   ;;  %v2382_v26 = vld [vmem:[%s2879_s29 + $0x2c0] ss:$8 sps:$4 sm:$0xff]   ;;  %v2385_v28 = vld [vmem:[%s2879_s29 + $0x2d4] ss:$8 sps:$4 sm:$0xff]  }
  0x87   : > { %1495 = vmatprep.subr.bf16.mxu0 %v2337_v54  ;;  %1371 = vmatprep.mubr.bf16.mxu1 %v1971_v21  ;;  %v2387_v29 = vld [vmem:[%s2879_s29 + $0xd0] ss:$8 sps:$4 sm:$0xff]   ;;  %v2389_v31 = vld [vmem:[%s2879_s29 + $0xe4] ss:$8 sps:$4 sm:$0xff]   ;;  %v2393_v33 = vld [vmem:[%s2879_s29 + $0xe0] ss:$8 sps:$4 sm:$0xff]  }
  0x88   : > { %1517 = vmatprep.mubr.bf16.mxu0 %v1975_v24  ;;  %v2388_v30 = vld [vmem:[%s2879_s29 + $0x2d0] ss:$8 sps:$4 sm:$0xff]   ;;  %v2391_v32 = vld [vmem:[%s2879_s29 + $0x2e4] ss:$8 sps:$4 sm:$0xff]   ;;  %v2394_v34 = vld [vmem:[%s2879_s29 + $0x2e0] ss:$8 sps:$4 sm:$0xff]  }
  0x89   : > { %1350 = vmatpush1.bf16.msra.mxu1 %v2339_v55  ;;  %v2395_v35 = vld [vmem:[%s2879_s29 + $0xf4] ss:$8 sps:$4 sm:$0xff]   ;;  %v2399_v37 = vld [vmem:[%s2879_s29 + $0xf0] ss:$8 sps:$4 sm:$0xff]   ;;  %v2403_v39 = vld [vmem:[%s2879_s29 + $0x104] ss:$8 sps:$4 sm:$0xff]  }
  0x8a   : > { %1496 = vmatpush1.bf16.msra.mxu0 %v2340_v56  ;;  %1351 = vmatprep.subr.bf16.mxu1 %v2341_v57  ;;  %v2397_v36 = vld [vmem:[%s2879_s29 + $0x2f4] ss:$8 sps:$4 sm:$0xff]   ;;  %v2400_v38 = vld [vmem:[%s2879_s29 + $0x2f0] ss:$8 sps:$4 sm:$0xff]   ;;  %v2406_v40 = vld [vmem:[%s2879_s29 + $0x304] ss:$8 sps:$4 sm:$0xff]  }
  0x8b   : > { %1497 = vmatprep.subr.bf16.mxu0 %v2343_v58  ;;  %v2401_v42 = vld [vmem:[%s2879_s29 + $0x100] ss:$8 sps:$4 sm:$0xff]   ;;  %v2409_v45 = vld [vmem:[%s2879_s29 + $0x114] ss:$8 sps:$4 sm:$0xff]   ;;  %v2407_v47 = vld [vmem:[%s2879_s29 + $0x110] ss:$8 sps:$4 sm:$0xff]  }
  0x8c   : > { %v2404_v44 = vld [vmem:[%s2879_s29 + $0x300] ss:$8 sps:$4 sm:$0xff]   ;;  %v2412_v46 = vld [vmem:[%s2879_s29 + $0x314] ss:$8 sps:$4 sm:$0xff]   ;;  %v2410_v48 = vld [vmem:[%s2879_s29 + $0x310] ss:$8 sps:$4 sm:$0xff]  }
  0x8d   : > { %1352 = vmatpush1.bf16.msra.mxu1 %v2345_v59  ;;  %v2415_v49 = vld [vmem:[%s2879_s29 + $0x124] ss:$8 sps:$4 sm:$0xff]   ;;  %v2413_v51 = vld [vmem:[%s2879_s29 + $0x120] ss:$8 sps:$4 sm:$0xff]   ;;  %v389_v55 = vld [vmem:[%s2877_s26 + $0x50] sm:$0xff] }
  0x8e   : > { %1498 = vmatpush1.bf16.msra.mxu0 %v2346_v60  ;;  %1353 = vmatprep.subr.bf16.mxu1 %v2347_v61  ;;  %v2418_v50 = vld [vmem:[%s2879_s29 + $0x324] ss:$8 sps:$4 sm:$0xff]   ;;  %v2416_v52 = vld [vmem:[%s2879_s29 + $0x320] ss:$8 sps:$4 sm:$0xff]   ;;  %v393_v56 = vld [vmem:[%s2877_s26 + $0x70] sm:$0xff] }
  0x8f   : > { %1499 = vmatprep.subr.bf16.mxu0 %v2349_v62  ;;  %v387_v53 = vld [vmem:[%s2877_s26 + $0x40] sm:$0xff]  ;;  %v2421_v57 = vld [vmem:[%s2879_s29 + $0x134] ss:$8 sps:$4 sm:$0xff]   ;;  %v1983_v59 = vcombine.high %v389_v55, %v393_v56  ;;  %v1982_v62 = vcombine.low %v389_v55, %v393_v56 }
  0x90   : > { %v391_v54 = vld [vmem:[%s2877_s26 + $0x60] sm:$0xff]  ;;  %v2424_v61 = vld [vmem:[%s2879_s29 + $0x334] ss:$8 sps:$4 sm:$0xff]  }
  0x91   : > { %1354 = vmatpush1.bf16.msra.mxu1 %v2351_v63  ;;  %v1979_v58 = vcombine.high %v387_v53, %v391_v54  ;;  %v1978_v60 = vcombine.low %v387_v53, %v391_v54  ;;  %v2419_v63 = vld [vmem:[%s2879_s29 + $0x130] ss:$8 sps:$4 sm:$0xff]   ;;  %v2439_v17 = vld [vmem:[%s2879_s29 + $0x164] ss:$8 sps:$4 sm:$0xff]  }
  0x92   : > { %1500 = vmatpush1.bf16.msra.mxu0 %v2352_v0  ;;  %1355 = vmatprep.subr.bf16.mxu1 %v2353_v1  ;;  %v2422_v0 = vld [vmem:[%s2879_s29 + $0x330] ss:$8 sps:$4 sm:$0xff]   ;;  %v2427_v1 = vld [vmem:[%s2879_s29 + $0x144] ss:$8 sps:$4 sm:$0xff]  }
  0x93   : > { %1501 = vmatprep.subr.bf16.mxu0 %v2355_v2  ;;  %v2430_v2 = vld [vmem:[%s2879_s29 + $0x344] ss:$8 sps:$4 sm:$0xff]   ;;  %v405_v21 = vld [vmem:[%s2877_s26 + $0xd0] sm:$0xff] }
  0x94   : > { %v2442_v18 = vld [vmem:[%s2879_s29 + $0x364] ss:$8 sps:$4 sm:$0xff]   ;;  %v409_v23 = vld [vmem:[%s2877_s26 + $0xf0] sm:$0xff] }
  0x95   : > { %1356 = vmatpush1.bf16.msra.mxu1 %v2357_v3  ;;  %v395_v3 = vld [vmem:[%s2877_s26 + $0x80] sm:$0xff]  ;;  %v1999_v24 = vcombine.high %v405_v21, %v409_v23  ;;  %v2467_v53 = vld [vmem:[%s2879_s29 + $0x1b0] ss:$8 sps:$4 sm:$0xff]  }
  0x96   : > { %1502 = vmatpush1.bf16.msra.mxu0 %v2358_v4  ;;  %1357 = vmatprep.subr.bf16.mxu1 %v2359_v5  ;;  %v399_v4 = vld [vmem:[%s2877_s26 + $0xa0] sm:$0xff]  ;;  %v2470_v54 = vld [vmem:[%s2879_s29 + $0x3b0] ss:$8 sps:$4 sm:$0xff]  }
  0x97   : > { %1503 = vmatprep.subr.bf16.mxu0 %v2361_v6  ;;  %v1987_v5 = vcombine.high %v395_v3, %v399_v4  ;;  %v397_v6 = vld [vmem:[%s2877_s26 + $0x90] sm:$0xff]  ;;  %v2475_v55 = vld [vmem:[%s2879_s29 + $0x1c4] ss:$8 sps:$4 sm:$0xff]  }
  0x98   : > { %v2478_v56 = vld [vmem:[%s2879_s29 + $0x3c4] ss:$8 sps:$4 sm:$0xff]  }
  0x99   : > { %1358 = vmatpush1.bf16.msra.mxu1 %v2363_v7  ;;  %v401_v7 = vld [vmem:[%s2877_s26 + $0xb0] sm:$0xff] }
  0x9a   : > { %1504 = vmatpush1.bf16.msra.mxu0 %v2364_v8  ;;  %1359 = vmatprep.subr.bf16.mxu1 %v2365_v9  ;;  %v2425_v8 = vld [vmem:[%s2879_s29 + $0x140] ss:$8 sps:$4 sm:$0xff]  }
  0x9b   : > { %1505 = vmatprep.subr.bf16.mxu0 %v2367_v10  ;;  %v2428_v9 = vld [vmem:[%s2879_s29 + $0x340] ss:$8 sps:$4 sm:$0xff]   ;;  %v1991_v10 = vcombine.high %v397_v6, %v401_v7 }
  0x9d   : > { %1360 = vmatpush1.bf16.msra.mxu1 %v2369_v11  ;;  %v1986_v11 = vcombine.low %v395_v3, %v399_v4  ;;  %v2493_v3 = vld [vmem:[%s2879_s29 + $0x1f4] ss:$8 sps:$4 sm:$0xff]  }
  0x9e   : > { %1506 = vmatpush1.bf16.msra.mxu0 %v2370_v12  ;;  %1361 = vmatprep.subr.bf16.mxu1 %v2371_v13  ;;  %v1990_v12 = vcombine.low %v397_v6, %v401_v7  ;;  %v2433_v13 = vld [vmem:[%s2879_s29 + $0x154] ss:$8 sps:$4 sm:$0xff]   ;;  %v2494_v6 = vld [vmem:[%s2879_s29 + $0x3f0] ss:$8 sps:$4 sm:$0xff]   ;;  %v388_v7 = vld [vmem:[%s2877_s26 + $0x48] sm:$0xff] }
  0x9f   : > { %1507 = vmatprep.subr.bf16.mxu0 %v2373_v14  ;;  %v2436_v14 = vld [vmem:[%s2879_s29 + $0x354] ss:$8 sps:$4 sm:$0xff]  }
  0xa0   : > { %v2496_v4 = vld [vmem:[%s2879_s29 + $0x3f4] ss:$8 sps:$4 sm:$0xff]  }
  0xa1   : > { %1362 = vmatpush1.bf16.msra.mxu1 %v2375_v15  ;;  %v2431_v15 = vld [vmem:[%s2879_s29 + $0x150] ss:$8 sps:$4 sm:$0xff]  }
  0xa2   : > { %1508 = vmatpush1.bf16.msra.mxu0 %v2376_v16  ;;  %1363 = vmatprep.subr.bf16.mxu1 %v2377_v19  ;;  %v2434_v16 = vld [vmem:[%s2879_s29 + $0x350] ss:$8 sps:$4 sm:$0xff]   ;;  %v403_v19 = vld [vmem:[%s2877_s26 + $0xc0] sm:$0xff] }
  0xa3   : > { %1509 = vmatprep.subr.bf16.mxu0 %v2379_v20  ;;  %v407_v20 = vld [vmem:[%s2877_s26 + $0xe0] sm:$0xff] }
  0xa4   : > { %v1995_v22 = vcombine.high %v403_v19, %v407_v20 }
  0xa5   : > { %1364 = vmatpush1.bf16.msra.mxu1 %v2381_v25  ;;  %v2437_v25 = vld [vmem:[%s2879_s29 + $0x160] ss:$8 sps:$4 sm:$0xff]  }
  0xa6   : > { %1510 = vmatpush1.bf16.msra.mxu0 %v2382_v26  ;;  %1365 = vmatprep.subr.bf16.mxu1 %v2383_v27  ;;  %v2440_v26 = vld [vmem:[%s2879_s29 + $0x360] ss:$8 sps:$4 sm:$0xff]   ;;  %v1994_v27 = vcombine.low %v403_v19, %v407_v20 }
  0xa7   : > { %1511 = vmatprep.subr.bf16.mxu0 %v2385_v28  ;;  %v1998_v28 = vcombine.low %v405_v21, %v409_v23  ;;  %v404_v23 = vld [vmem:[%s2877_s26 + $0xc8] sm:$0xff] }
  0xa9   : > { %1366 = vmatpush1.bf16.msra.mxu1 %v2387_v29  ;;  %v2445_v29 = vld [vmem:[%s2879_s29 + $0x174] ss:$8 sps:$4 sm:$0xff]  }
  0xaa   : > { %1512 = vmatpush1.bf16.msra.mxu0 %v2388_v30  ;;  %1367 = vmatprep.subr.bf16.mxu1 %v2389_v31  ;;  %v2448_v30 = vld [vmem:[%s2879_s29 + $0x374] ss:$8 sps:$4 sm:$0xff]   ;;  %v3007_v31 = vld [vmem:[%s2877_s26 + $0x8] sm:$0xff] }
  0xab   : > { %1513 = vmatprep.subr.bf16.mxu0 %v2391_v32  ;;  %v3010_v32 = vld [vmem:[%s2877_s26 + $0x28] sm:$0xff] }
  0xad   : > { %1368 = vmatpush1.bf16.msra.mxu1 %v2393_v33  ;;  %v3013_v33 = vld [vmem:[%s2877_s26 + $0x18] sm:$0xff] }
  0xae   : > { %1514 = vmatpush1.bf16.msra.mxu0 %v2394_v34  ;;  %1369 = vmatprep.subr.bf16.mxu1 %v2395_v35  ;;  %v3016_v34 = vld [vmem:[%s2877_s26 + $0x38] sm:$0xff] }
  0xaf   : > { %1515 = vmatprep.subr.bf16.mxu0 %v2397_v36  ;;  %v2443_v35 = vld [vmem:[%s2879_s29 + $0x170] ss:$8 sps:$4 sm:$0xff]  }
  0xb0   : > { %v2446_v36 = vld [vmem:[%s2879_s29 + $0x370] ss:$8 sps:$4 sm:$0xff]  }
  0xb1   : > { %1370 = vmatpush1.bf16.msra.mxu1 %v2399_v37  ;;  %v1973_v37 = vcombine.high %v3007_v31, %v3010_v32 }
  0xb2   : > { %1516 = vmatpush1.bf16.msra.mxu0 %v2400_v38  ;;  %1412 = vmatprep.subr.bf16.mxu1 %v2403_v39  ;;  %v2451_v38 = vld [vmem:[%s2879_s29 + $0x184] ss:$8 sps:$4 sm:$0xff]  }
  0xb3   : > { %1558 = vmatprep.subr.bf16.mxu0 %v2406_v40  ;;  %v2454_v39 = vld [vmem:[%s2879_s29 + $0x384] ss:$8 sps:$4 sm:$0xff]   ;;  %v1977_v40 = vcombine.high %v3013_v33, %v3016_v34 }
  0xb4   : > { %1372 = vmatmul.mubr.bf16.vlgmr.msra.gmra.mrb[0].mxu1 %v1970_v41  ;;  %v2449_v41 = vld [vmem:[%s2879_s29 + $0x180] ss:$8 sps:$4 sm:$0xff]  }
  0xb5   : > { %1518 = vmatmul.mubr.bf16.vlgmr.msra.gmra.mrb[0].mxu0 %v1974_v43  ;;  %1413 = vmatpush1.bf16.msra.mxu1 %v2401_v42  ;;  %v2452_v42 = vld [vmem:[%s2879_s29 + $0x380] ss:$8 sps:$4 sm:$0xff]   ;;  %v2457_v43 = vld [vmem:[%s2879_s29 + $0x194] ss:$8 sps:$4 sm:$0xff]  }
  0xb6   : > { %1559 = vmatpush1.bf16.msra.mxu0 %v2404_v44  ;;  %1414 = vmatprep.subr.bf16.mxu1 %v2409_v45  ;;  %v2460_v44 = vld [vmem:[%s2879_s29 + $0x394] ss:$8 sps:$4 sm:$0xff]   ;;  %v2455_v45 = vld [vmem:[%s2879_s29 + $0x190] ss:$8 sps:$4 sm:$0xff]  }
  0xb7   : > { %1560 = vmatprep.subr.bf16.mxu0 %v2412_v46  ;;  %1381 = vmatprep.mubr.bf16.mxu1 %v1979_v58  ;;  %v2458_v46 = vld [vmem:[%s2879_s29 + $0x390] ss:$8 sps:$4 sm:$0xff]   ;;  %v2476_v58 = vld [vmem:[%s2879_s29 + $0x3c0] ss:$8 sps:$4 sm:$0xff]  }
  0xb8   : > { %1527 = vmatprep.mubr.bf16.mxu0 %v1983_v59  ;;  %v2481_v59 = vld [vmem:[%s2879_s29 + $0x1d4] ss:$8 sps:$4 sm:$0xff]  }
  0xb9   : > { %1415 = vmatpush1.bf16.msra.mxu1 %v2407_v47  ;;  %v2463_v47 = vld [vmem:[%s2879_s29 + $0x1a4] ss:$8 sps:$4 sm:$0xff]  }
  0xba   : > { %1561 = vmatpush1.bf16.msra.mxu0 %v2410_v48  ;;  %1416 = vmatprep.subr.bf16.mxu1 %v2415_v49  ;;  %v2466_v48 = vld [vmem:[%s2879_s29 + $0x3a4] ss:$8 sps:$4 sm:$0xff]   ;;  %v2461_v49 = vld [vmem:[%s2879_s29 + $0x1a0] ss:$8 sps:$4 sm:$0xff]  }
  0xbb   : > { %1562 = vmatprep.subr.bf16.mxu0 %v2418_v50  ;;  %v2464_v50 = vld [vmem:[%s2879_s29 + $0x3a0] ss:$8 sps:$4 sm:$0xff]  }
  0xbc   : > { %1382 = vmatmul.mubr.bf16.gmra.mrb[4].mxu1 %v1978_v60  ;;  %v2484_v60 = vld [vmem:[%s2879_s29 + $0x3d4] ss:$8 sps:$4 sm:$0xff]  }
  0xbd   : > { %1528 = vmatmul.mubr.bf16.gmra.mrb[4].mxu0 %v1982_v62  ;;  %1417 = vmatpush1.bf16.msra.mxu1 %v2413_v51  ;;  %v2469_v51 = vld [vmem:[%s2879_s29 + $0x1b4] ss:$8 sps:$4 sm:$0xff]   ;;  %v2482_v62 = vld [vmem:[%s2879_s29 + $0x3d0] ss:$8 sps:$4 sm:$0xff]  }
  0xbe   : > { %1563 = vmatpush1.bf16.msra.mxu0 %v2416_v52  ;;  %1418 = vmatprep.subr.bf16.mxu1 %v2421_v57  ;;  %v2472_v52 = vld [vmem:[%s2879_s29 + $0x3b4] ss:$8 sps:$4 sm:$0xff]   ;;  %v2473_v57 = vld [vmem:[%s2879_s29 + $0x1c0] ss:$8 sps:$4 sm:$0xff]  }
  0xbf   : > { %1564 = vmatprep.subr.bf16.mxu0 %v2424_v61  ;;  %1391 = vmatprep.mubr.bf16.mxu1 %v1987_v5  ;;  %v2479_v61 = vld [vmem:[%s2879_s29 + $0x1d0] ss:$8 sps:$4 sm:$0xff]  }
  0xc0   : > { %1537 = vmatprep.mubr.bf16.mxu0 %v1991_v10  ;;  %v2491_v5 = vld [vmem:[%s2879_s29 + $0x1f0] ss:$8 sps:$4 sm:$0xff]  }
  0xc1   : > { %1419 = vmatpush1.bf16.msra.mxu1 %v2419_v63  ;;  %v2487_v63 = vld [vmem:[%s2879_s29 + $0x1e4] ss:$8 sps:$4 sm:$0xff]   ;;  %v394_v10 = vld [vmem:[%s2877_s26 + $0x78] sm:$0xff] }
  0xc2   : > { %1565 = vmatpush1.bf16.msra.mxu0 %v2422_v0  ;;  %1420 = vmatprep.subr.bf16.mxu1 %v2427_v1  ;;  %v2490_v0 = vld [vmem:[%s2879_s29 + $0x3e4] ss:$8 sps:$4 sm:$0xff]   ;;  %v2485_v1 = vld [vmem:[%s2879_s29 + $0x1e0] ss:$8 sps:$4 sm:$0xff]  }
  0xc3   : > { %1566 = vmatprep.subr.bf16.mxu0 %v2430_v2  ;;  %v2488_v2 = vld [vmem:[%s2879_s29 + $0x3e0] ss:$8 sps:$4 sm:$0xff]  }
  0xc4   : > { %1392 = vmatmul.mubr.bf16.gmra.mrb[8].mxu1 %v1986_v11  ;;  %v1972_v11 = vcombine.low %v3007_v31, %v3010_v32 }
  0xc5   : > { %1538 = vmatmul.mubr.bf16.gmra.mrb[8].mxu0 %v1990_v12  ;;  %1421 = vmatpush1.bf16.msra.mxu1 %v2425_v8  ;;  %v392_v8 = vld [vmem:[%s2877_s26 + $0x68] sm:$0xff]  ;;  %v1976_v12 = vcombine.low %v3013_v33, %v3016_v34  ;;  %v363_v34 = vld [vmem:[#allocation2] sm:$0xff] }
  0xc6   : > { %1567 = vmatpush1.bf16.msra.mxu0 %v2428_v9  ;;  %1422 = vmatprep.subr.bf16.mxu1 %v2433_v13  ;;  %v390_v9 = vld [vmem:[%s2877_s26 + $0x58] sm:$0xff]  ;;  %v1981_v13 = vcombine.high %v388_v7, %v392_v8  ;;  %v1980_v19 = vcombine.low %v388_v7, %v392_v8 }
  0xc7   : > { %1568 = vmatprep.subr.bf16.mxu0 %v2436_v14  ;;  %1401 = vmatprep.mubr.bf16.mxu1 %v1995_v22  ;;  %v1985_v14 = vcombine.high %v390_v9, %v394_v10  ;;  %v1984_v20 = vcombine.low %v390_v9, %v394_v10  ;;  %v371_v10 = vld [vmem:[#allocation2 + $0x40] sm:$0xff] }
  0xc8   : > { %1547 = vmatprep.mubr.bf16.mxu0 %v1999_v24  ;;  %v408_v24 = vld [vmem:[%s2877_s26 + $0xe8] sm:$0xff] }
  0xc9   : > { %1423 = vmatpush1.bf16.msra.mxu1 %v2431_v15  ;;  %v396_v15 = vld [vmem:[%s2877_s26 + $0x88] sm:$0xff]  ;;  %v1996_v31 = vcombine.low %v404_v23, %v408_v24 }
  0xca   : > { %1569 = vmatpush1.bf16.msra.mxu0 %v2434_v16  ;;  %1424 = vmatprep.subr.bf16.mxu1 %v2439_v17  ;;  %v400_v16 = vld [vmem:[%s2877_s26 + $0xa8] sm:$0xff]  ;;  %v398_v17 = vld [vmem:[%s2877_s26 + $0x98] sm:$0xff] }
  0xcb   : > { %1570 = vmatprep.subr.bf16.mxu0 %v2442_v18  ;;  %v402_v18 = vld [vmem:[%s2877_s26 + $0xb8] sm:$0xff]  ;;  %v1989_v21 = vcombine.high %v396_v15, %v400_v16 }
  0xcc   : > { %1402 = vmatmul.mubr.bf16.gmra.mrb[12].mxu1 %v1994_v27  ;;  %v1993_v22 = vcombine.high %v398_v17, %v402_v18  ;;  %v1988_v27 = vcombine.low %v396_v15, %v400_v16 }
  0xcd   : > { %1548 = vmatmul.mubr.bf16.gmra.mrb[12].mxu0 %v1998_v28  ;;  %1425 = vmatpush1.bf16.msra.mxu1 %v2437_v25  ;;  %v406_v25 = vld [vmem:[%s2877_s26 + $0xd8] sm:$0xff]  ;;  %v1992_v28 = vcombine.low %v398_v17, %v402_v18  ;;  %v373_v18 = vld [vmem:[#allocation2 + $0x50] sm:$0xff] }
  0xce   : > { %1571 = vmatpush1.bf16.msra.mxu0 %v2440_v26  ;;  %1426 = vmatprep.subr.bf16.mxu1 %v2445_v29  ;;  %v410_v26 = vld [vmem:[%s2877_s26 + $0xf8] sm:$0xff]  ;;  %v1997_v29 = vcombine.high %v404_v23, %v408_v24 }
  0xcf   : > { %1572 = vmatprep.subr.bf16.mxu0 %v2448_v30  ;;  %1444 = vmatprep.mubr.bf16.mxu1 %v1973_v37  ;;  %v2001_v30 = vcombine.high %v406_v25, %v410_v26  ;;  %v2000_v32 = vcombine.low %v406_v25, %v410_v26  ;;  %v374_v23 = vld [vmem:[#allocation2 + $0x58] sm:$0xff] }
  0xd0   : > { %1590 = vmatprep.mubr.bf16.mxu0 %v1977_v40 }
  0xd1   : > { %1427 = vmatpush1.bf16.msra.mxu1 %v2443_v35 }
  0xd2   : > { %1573 = vmatpush1.bf16.msra.mxu0 %v2446_v36  ;;  %1428 = vmatprep.subr.bf16.mxu1 %v2451_v38  ;;  %v364_v38 = vld [vmem:[#allocation2 + $0x8] sm:$0xff] }
  0xd3   : > { %1574 = vmatprep.subr.bf16.mxu0 %v2454_v39 }
  0xd5   : > { %1429 = vmatpush1.bf16.msra.mxu1 %v2449_v41 }
  0xd6   : > { %1575 = vmatpush1.bf16.msra.mxu0 %v2452_v42  ;;  %1430 = vmatprep.subr.bf16.mxu1 %v2457_v43  ;;  %v365_v42 = vld [vmem:[#allocation2 + $0x10] sm:$0xff] }
  0xd7   : > { %1576 = vmatprep.subr.bf16.mxu0 %v2460_v44 }
  0xd9   : > { %1431 = vmatpush1.bf16.msra.mxu1 %v2455_v45 }
  0xda   : > { %1577 = vmatpush1.bf16.msra.mxu0 %v2458_v46  ;;  %1432 = vmatprep.subr.bf16.mxu1 %v2463_v47  ;;  %v366_v47 = vld [vmem:[#allocation2 + $0x18] sm:$0xff] }
  0xdb   : > { %1578 = vmatprep.subr.bf16.mxu0 %v2466_v48 }
  0xdd   : > { %1433 = vmatpush1.bf16.msra.mxu1 %v2461_v49 }
  0xde   : > { %1579 = vmatpush1.bf16.msra.mxu0 %v2464_v50  ;;  %1434 = vmatprep.subr.bf16.mxu1 %v2469_v51 }
  0xdf   : > { %1580 = vmatprep.subr.bf16.mxu0 %v2472_v52 }
  0xe1   : > { %1435 = vmatpush1.bf16.msra.mxu1 %v2467_v53 }
  0xe2   : > { %1581 = vmatpush1.bf16.msra.mxu0 %v2470_v54  ;;  %1436 = vmatprep.subr.bf16.mxu1 %v2475_v55  ;;  %v367_v54 = vld [vmem:[#allocation2 + $0x20] sm:$0xff] }
  0xe3   : > { %1582 = vmatprep.subr.bf16.mxu0 %v2478_v56 }
  0xe5   : > { %1437 = vmatpush1.bf16.msra.mxu1 %v2473_v57 }
  0xe6   : > { %1583 = vmatpush1.bf16.msra.mxu0 %v2476_v58  ;;  %1438 = vmatprep.subr.bf16.mxu1 %v2481_v59  ;;  %v368_v58 = vld [vmem:[#allocation2 + $0x28] sm:$0xff] }
  0xe7   : > { %1584 = vmatprep.subr.bf16.mxu0 %v2484_v60 }
  0xe9   : > { %1439 = vmatpush1.bf16.msra.mxu1 %v2479_v61 }
  0xea   : > { %1585 = vmatpush1.bf16.msra.mxu0 %v2482_v62  ;;  %1440 = vmatprep.subr.bf16.mxu1 %v2487_v63  ;;  %v369_v62 = vld [vmem:[#allocation2 + $0x30] sm:$0xff] }
  0xeb   : > { %1586 = vmatprep.subr.bf16.mxu0 %v2490_v0 }
  0xed   : > { %1441 = vmatpush1.bf16.msra.mxu1 %v2485_v1 }
  0xee   : > { %1587 = vmatpush1.bf16.msra.mxu0 %v2488_v2  ;;  %1442 = vmatprep.subr.bf16.mxu1 %v2493_v3  ;;  %v370_v3 = vld [vmem:[#allocation2 + $0x38] sm:$0xff] }
  0xef   : > { %1588 = vmatprep.subr.bf16.mxu0 %v2496_v4 }
  0xf1   : > { %1443 = vmatpush1.bf16.msra.mxu1 %v2491_v5 }
  0xf2   : > { %1589 = vmatpush1.bf16.msra.mxu0 %v2494_v6 }
  0xf4   : > { %1445 = vmatmul.mubr.bf16.vlgmr.msra.gmra.mrb[0].mxu1 %v1972_v11 }
  0xf5   : > { %1591 = vmatmul.mubr.bf16.vlgmr.msra.gmra.mrb[0].mxu0 %v1976_v12  ;;  %1454 = vmatprep.mubr.bf16.mxu1 %v1981_v13 }
  0xf6   : > { %1600 = vmatprep.mubr.bf16.mxu0 %v1985_v14  ;;  %v372_v14 = vld [vmem:[#allocation2 + $0x48] sm:$0xff] }
  0xfc   : > { %1455 = vmatmul.mubr.bf16.gmra.mrb[4].mxu1 %v1980_v19 }
  0xfd   : > { %1601 = vmatmul.mubr.bf16.gmra.mrb[4].mxu0 %v1984_v20  ;;  %1464 = vmatprep.mubr.bf16.mxu1 %v1989_v21 }
  0xfe   : > { %1610 = vmatprep.mubr.bf16.mxu0 %v1993_v22 }
 0x104   : > { %1465 = vmatmul.mubr.bf16.gmra.mrb[8].mxu1 %v1988_v27 }
 0x105   : > { %1611 = vmatmul.mubr.bf16.gmra.mrb[8].mxu0 %v1992_v28  ;;  %1474 = vmatprep.mubr.bf16.mxu1 %v1997_v29 }
 0x106   : > { %1620 = vmatprep.mubr.bf16.mxu0 %v2001_v30  ;;  %v375_v30 = vld [vmem:[#allocation2 + $0x60] sm:$0xff] }
 0x10c   : > { %1475 = vmatmul.mubr.bf16.gmra.mrb[12].mxu1 %v1996_v31 }
 0x10d   : > { %1621 = vmatmul.mubr.bf16.gmra.mrb[12].mxu0 %v2000_v32 }
 0x1c7   : > { %v1446_v33 = vpop.f32.mrb[0].mxu1 }
 0x1c8   : > { %v1592_v35 = vpop.f32.mrb[0].mxu0  ;;  %v1448_v37 = vpop.f32.mrb[1].mxu1 }
 0x1c9   : > { %v2155_v36 = vadd.f32 %v1592_v35, %v1446_v33  ;;  %v1594_v39 = vpop.f32.mrb[1].mxu0  ;;  %v1450_v41 = vpop.f32.mrb[2].mxu1 }
 0x1ca   : > { %v2156_v40 = vadd.f32 %v1594_v39, %v1448_v37  ;;  %v1596_v43 = vpop.f32.mrb[2].mxu0  ;;  %v1452_v46 = vpop.f32.mrb[3].mxu1 }
 0x1cb   : > { %v1631_v44 = vadd.f32 %v2155_v36, %v363_v34  ;;  %v2157_v45 = vadd.f32 %v1596_v43, %v1450_v41  ;;  %v1598_v48 = vpop.f32.mrb[3].mxu0  ;;  %v376_v34 = vld [vmem:[#allocation2 + $0x68] sm:$0xff]  ;;  %v378_v43 = vld [vmem:[#allocation2 + $0x78] sm:$0xff] }
 0x1cc   : > { %v1632_v49 = vadd.f32 %v2156_v40, %v364_v38  ;;  %v2158_v50 = vadd.f32 %v1598_v48, %v1452_v46  ;;  %v377_v38 = vld [vmem:[#allocation2 + $0x70] sm:$0xff] }
 0x1cd   : > { %1647 = vst [vmem:[#allocation2] sm:$0xff] %v1631_v44  ;;  %v1633_v51 = vadd.f32 %v2157_v45, %v365_v42 }
 0x1ce   : > { %1648 = vst [vmem:[#allocation2 + $0x8] sm:$0xff] %v1632_v49  ;;  %v1634_v52 = vadd.f32 %v2158_v50, %v366_v47  ;;  %v1685_v49 = vlaneseq (!%p2130_p12) }
 0x1cf   : > { %1649 = vst [vmem:[#allocation2 + $0x10] sm:$0xff] %v1633_v51  ;;  %v1456_v53 = vpop.f32.mrb[4].mxu1  ;;  %v1683_v51 = vld [vmem:[%s339_s22] sm:$0x3] (!%p2130_p12) }
 0x1d0   : > { %1650 = vst [vmem:[#allocation2 + $0x18] sm:$0xff] %v1634_v52  ;;  %v1602_v55 = vpop.f32.mrb[4].mxu0  ;;  %v1458_v57 = vpop.f32.mrb[5].mxu1  ;;  %v1686_v50 = vshrl.u32 (!%p2130_p12), %v1685_v49, 7 }
 0x1d1   : > { %v2159_v56 = vadd.f32 %v1602_v55, %v1456_v53  ;;  %v1604_v59 = vpop.f32.mrb[5].mxu0  ;;  %v1460_v61 = vpop.f32.mrb[6].mxu1 }
 0x1d2   : > { %v2160_v60 = vadd.f32 %v1604_v59, %v1458_v57  ;;  %v1606_v63 = vpop.f32.mrb[6].mxu0  ;;  %v1462_v2 = vpop.f32.mrb[7].mxu1  ;;  %v1691_v55 = vsub.s32 (!%p2130_p12), 1, %v1686_v50 }
 0x1d3   : > { %v1635_v0 = vadd.f32 %v2159_v56, %v367_v54  ;;  %v2161_v1 = vadd.f32 %v1606_v63, %v1460_v61  ;;  %v1608_v4 = vpop.f32.mrb[7].mxu0  ;;  %v1687_v54 = vsub.s32 (!%p2130_p12), 0, %v1686_v50 }
 0x1d4   : > { %v1636_v5 = vadd.f32 %v2160_v60, %v368_v58  ;;  %v2162_v6 = vadd.f32 %v1608_v4, %v1462_v2  ;;  %v1667_v52 = vld [vmem:[#allocation2] sm:$0xff] (!%p2130_p12)  ;;  %v1692_v60 = vrot.slane (!%p2130_p12), %v1683_v51, %v1691_v55 }
 0x1d5   : > { %1651 = vst [vmem:[#allocation2 + $0x20] sm:$0xff] %v1635_v0  ;;  %v1637_v7 = vadd.f32 %v2161_v1, %v369_v62  ;;  %v1668_v53 = vld [vmem:[#allocation2 + $0x8] sm:$0xff] (!%p2130_p12)  ;;  %v1688_v59 = vrot.slane (!%p2130_p12), %v1683_v51, %v1687_v54 }
 0x1d6   : > { %1652 = vst [vmem:[#allocation2 + $0x28] sm:$0xff] %v1636_v5  ;;  %v1638_v8 = vadd.f32 %v2162_v6, %v370_v3  ;;  %v1669_v56 = vld [vmem:[#allocation2 + $0x10] sm:$0xff] (!%p2130_p12)  ;;  %v1696_v3 = vadd.f32 (!%p2130_p12), %v1692_v60, %v1668_v53 }
 0x1d7   : > { %1653 = vst [vmem:[#allocation2 + $0x30] sm:$0xff] %v1637_v7  ;;  %v1466_v9 = vpop.f32.mrb[8].mxu1  ;;  %v1670_v57 = vld [vmem:[#allocation2 + $0x18] sm:$0xff] (!%p2130_p12)  ;;  %v1695_v2 = vadd.f32 (!%p2130_p12), %v1688_v59, %v1667_v52  ;;  %v1697_v4 = vadd.f32 (!%p2130_p12), %v1688_v59, %v1669_v56 }
 0x1d8   : > { %1654 = vst [vmem:[#allocation2 + $0x38] sm:$0xff] %v1638_v8  ;;  %v1612_v11 = vpop.f32.mrb[8].mxu0  ;;  %v1468_v13 = vpop.f32.mrb[9].mxu1  ;;  %v1698_v5 = vadd.f32 (!%p2130_p12), %v1692_v60, %v1670_v57 }
 0x1d9   : > { %v2163_v12 = vadd.f32 %v1612_v11, %v1466_v9  ;;  %v1614_v15 = vpop.f32.mrb[9].mxu0  ;;  %v1470_v17 = vpop.f32.mrb[10].mxu1 }
 0x1da   : > { %v2164_v16 = vadd.f32 %v1614_v15, %v1468_v13  ;;  %v1616_v19 = vpop.f32.mrb[10].mxu0  ;;  %v1472_v22 = vpop.f32.mrb[11].mxu1  ;;  %v2146_v15 = vpack.c.bf16 (!%p2130_p12), %v1696_v3, %v1695_v2 }
 0x1db   : > { %v1639_v20 = vadd.f32 %v2163_v12, %v371_v10  ;;  %v2165_v21 = vadd.f32 %v1616_v19, %v1470_v17  ;;  %v1618_v24 = vpop.f32.mrb[11].mxu0 }
 0x1dc   : > { %v1640_v25 = vadd.f32 %v2164_v16, %v372_v14  ;;  %v2166_v26 = vadd.f32 %v1618_v24, %v1472_v22  ;;  %v1671_v58 = vld [vmem:[#allocation2 + $0x20] sm:$0xff] (!%p2130_p12)  ;;  %v2147_v16 = vpack.c.bf16 (!%p2130_p12), %v1698_v5, %v1697_v4  ;;  %1759 = vst [vmem:[%s2893_s27] sm:$0xff] (!%p2130_p12), %v2146_v15 }
 0x1dd   : > { %1655 = vst [vmem:[#allocation2 + $0x40] sm:$0xff] %v1639_v20  ;;  %v1641_v27 = vadd.f32 %v2165_v21, %v373_v18  ;;  %v1672_v61 = vld [vmem:[#allocation2 + $0x28] sm:$0xff] (!%p2130_p12)  ;;  %v1699_v8 = vadd.f32 (!%p2130_p12), %v1688_v59, %v1671_v58 }
 0x1de   : > { %1656 = vst [vmem:[#allocation2 + $0x48] sm:$0xff] %v1640_v25  ;;  %v1642_v28 = vadd.f32 %v2166_v26, %v374_v23  ;;  %v1673_v62 = vld [vmem:[#allocation2 + $0x30] sm:$0xff] (!%p2130_p12)  ;;  %v1700_v9 = vadd.f32 (!%p2130_p12), %v1692_v60, %v1672_v61  ;;  %1760 = vst [vmem:[%s2893_s27 + $0x8] sm:$0xff] (!%p2130_p12), %v2147_v16 }
 0x1df   : > { %1657 = vst [vmem:[#allocation2 + $0x50] sm:$0xff] %v1641_v27  ;;  %v1476_v29 = vpop.f32.mrb[12].mxu1  ;;  %v1674_v63 = vld [vmem:[#allocation2 + $0x38] sm:$0xff] (!%p2130_p12)  ;;  %v1701_v10 = vadd.f32 (!%p2130_p12), %v1688_v59, %v1673_v62 }
 0x1e0   : > { %1658 = vst [vmem:[#allocation2 + $0x58] sm:$0xff] %v1642_v28  ;;  %v1622_v31 = vpop.f32.mrb[12].mxu0  ;;  %v1478_v33 = vpop.f32.mrb[13].mxu1  ;;  %v1702_v11 = vadd.f32 (!%p2130_p12), %v1692_v60, %v1674_v63  ;;  %v2148_v20 = vpack.c.bf16 (!%p2130_p12), %v1700_v9, %v1699_v8 }
 0x1e1   : > { %v2167_v32 = vadd.f32 %v1622_v31, %v1476_v29  ;;  %v1624_v35 = vpop.f32.mrb[13].mxu0  ;;  %v1480_v37 = vpop.f32.mrb[14].mxu1 }
 0x1e2   : > { %v2168_v36 = vadd.f32 %v1624_v35, %v1478_v33  ;;  %v1626_v39 = vpop.f32.mrb[14].mxu0  ;;  %v1482_v42 = vpop.f32.mrb[15].mxu1  ;;  %1666 = sbr.rel (%p2130_p12) target bundleno = 501 (0x1f5), region = 67  ;;  %v2149_v21 = vpack.c.bf16 (!%p2130_p12), %v1702_v11, %v1701_v10  ;;  %1761 = vst [vmem:[%s2893_s27 + $0x10] sm:$0xff] (!%p2130_p12), %v2148_v20 }
 0x1e3   : > { %v1643_v40 = vadd.f32 %v2167_v32, %v375_v30  ;;  %v2169_v41 = vadd.f32 %v1626_v39, %v1480_v37  ;;  %v1628_v44 = vpop.f32.mrb[15].mxu0 }
 0x1e4   : > { %v1644_v45 = vadd.f32 %v2168_v36, %v376_v34  ;;  %v2170_v46 = vadd.f32 %v1628_v44, %v1482_v42  ;;  %v1675_v0 = vld [vmem:[#allocation2 + $0x40] sm:$0xff] (!%p2130_p12)  ;;  %1762 = vst [vmem:[%s2893_s27 + $0x18] sm:$0xff] (!%p2130_p12), %v2149_v21 }
 0x1e5   : > { %1659 = vst [vmem:[#allocation2 + $0x60] sm:$0xff] %v1643_v40  ;;  %v1645_v47 = vadd.f32 %v2169_v41, %v377_v38  ;;  %v1676_v1 = vld [vmem:[#allocation2 + $0x48] sm:$0xff] (!%p2130_p12)  ;;  %v1703_v17 = vadd.f32 (!%p2130_p12), %v1688_v59, %v1675_v0 }
 0x1e6   : > { %1660 = vst [vmem:[#allocation2 + $0x68] sm:$0xff] %v1644_v45  ;;  %v1646_v48 = vadd.f32 %v2170_v46, %v378_v43  ;;  %v1677_v6 = vld [vmem:[#allocation2 + $0x50] sm:$0xff] (!%p2130_p12)  ;;  %v1704_v18 = vadd.f32 (!%p2130_p12), %v1692_v60, %v1676_v1 }
 0x1e7   : > { %1661 = vst [vmem:[#allocation2 + $0x70] sm:$0xff] %v1645_v47  ;;  %v1678_v7 = vld [vmem:[#allocation2 + $0x58] sm:$0xff] (!%p2130_p12)  ;;  %v1705_v22 = vadd.f32 (!%p2130_p12), %v1688_v59, %v1677_v6 }
 0x1e8   : > { %1662 = vst [vmem:[#allocation2 + $0x78] sm:$0xff] %v1646_v48  ;;  %v1706_v23 = vadd.f32 (!%p2130_p12), %v1692_v60, %v1678_v7  ;;  %v2150_v24 = vpack.c.bf16 (!%p2130_p12), %v1704_v18, %v1703_v17 }
 0x1ea   : > { %v2151_v28 = vpack.c.bf16 %v1706_v23, %v1705_v22  ;;  %1763 = vst [vmem:[%s2893_s27 + $0x20] sm:$0xff] %v2150_v24 }
 0x1ec   : > { %v1679_v12 = vld [vmem:[#allocation2 + $0x60] sm:$0xff]  ;;  %1764 = vst [vmem:[%s2893_s27 + $0x28] sm:$0xff] %v2151_v28 }
 0x1ed   : > { %v1680_v13 = vld [vmem:[#allocation2 + $0x68] sm:$0xff]  ;;  %v1707_v25 = vadd.f32 %v1688_v59, %v1679_v12 }
 0x1ee   : > { %v1681_v14 = vld [vmem:[#allocation2 + $0x70] sm:$0xff]  ;;  %v1708_v26 = vadd.f32 %v1692_v60, %v1680_v13 }
 0x1ef   : > { %v1682_v19 = vld [vmem:[#allocation2 + $0x78] sm:$0xff]  ;;  %v1709_v27 = vadd.f32 %v1688_v59, %v1681_v14 }
 0x1f0   : > { %v1710_v29 = vadd.f32 %v1692_v60, %v1682_v19  ;;  %v2152_v30 = vpack.c.bf16 %v1708_v26, %v1707_v25 }
 0x1f2   : > { %v2153_v31 = vpack.c.bf16 %v1710_v29, %v1709_v27  ;;  %1765 = vst [vmem:[%s2893_s27 + $0x30] sm:$0xff] %v2152_v30 }
 0x1f4   : > { %1766 = vst [vmem:[%s2893_s27 + $0x38] sm:$0xff] %v2153_v31 }
 0x1f5 PF: > { %p3153_p11 = scmp.ne.s32.totalorder %s3151_s14, 0 }
 0x1f6   : > { %s2154_s19 = sshll.u32 (%p3153_p11), %s2611_s20, 3  ;;  %v1821_v32 = vld [vmem:[%s2893_s27] sm:$0xff] (%p3153_p11)  ;;  %v1823_v33 = vld [vmem:[%s2893_s27 + $0x8] sm:$0xff] (%p3153_p11)  ;;  %v1825_v34 = vld [vmem:[%s2893_s27 + $0x10] sm:$0xff] (%p3153_p11) }
 0x1f7   : > { %1773 = sbr.rel (!%p3153_p11) target bundleno = 510 (0x1fe), region = 71  ;;  %s1779_s5 = scalar_lea.vmem (%p3153_p11), %s3139_s3, %s2154_s19  ;;  %v1827_v35 = vld [vmem:[%s2893_s27 + $0x18] sm:$0xff] (%p3153_p11)  ;;  %v1829_v36 = vld [vmem:[%s2893_s27 + $0x20] sm:$0xff] (%p3153_p11)  ;;  %v1831_v37 = vld [vmem:[%s2893_s27 + $0x28] sm:$0xff] (%p3153_p11) }
 0x1f8   : > { %1822 = vst [vmem:[%s1779_s5] sm:$0xff] (%p3153_p11), %v1821_v32  ;;  %1824 = vst [vmem:[%s1779_s5 + $0x40] sm:$0xff] (%p3153_p11), %v1823_v33 }
 0x1f9   : > { %1826 = vst [vmem:[%s1779_s5 + $0x80] sm:$0xff] (%p3153_p11), %v1825_v34  ;;  %1828 = vst [vmem:[%s1779_s5 + $0xc0] sm:$0xff] (%p3153_p11), %v1827_v35  ;;  %v1833_v38 = vld [vmem:[%s2893_s27 + $0x30] sm:$0xff] (%p3153_p11) }
 0x1fa   : > { %1830 = vst [vmem:[%s1779_s5 + $0x100] sm:$0xff] (%p3153_p11), %v1829_v36  ;;  %1832 = vst [vmem:[%s1779_s5 + $0x140] sm:$0xff] (%p3153_p11), %v1831_v37 }
 0x1fb   : > { %v1835_v39 = vld [vmem:[%s2893_s27 + $0x38] sm:$0xff] (%p3153_p11)  ;;  %1834 = vst [vmem:[%s1779_s5 + $0x180] sm:$0xff] (%p3153_p11), %v1833_v38 }
 0x1fc   : > { %1836 = vst [vmem:[%s1779_s5 + $0x1c0] sm:$0xff] (%p3153_p11), %v1835_v39 }
 0x1fe PF: > { %s16_s23 = sadd.s32 1, %s2623_s23   ;;  %s3154_s20 = sld [smem:[#allocation11_spill]] }
 0x1ff   : > { %p13_p13 = scmp.ge.s32.totalorder %s16_s23, 34   ;;  %s3155_s6 = sld [smem:[#allocation8_spill]] }
 0x200   : > { %s3156_s25 = sld [smem:[#allocation9_spill]]  ;;  %s3157_s22 = sld [smem:[#allocation10_spill]] }
 0x201   : > { %s3158_s12 = smov %s2583_s13  ;;  %s3159_s13 = smov %s2753_s11 }
 0x202   : > { %s3160_s14 = smov %s2591_s15  ;;  %s3161_s15 = smov %s2595_s16 }
 0x203   : > { %s3162_s16 = smov %s2745_s8  ;;  %s3163_s17 = smov %s2603_s18 }
 0x204   : > { %s3164_s18 = smov %s3154_s20  ;;  %s3165_s19 = smov %s2615_s21 }
 0x205   : > { %s3166_s20 = smov %s3155_s6  ;;  %15 = sbr.rel (!%p13_p13) target bundleno = 9 (0x9), region = 152 }
 0x206   : > { %s3167_s21 = smov %s3156_s25 }
 0x20c   :  { %1852 = vsyncpa [#allocation5], 1 }
 0x20d   :  { %1854 = vsyncpa [#allocation5 + $0x1], 1 }

// kernel: g_basic_forward.11
= control target key start
LH: loop header
LB: loop body
LE: loop exit
PB: predicated region body
PF: predicated region fallthrough
CT: control target
= control target key end

     0   :  { %s731_s9 = smov 0   ;;  %s733_s10 = smov 0   ;;  %s859_s0 = inlined_call_operand.vmem [shape: bf16[128,512], index: 0, kind: input, shape index: {}]   ;;  %s860_s1 = inlined_call_operand.vmem [shape: f32[1,512], index: 1, kind: output, shape index: {0}]   ;;  %s861_s2 = inlined_call_operand.vmem [shape: f32[1,512], index: 2, kind: output, shape index: {1}]  }
   0x1   :  { %s735_s11 = smov 0   ;;  %s737_s12 = smov 0  }
   0x2   :  { %s739_s13 = smov 0  }
   0x3 LB: > { %s25_s14 = sadd.s32 1, %s707_s12  ;;  %p41_p1 = scmp.ne.s32.totalorder %s699_s10, %s695_s9  ;;  %s711_s13 = sphi %s739_s13, %s13_s13   ;;  %s707_s12 = sphi %s737_s12, %s867_s12   ;;  %s703_s11 = sphi %s735_s11, %s866_s11   ;;  %s699_s10 = sphi %s733_s10, %s865_s10   ;;  %s695_s9 = sphi %s731_s9, %s864_s9  }
   0x4   : > { %p27_p0 = scmp.ge.s32.totalorder %s25_s14, 2  ;;  %p42_p2 = scmp.eq.s32.totalorder %s711_s13, 0 }
   0x5   : > { %s34_s16 = sadd.s32 1, %s699_s10  ;;  %p588_p5 = scmp.ge.s32.totalorder %s711_s13, 2 }
   0x6   : > { %s869_s14 = smov (%p27_p0, %s25_s14), 0  ;;  %p43_p3 = por %p42_p2, %p41_p1 }
   0x7   : > { %s30_s15 = ssub.s32 %s707_s12, %s869_s14  ;;  %119 = sbr.rel (%p588_p5) target bundleno = 26 (0x1a), region = 16 }
   0x8   : > { %p32_p4 = scmp.eq.s32.totalorder %s30_s15, 0 }
   0xa   : > { %s766_s17 = scalar_select %p32_p4, %s699_s10, %s34_s16  }
   0xe   : > { %122 = sbr.rel (!%p43_p3) target bundleno = 26 (0x1a), region = 20  ;;  %s124_s18 = sand.u32 (%p43_p3), 1, %s699_s10  }
   0xf   : > { %s598_s19 = sshll.u32 (%p43_p3), %s707_s12, 3  ;;  %s589_s20 = sshll.u32 (%p43_p3), %s124_s18, 7 }
  0x10   : > { %s774_s23 = scalar_lea.vmem (%p43_p3), %s859_s0, %s598_s19  ;;  %s126_s24 = scalar_lea.vmem (%p43_p3), [#allocation2], %s589_s20 }
  0x11   : > { %v190_v0 = vld [vmem:[%s774_s23] sm:$0xff] (%p43_p3)  ;;  %v192_v1 = vld [vmem:[%s774_s23 + $0x10] sm:$0xff] (%p43_p3) }
  0x12   : > { %v194_v2 = vld [vmem:[%s774_s23 + $0x20] sm:$0xff] (%p43_p3)  ;;  %191 = vst [vmem:[%s126_s24] sm:$0xff] (%p43_p3), %v190_v0  ;;  %193 = vst [vmem:[%s126_s24 + $0x8] sm:$0xff] (%p43_p3), %v192_v1  ;;  %v196_v3 = vld [vmem:[%s774_s23 + $0x30] sm:$0xff] (%p43_p3) }
  0x13   : > { %195 = vst [vmem:[%s126_s24 + $0x10] sm:$0xff] (%p43_p3), %v194_v2  ;;  %v198_v4 = vld [vmem:[%s774_s23 + $0x40] sm:$0xff] (%p43_p3)  ;;  %v200_v5 = vld [vmem:[%s774_s23 + $0x50] sm:$0xff] (%p43_p3)  ;;  %197 = vst [vmem:[%s126_s24 + $0x18] sm:$0xff] (%p43_p3), %v196_v3 }
  0x14   : > { %199 = vst [vmem:[%s126_s24 + $0x20] sm:$0xff] (%p43_p3), %v198_v4  ;;  %201 = vst [vmem:[%s126_s24 + $0x28] sm:$0xff] (%p43_p3), %v200_v5  ;;  %v202_v6 = vld [vmem:[%s774_s23 + $0x60] sm:$0xff] (%p43_p3)  ;;  %v204_v7 = vld [vmem:[%s774_s23 + $0x70] sm:$0xff] (%p43_p3) }
  0x15   : > { %v206_v8 = vld [vmem:[%s774_s23 + $0x80] sm:$0xff]  ;;  %203 = vst [vmem:[%s126_s24 + $0x30] sm:$0xff] %v202_v6  ;;  %205 = vst [vmem:[%s126_s24 + $0x38] sm:$0xff] %v204_v7  ;;  %v208_v9 = vld [vmem:[%s774_s23 + $0x90] sm:$0xff] }
  0x16   : > { %207 = vst [vmem:[%s126_s24 + $0x40] sm:$0xff] %v206_v8  ;;  %v210_v10 = vld [vmem:[%s774_s23 + $0xa0] sm:$0xff]  ;;  %v212_v11 = vld [vmem:[%s774_s23 + $0xb0] sm:$0xff]  ;;  %209 = vst [vmem:[%s126_s24 + $0x48] sm:$0xff] %v208_v9 }
  0x17   : > { %211 = vst [vmem:[%s126_s24 + $0x50] sm:$0xff] %v210_v10  ;;  %213 = vst [vmem:[%s126_s24 + $0x58] sm:$0xff] %v212_v11  ;;  %v214_v12 = vld [vmem:[%s774_s23 + $0xc0] sm:$0xff]  ;;  %v216_v13 = vld [vmem:[%s774_s23 + $0xd0] sm:$0xff] }
  0x18   : > { %v218_v14 = vld [vmem:[%s774_s23 + $0xe0] sm:$0xff]  ;;  %215 = vst [vmem:[%s126_s24 + $0x60] sm:$0xff] %v214_v12  ;;  %217 = vst [vmem:[%s126_s24 + $0x68] sm:$0xff] %v216_v13  ;;  %v220_v15 = vld [vmem:[%s774_s23 + $0xf0] sm:$0xff] }
  0x19   : > { %219 = vst [vmem:[%s126_s24 + $0x70] sm:$0xff] %v218_v14  ;;  %221 = vst [vmem:[%s126_s24 + $0x78] sm:$0xff] %v220_v15 }
  0x1a PF: > { %p592_p6 = scmp.ge.s32.totalorder %s711_s13, 1  ;;  %p226_p7 = scmp.lt.s32.totalorder %s711_s13, 3 }
  0x1c   : > { %p227_p8 = pnand %p592_p6, %p226_p7 }
  0x1d   : > { %s233_s25 = sand.u32 (!%p227_p8), 1, %s695_s9   ;;  %s594_s26 = sshll.u32 (!%p227_p8), %s703_s11, 1  ;;  %v273_v16 = vlaneseq (!%p227_p8)  ;;  %v713_v18 = vmov (!%p227_p8), 0.0  }
  0x1e   : > { %230 = sbr.rel (%p227_p8) target bundleno = 86 (0x56), region = 58  ;;  %s593_s27 = sshll.u32 (!%p227_p8), %s233_s25, 7 }
  0x1f   : > { %p260_p9 = scmp.lt.s32.totalorder (!%p227_p8), %s594_s26, 3  ;;  %vm797_vm0 = vcmp.lt.s32.totalorder (!%p227_p8), %v273_v16, 256  ;;  %s817_s6 = scalar_lea.vmem (!%p227_p8), [#allocation2], %s593_s27 }
  0x20   : > { %v279_v19 = vld [vmem:[%s817_s6] sm:$0xff] (!%p227_p8)  ;;  %v280_v20 = vld [vmem:[%s817_s6 + $0x8] sm:$0xff] (!%p227_p8)  ;;  %v281_v21 = vld [vmem:[%s817_s6 + $0x10] sm:$0xff] (!%p227_p8) }
  0x21   : > { %v295_v22 = vunpack.c.l.bf16 (!%p227_p8), %v279_v19  ;;  %v296_v23 = vunpack.c.h.bf16 (!%p227_p8), %v279_v19  ;;  %v297_v24 = vunpack.c.l.bf16 (!%p227_p8), %v280_v20  ;;  %v298_v25 = vunpack.c.h.bf16 (!%p227_p8), %v280_v20  ;;  %v282_v26 = vld [vmem:[%s817_s6 + $0x18] sm:$0xff] (!%p227_p8)  ;;  %v283_v31 = vld [vmem:[%s817_s6 + $0x20] sm:$0xff] (!%p227_p8)  ;;  %v284_v36 = vld [vmem:[%s817_s6 + $0x28] sm:$0xff] (!%p227_p8) }
  0x22   : > { %v299_v27 = vunpack.c.l.bf16 (!%p227_p8), %v281_v21  ;;  %v300_v28 = vunpack.c.h.bf16 (!%p227_p8), %v281_v21  ;;  %v301_v32 = vunpack.c.l.bf16 (!%p227_p8), %v282_v26  ;;  %v302_v33 = vunpack.c.h.bf16 (!%p227_p8), %v282_v26  ;;  %v285_v41 = vld [vmem:[%s817_s6 + $0x30] sm:$0xff] (!%p227_p8)  ;;  %v286_v46 = vld [vmem:[%s817_s6 + $0x38] sm:$0xff] (!%p227_p8)  ;;  %v287_v51 = vld [vmem:[%s817_s6 + $0x40] sm:$0xff] (!%p227_p8) }
  0x23   : > { %v328_v29 = vadd.f32 (!%p227_p8), %v297_v24, %v295_v22  ;;  %v349_v30 = vadd.f32 (!%p227_p8), %v298_v25, %v296_v23  ;;  %v303_v37 = vunpack.c.l.bf16 (!%p227_p8), %v283_v31  ;;  %v304_v38 = vunpack.c.h.bf16 (!%p227_p8), %v283_v31  ;;  %v288_v56 = vld [vmem:[%s817_s6 + $0x48] sm:$0xff] (!%p227_p8)  ;;  %v289_v61 = vld [vmem:[%s817_s6 + $0x50] sm:$0xff] (!%p227_p8)  ;;  %v290_v2 = vld [vmem:[%s817_s6 + $0x58] sm:$0xff] (!%p227_p8) }
  0x24   : > { %v305_v42 = vunpack.c.l.bf16 (!%p227_p8), %v284_v36  ;;  %v306_v43 = vunpack.c.h.bf16 (!%p227_p8), %v284_v36  ;;  %v307_v47 = vunpack.c.l.bf16 (!%p227_p8), %v285_v41  ;;  %v308_v48 = vunpack.c.h.bf16 (!%p227_p8), %v285_v41  ;;  %v291_v7 = vld [vmem:[%s817_s6 + $0x60] sm:$0xff] (!%p227_p8)  ;;  %v292_v12 = vld [vmem:[%s817_s6 + $0x68] sm:$0xff] (!%p227_p8)  ;;  %v294_v24 = vld [vmem:[%s817_s6 + $0x78] sm:$0xff] (!%p227_p8) }
  0x25   : > { %s871_s26 = smov (!%p260_p9, %s594_s26), 3  ;;  %v329_v34 = vadd.f32 %v328_v29, %v299_v27  ;;  %v350_v35 = vadd.f32 %v349_v30, %v300_v28  ;;  %v309_v52 = vunpack.c.l.bf16 %v286_v46  ;;  %v310_v53 = vunpack.c.h.bf16 %v286_v46 }
  0x26   : > { %s804_s30 = scalar_lea.vmem %s860_s1, %s871_s26  ;;  %s809_s5 = scalar_lea.vmem %s861_s2, %s871_s26  ;;  %661 = vmul.bf16.f32.vacc0 %v279_v19, %v279_v19  ;;  %v311_v57 = vunpack.c.l.bf16 %v287_v51  ;;  %v312_v58 = vunpack.c.h.bf16 %v287_v51  ;;  %v313_v62 = vunpack.c.l.bf16 %v288_v56  ;;  %v293_v19 = vld [vmem:[%s817_s6 + $0x70] sm:$0xff] }
  0x27   : > { %277 = vst.msk [vmem:[%s804_s30] sm:$0x3] %vm797_vm0, %v713_v18  ;;  %278 = vst.msk [vmem:[%s809_s5] sm:$0x3] %vm797_vm0, %v713_v18  ;;  %v330_v39 = vadd.f32 %v329_v34, %v301_v32  ;;  %v351_v40 = vadd.f32 %v350_v35, %v302_v33  ;;  %662 = vmac.bf16.f32.vacc0 %v280_v20, %v280_v20  ;;  %v314_v63 = vunpack.c.h.bf16 %v288_v56 }
  0x28   : > { %663 = vmac.bf16.f32.vacc0 %v281_v21, %v281_v21  ;;  %v315_v3 = vunpack.c.l.bf16 %v289_v61  ;;  %v316_v4 = vunpack.c.h.bf16 %v289_v61  ;;  %v317_v8 = vunpack.c.l.bf16 %v290_v2 }
  0x29   : > { %v331_v44 = vadd.f32 %v330_v39, %v303_v37  ;;  %v352_v45 = vadd.f32 %v351_v40, %v304_v38  ;;  %664 = vmac.bf16.f32.vacc0 %v282_v26, %v282_v26  ;;  %v318_v9 = vunpack.c.h.bf16 %v290_v2 }
  0x2a   : > { %665 = vmac.bf16.f32.vacc0 %v283_v31, %v283_v31  ;;  %v319_v13 = vunpack.c.l.bf16 %v291_v7  ;;  %v320_v14 = vunpack.c.h.bf16 %v291_v7  ;;  %v321_v20 = vunpack.c.l.bf16 %v292_v12 }
  0x2b   : > { %v332_v49 = vadd.f32 %v331_v44, %v305_v42  ;;  %v353_v50 = vadd.f32 %v352_v45, %v306_v43  ;;  %666 = vmac.bf16.f32.vacc0 %v284_v36, %v284_v36  ;;  %v322_v21 = vunpack.c.h.bf16 %v292_v12 }
  0x2c   : > { %667 = vmac.bf16.f32.vacc0 %v285_v41, %v285_v41  ;;  %v323_v25 = vunpack.c.l.bf16 %v293_v19  ;;  %v324_v26 = vunpack.c.h.bf16 %v293_v19  ;;  %v325_v29 = vunpack.c.l.bf16 %v294_v24 }
  0x2d   : > { %v333_v54 = vadd.f32 %v332_v49, %v307_v47  ;;  %v354_v55 = vadd.f32 %v353_v50, %v308_v48  ;;  %668 = vmac.bf16.f32.vacc0 %v286_v46, %v286_v46  ;;  %v326_v30 = vunpack.c.h.bf16 %v294_v24 }
  0x2e   : > { %669 = vmac.bf16.f32.vacc0 %v287_v51, %v287_v51  ;;  %v714_v39 = vmov 1966171168   ;;  %v377_v46 = vshrl.u32 %v273_v16, 7 }
  0x2f   : > { %v334_v59 = vadd.f32 %v333_v54, %v309_v52  ;;  %v355_v60 = vadd.f32 %v354_v55, %v310_v53  ;;  %670 = vmac.bf16.f32.vacc0 %v288_v56, %v288_v56  ;;  %v374_v40 = vunpack.c.l.s4 %v714_v39 }
  0x30   : > { %671 = vmac.bf16.f32.vacc0 %v289_v61, %v289_v61  ;;  %v715_v53 = vmov 1935823168  }
  0x31   : > { %v335_v0 = vadd.f32 %v334_v59, %v311_v57  ;;  %v356_v1 = vadd.f32 %v355_v60, %v312_v58  ;;  %672 = vmac.bf16.f32.vacc0 %v290_v2, %v290_v2  ;;  %v375_v45 = vunpack.c.0.s8 %v374_v40 }
  0x32   : > { %673 = vmac.bf16.f32.vacc0 %v291_v7, %v291_v7  ;;  %v681_v54 = vunpack.c.l.s4 %v715_v53 }
  0x33   : > { %v336_v5 = vadd.f32 %v335_v0, %v313_v62  ;;  %v357_v6 = vadd.f32 %v356_v1, %v314_v63  ;;  %674 = vmac.bf16.f32.vacc0 %v292_v12, %v292_v12  ;;  %v378_v61 = vsub.s32 %v375_v45, %v377_v46 }
  0x34   : > { %675 = vmac.bf16.f32.vacc0 %v293_v19, %v293_v19  ;;  %v682_v55 = vunpack.c.0.s8 %v681_v54 }
  0x35   : > { %v337_v10 = vadd.f32 %v336_v5, %v315_v3  ;;  %v358_v11 = vadd.f32 %v357_v6, %v316_v4  ;;  %676 = vmac.bf16.f32.vacc0 %v294_v24, %v294_v24  ;;  %v327_v3 = vld [vmem:[%s804_s30] sm:$0x3] }
  0x36   : > { %v685_v56 = vsub.s32 %v682_v55, %v377_v46 }
  0x37   : > { %v338_v15 = vadd.f32 %v337_v10, %v317_v8  ;;  %v359_v18 = vadd.f32 %v358_v11, %v318_v9  ;;  %v677_v49 = vmovacc.add.low.vacc0 }
  0x38   : > { %v678_v50 = vmovacc.add.high.vacc0 }
  0x39   : > { %v339_v22 = vadd.f32 %v338_v15, %v319_v13  ;;  %v360_v23 = vadd.f32 %v359_v18, %v320_v14  ;;  %v394_v18 = vld [vmem:[%s809_s5] sm:$0x3] }
  0x3a   : > { %v679_v51 = vcombine.low %v677_v49, %v678_v50  ;;  %v680_v52 = vcombine.high %v677_v49, %v678_v50 }
  0x3b   : > { %v340_v27 = vadd.f32 %v339_v22, %v321_v20  ;;  %v361_v28 = vadd.f32 %v360_v23, %v322_v21 }
  0x3c   : > { %v686_v57 = vrot.slane %v679_v51, %v685_v56  ;;  %v692_v58 = vrot.slane %v680_v52, %v685_v56 }
  0x3d   : > { %v341_v31 = vadd.f32 %v340_v27, %v323_v25  ;;  %v362_v32 = vadd.f32 %v361_v28, %v324_v26 }
  0x3e   : > { %v442_v16 = vrot.slane %v686_v57, 4  ;;  %v463_v62 = vrot.slane %v692_v58, 4 }
  0x3f   : > { %v342_v33 = vadd.f32 %v341_v31, %v325_v29  ;;  %v363_v34 = vadd.f32 %v362_v32, %v326_v30 }
  0x40   : > { %v443_v0 = vadd.f32 %v686_v57, %v442_v16  ;;  %v464_v1 = vadd.f32 %v692_v58, %v463_v62 }
  0x41   : > { %v343_v35 = vrot.slane %v342_v33, 4  ;;  %v364_v36 = vrot.slane %v363_v34, 4 }
  0x42   : > { %v444_v4 = vrot.slane %v443_v0, 2  ;;  %v465_v5 = vrot.slane %v464_v1, 2 }
  0x43   : > { %v344_v37 = vadd.f32 %v343_v35, %v342_v33  ;;  %v365_v38 = vadd.f32 %v364_v36, %v363_v34 }
  0x44   : > { %v445_v7 = vadd.f32 %v444_v4, %v443_v0  ;;  %v466_v8 = vadd.f32 %v465_v5, %v464_v1 }
  0x45   : > { %v345_v41 = vrot.slane %v344_v37, 2  ;;  %v366_v42 = vrot.slane %v365_v38, 2 }
  0x46   : > { %v446_v10 = vrot.slane %v445_v7, 1  ;;  %v467_v11 = vrot.slane %v466_v8, 1 }
  0x47   : > { %v346_v43 = vadd.f32 %v345_v41, %v344_v37  ;;  %v367_v44 = vadd.f32 %v366_v42, %v365_v38 }
  0x48   : > { %v447_v12 = vadd.f32 %v446_v10, %v445_v7  ;;  %v468_v13 = vadd.f32 %v467_v11, %v466_v8 }
  0x49   : > { %v347_v47 = vrot.slane %v346_v43, 1  ;;  %v368_v48 = vrot.slane %v367_v44, 1 }
  0x4a   : > { %v471_v14 = vcombine.low %v447_v12, %v468_v13 }
  0x4b   : > { %v348_v59 = vadd.f32 %v347_v47, %v346_v43  ;;  %v369_v60 = vadd.f32 %v368_v48, %v367_v44 }
  0x4c   : > { %v478_v15 = vrot.slane %v471_v14, %v378_v61 }
  0x4d   : > { %v372_v63 = vcombine.low %v348_v59, %v369_v60 }
  0x4e   : > { %v485_v19 = vrot.slane %v478_v15, %v378_v61 }
  0x4f   : > { %v379_v2 = vrot.slane %v372_v63, %v378_v61 }
  0x50   : > { %v487_v20 = vadd.f32 %v485_v19, %v394_v18 }
  0x51   : > { %v386_v6 = vrot.slane %v379_v2, %v378_v61 }
  0x52   : > { %488 = vst.msk [vmem:[%s809_s5] sm:$0x3] %vm797_vm0, %v487_v20 }
  0x53   : > { %v388_v9 = vadd.f32 %v386_v6, %v327_v3 }
  0x55   : > { %393 = vst.msk [vmem:[%s804_s30] sm:$0x3] %vm797_vm0, %v388_v9 }
  0x56 PF: > { %s13_s13 = sadd.s32 1, %s711_s13   ;;  %s864_s9 = smov %s699_s10 }
  0x57   : > { %p10_p10 = scmp.ge.s32.totalorder %s13_s13, 4   ;;  %s865_s10 = smov %s766_s17 }
  0x58   : > { %s866_s11 = smov %s707_s12  ;;  %s867_s12 = smov %s869_s14 }
  0x59   :  { %12 = sbr.rel (!%p10_p10) target bundleno = 3 (0x3), region = 113 }

// kernel: g_basic_forward.12
= control target key start
LH: loop header
LB: loop body
LE: loop exit
PB: predicated region body
PF: predicated region fallthrough
CT: control target
= control target key end

     0   :  { %s946_s12 = smov 0   ;;  %s948_s13 = smov 0   ;;  %s1171_s0 = inlined_call_operand.vmem [shape: bf16[128,512], index: 0, kind: input, shape index: {}]   ;;  %s1172_s1 = inlined_call_operand.vmem [shape: f32[1,512], index: 1, kind: input, shape index: {}]   ;;  %s1173_s2 = inlined_call_operand.vmem [shape: f32[1,512], index: 2, kind: input, shape index: {}]   ;;  %s1174_s3 = inlined_call_operand.vmem [shape: bf16[128,512], index: 3, kind: output, shape index: {}]  }
   0x1   :  { %s950_s14 = smov 0   ;;  %s952_s15 = smov 0  }
   0x2   :  { %s954_s16 = smov 0  }
   0x3 LB: > { %s25_s17 = sadd.s32 1, %s920_s15  ;;  %s795_s18 = sadd.s32 4294967295, %s924_s16   ;;  %s924_s16 = sphi %s954_s16, %s13_s16   ;;  %s920_s15 = sphi %s952_s15, %s1179_s15   ;;  %s916_s14 = sphi %s950_s14, %s1178_s14   ;;  %s912_s13 = sphi %s948_s13, %s1177_s13   ;;  %s908_s12 = sphi %s946_s12, %s1176_s12  }
   0x4   : > { %p27_p0 = scmp.ge.s32.totalorder %s25_s17, 2  ;;  %p41_p1 = scmp.ne.s32.totalorder %s912_s13, %s908_s12 }
   0x5   : > { %p42_p2 = scmp.eq.s32.totalorder %s924_s16, 0  ;;  %p125_p4 = scmp.eq.s32.totalorder %s795_s18, 1 }
   0x6   : > { %s1181_s17 = smov (%p27_p0, %s25_s17), 0  ;;  %s34_s20 = sadd.s32 1, %s912_s13 }
   0x7   : > { %p43_p3 = por %p42_p2, %p41_p1  ;;  %s30_s19 = ssub.s32 %s920_s15, %s1181_s17 }
   0x8   : > { %p32_p5 = scmp.eq.s32.totalorder %s30_s19, 0  ;;  %p981_p6 = por %p125_p4, %p41_p1 }
   0x9   : > { %p798_p7 = scmp.ge.s32.totalorder %s924_s16, 2 }
   0xa   : > { %s986_s22 = scalar_select %p32_p5, %s912_s13, %s34_s20  }
   0xb   : > { %147 = sbr.rel (%p798_p7) target bundleno = 30 (0x1e), region = 16 }
  0x12   : > { %150 = sbr.rel (!%p43_p3) target bundleno = 30 (0x1e), region = 20  ;;  %s152_s23 = sand.u32 (%p43_p3), 1, %s912_s13  }
  0x13   : > { %s828_s24 = sshll.u32 (%p43_p3), %s920_s15, 3  ;;  %s799_s25 = sshll.u32 (%p43_p3), %s152_s23, 7 }
  0x14   : > { %s994_s28 = scalar_lea.vmem (%p43_p3), %s1171_s0, %s828_s24  ;;  %s154_s29 = scalar_lea.vmem (%p43_p3), [#allocation2], %s799_s25 }
  0x15   : > { %v218_v0 = vld [vmem:[%s994_s28] sm:$0xff] (%p43_p3)  ;;  %v220_v1 = vld [vmem:[%s994_s28 + $0x10] sm:$0xff] (%p43_p3) }
  0x16   : > { %v222_v2 = vld [vmem:[%s994_s28 + $0x20] sm:$0xff] (%p43_p3)  ;;  %219 = vst [vmem:[%s154_s29] sm:$0xff] (%p43_p3), %v218_v0  ;;  %221 = vst [vmem:[%s154_s29 + $0x8] sm:$0xff] (%p43_p3), %v220_v1  ;;  %v224_v3 = vld [vmem:[%s994_s28 + $0x30] sm:$0xff] (%p43_p3) }
  0x17   : > { %223 = vst [vmem:[%s154_s29 + $0x10] sm:$0xff] (%p43_p3), %v222_v2  ;;  %v226_v4 = vld [vmem:[%s994_s28 + $0x40] sm:$0xff] (%p43_p3)  ;;  %v228_v5 = vld [vmem:[%s994_s28 + $0x50] sm:$0xff] (%p43_p3)  ;;  %225 = vst [vmem:[%s154_s29 + $0x18] sm:$0xff] (%p43_p3), %v224_v3 }
  0x18   : > { %227 = vst [vmem:[%s154_s29 + $0x20] sm:$0xff] (%p43_p3), %v226_v4  ;;  %229 = vst [vmem:[%s154_s29 + $0x28] sm:$0xff] (%p43_p3), %v228_v5  ;;  %v230_v6 = vld [vmem:[%s994_s28 + $0x60] sm:$0xff] (%p43_p3)  ;;  %v232_v7 = vld [vmem:[%s994_s28 + $0x70] sm:$0xff] (%p43_p3) }
  0x19   : > { %v234_v8 = vld [vmem:[%s994_s28 + $0x80] sm:$0xff]  ;;  %231 = vst [vmem:[%s154_s29 + $0x30] sm:$0xff] %v230_v6  ;;  %233 = vst [vmem:[%s154_s29 + $0x38] sm:$0xff] %v232_v7  ;;  %v236_v9 = vld [vmem:[%s994_s28 + $0x90] sm:$0xff] }
  0x1a   : > { %235 = vst [vmem:[%s154_s29 + $0x40] sm:$0xff] %v234_v8  ;;  %v238_v10 = vld [vmem:[%s994_s28 + $0xa0] sm:$0xff]  ;;  %v240_v11 = vld [vmem:[%s994_s28 + $0xb0] sm:$0xff]  ;;  %237 = vst [vmem:[%s154_s29 + $0x48] sm:$0xff] %v236_v9 }
  0x1b   : > { %239 = vst [vmem:[%s154_s29 + $0x50] sm:$0xff] %v238_v10  ;;  %241 = vst [vmem:[%s154_s29 + $0x58] sm:$0xff] %v240_v11  ;;  %v242_v12 = vld [vmem:[%s994_s28 + $0xc0] sm:$0xff]  ;;  %v244_v13 = vld [vmem:[%s994_s28 + $0xd0] sm:$0xff] }
  0x1c   : > { %v246_v14 = vld [vmem:[%s994_s28 + $0xe0] sm:$0xff]  ;;  %243 = vst [vmem:[%s154_s29 + $0x60] sm:$0xff] %v242_v12  ;;  %245 = vst [vmem:[%s154_s29 + $0x68] sm:$0xff] %v244_v13  ;;  %v248_v15 = vld [vmem:[%s994_s28 + $0xf0] sm:$0xff] }
  0x1d   : > { %247 = vst [vmem:[%s154_s29 + $0x70] sm:$0xff] %v246_v14  ;;  %249 = vst [vmem:[%s154_s29 + $0x78] sm:$0xff] %v248_v15 }
  0x1e PF: > { %p802_p8 = scmp.ge.s32.totalorder %s924_s16, 1  ;;  %p270_p9 = scmp.lt.s32.totalorder %s924_s16, 3 }
  0x20   : > { %p271_p10 = pnand %p802_p8, %p270_p9 }
  0x21   : > { %s277_s30 = sand.u32 (!%p271_p10), 1, %s908_s12   ;;  %s805_s4 = sshll.u32 (!%p271_p10), %s916_s14, 1  ;;  %v371_v16 = vlaneseq (!%p271_p10) }
  0x22   : > { %274 = sbr.rel (%p271_p10) target bundleno = 93 (0x5d), region = 66  ;;  %s1016_s5 = sshll.u32 (!%p271_p10), %s277_s30, 7 }
  0x23   : > { %p310_p11 = scmp.lt.s32.totalorder (!%p271_p10), %s805_s4, 3  ;;  %v372_v17 = vshrl.u32 (!%p271_p10), %v371_v16, 7  ;;  %s1019_s6 = scalar_lea.vmem (!%p271_p10), [#allocation2], %s1016_s5 }
  0x24   : > { %v321_v18 = vld [vmem:[%s1019_s6] sm:$0xff] (!%p271_p10)  ;;  %v322_v19 = vld [vmem:[%s1019_s6 + $0x8] sm:$0xff] (!%p271_p10)  ;;  %v323_v20 = vld [vmem:[%s1019_s6 + $0x10] sm:$0xff] (!%p271_p10)  ;;  %s1064_s18 = scalar_lea.vmem (!%p271_p10), [#allocation3], %s1016_s5 }
  0x25   : > { %v337_v21 = vunpack.c.l.bf16 (!%p271_p10), %v321_v18  ;;  %v338_v22 = vunpack.c.h.bf16 (!%p271_p10), %v321_v18  ;;  %v373_v23 = vsub.s32 (!%p271_p10), 0, %v372_v17  ;;  %v377_v24 = vsub.s32 (!%p271_p10), 1, %v372_v17  ;;  %v324_v25 = vld [vmem:[%s1019_s6 + $0x18] sm:$0xff] (!%p271_p10)  ;;  %v325_v26 = vld [vmem:[%s1019_s6 + $0x20] sm:$0xff] (!%p271_p10)  ;;  %v326_v31 = vld [vmem:[%s1019_s6 + $0x28] sm:$0xff] (!%p271_p10) }
  0x26   : > { %v339_v27 = vunpack.c.l.bf16 (!%p271_p10), %v322_v19  ;;  %v340_v28 = vunpack.c.h.bf16 (!%p271_p10), %v322_v19  ;;  %v341_v29 = vunpack.c.l.bf16 (!%p271_p10), %v323_v20  ;;  %v342_v30 = vunpack.c.h.bf16 (!%p271_p10), %v323_v20  ;;  %v327_v32 = vld [vmem:[%s1019_s6 + $0x30] sm:$0xff] (!%p271_p10)  ;;  %v328_v11 = vld [vmem:[%s1019_s6 + $0x38] sm:$0xff] (!%p271_p10) }
  0x27   : > { %v343_v35 = vunpack.c.l.bf16 (!%p271_p10), %v324_v25  ;;  %v344_v36 = vunpack.c.h.bf16 (!%p271_p10), %v324_v25  ;;  %v345_v37 = vunpack.c.l.bf16 (!%p271_p10), %v325_v26  ;;  %v346_v38 = vunpack.c.h.bf16 (!%p271_p10), %v325_v26 }
  0x28   : > { %v347_v43 = vunpack.c.l.bf16 (!%p271_p10), %v326_v31  ;;  %v348_v44 = vunpack.c.h.bf16 (!%p271_p10), %v326_v31  ;;  %v349_v45 = vunpack.c.l.bf16 (!%p271_p10), %v327_v32  ;;  %v350_v46 = vunpack.c.h.bf16 (!%p271_p10), %v327_v32 }
  0x29   : > { %s1183_s4 = smov (!%p310_p11, %s805_s4), 3  ;;  %s845_s19 = sshll.u32 (%p981_p6), %s916_s14, 3 }
  0x2a   : > { %s312_s9 = scalar_lea.vmem %s1172_s1, %s1183_s4  ;;  %s317_s12 = scalar_lea.vmem %s1173_s2, %s1183_s4 }
  0x2b   : > { %v369_v33 = vld [vmem:[%s312_s9] sm:$0x3]  ;;  %s613_s24 = scalar_lea.vmem (%p981_p6), %s1174_s3, %s845_s19 }
  0x2c   : > { %v413_v34 = vld [vmem:[%s317_s12] sm:$0x3]  ;;  %v1034_v39 = vrot.slane %v369_v33, %v373_v23  ;;  %v1036_v40 = vrot.slane %v369_v33, %v377_v24  ;;  %v330_v33 = vld [vmem:[%s1019_s6 + $0x48] sm:$0xff] }
  0x2d   : > { %v1038_v41 = vrot.slane %v413_v34, %v373_v23  ;;  %v1040_v42 = vrot.slane %v413_v34, %v377_v24  ;;  %v352_v23 = vunpack.c.h.bf16 %v328_v11  ;;  %v329_v24 = vld [vmem:[%s1019_s6 + $0x40] sm:$0xff] }
  0x2e   : > { %v381_v47 = vmul.f32 %v1034_v39, %v337_v21  ;;  %v382_v48 = vmul.f32 %v1036_v40, %v338_v22  ;;  %v383_v49 = vmul.f32 %v1034_v39, %v339_v27  ;;  %v384_v50 = vmul.f32 %v1036_v40, %v340_v28 }
  0x2f   : > { %v385_v51 = vmul.f32 %v1034_v39, %v341_v29  ;;  %v386_v52 = vmul.f32 %v1036_v40, %v342_v30  ;;  %v387_v53 = vmul.f32 %v1034_v39, %v343_v35  ;;  %v388_v54 = vmul.f32 %v1036_v40, %v344_v36 }
  0x30   : > { %v425_v55 = vadd.f32 %v1038_v41, %v381_v47  ;;  %v426_v56 = vadd.f32 %v1040_v42, %v382_v48  ;;  %v427_v57 = vadd.f32 %v1038_v41, %v383_v49  ;;  %v428_v58 = vadd.f32 %v1040_v42, %v384_v50 }
  0x31   : > { %v429_v59 = vadd.f32 %v1038_v41, %v385_v51  ;;  %v430_v60 = vadd.f32 %v1040_v42, %v386_v52  ;;  %v431_v61 = vadd.f32 %v1038_v41, %v387_v53  ;;  %v432_v62 = vadd.f32 %v1040_v42, %v388_v54  ;;  %v332_v51 = vld [vmem:[%s1019_s6 + $0x58] sm:$0xff] }
  0x32   : > { %v457_v63 = vmax.f32 %v425_v55, 0.0  ;;  %v458_v0 = vmax.f32 %v426_v56, 0.0  ;;  %v459_v1 = vmax.f32 %v427_v57, 0.0  ;;  %v460_v2 = vmax.f32 %v428_v58, 0.0 }
  0x33   : > { %v461_v3 = vmax.f32 %v429_v59, 0.0  ;;  %v462_v4 = vmax.f32 %v430_v60, 0.0  ;;  %v463_v5 = vmax.f32 %v431_v61, 0.0  ;;  %v464_v6 = vmax.f32 %v432_v62, 0.0 }
  0x34   : > { %v829_v7 = vpack.c.bf16 %v458_v0, %v457_v63  ;;  %v830_v8 = vpack.c.bf16 %v460_v2, %v459_v1  ;;  %v389_v9 = vmul.f32 %v1034_v39, %v345_v37  ;;  %v390_v10 = vmul.f32 %v1036_v40, %v346_v38  ;;  %v331_v38 = vld [vmem:[%s1019_s6 + $0x50] sm:$0xff]  ;;  %v333_v0 = vld [vmem:[%s1019_s6 + $0x60] sm:$0xff] }
  0x35   : > { %v831_v12 = vpack.c.bf16 %v462_v4, %v461_v3  ;;  %v832_v13 = vpack.c.bf16 %v464_v6, %v463_v5  ;;  %v391_v14 = vmul.f32 %v1034_v39, %v347_v43  ;;  %v392_v15 = vmul.f32 %v1036_v40, %v348_v44 }
  0x36   : > { %585 = vst [vmem:[%s1064_s18] sm:$0xff] %v829_v7  ;;  %586 = vst [vmem:[%s1064_s18 + $0x8] sm:$0xff] %v830_v8  ;;  %v433_v16 = vadd.f32 %v1038_v41, %v389_v9  ;;  %v434_v17 = vadd.f32 %v1040_v42, %v390_v10  ;;  %v393_v18 = vmul.f32 %v1034_v39, %v349_v45  ;;  %v351_v22 = vunpack.c.l.bf16 %v328_v11 }
  0x37   : > { %v394_v19 = vmul.f32 %v1036_v40, %v350_v46  ;;  %587 = vst [vmem:[%s1064_s18 + $0x10] sm:$0xff] %v831_v12  ;;  %588 = vst [vmem:[%s1064_s18 + $0x18] sm:$0xff] %v832_v13  ;;  %v435_v20 = vadd.f32 %v1038_v41, %v391_v14  ;;  %v436_v21 = vadd.f32 %v1040_v42, %v392_v15  ;;  %v353_v37 = vunpack.c.l.bf16 %v329_v24  ;;  %v334_v13 = vld [vmem:[%s1019_s6 + $0x68] sm:$0xff] }
  0x38   : > { %v465_v25 = vmax.f32 %v433_v16, 0.0  ;;  %v466_v26 = vmax.f32 %v434_v17, 0.0  ;;  %v437_v27 = vadd.f32 %v1038_v41, %v393_v18  ;;  %v395_v31 = vmul.f32 %v1034_v39, %v351_v22  ;;  %v335_v18 = vld [vmem:[%s1019_s6 + $0x70] sm:$0xff] }
  0x39   : > { %v438_v28 = vadd.f32 %v1040_v42, %v394_v19  ;;  %v467_v29 = vmax.f32 %v435_v20, 0.0  ;;  %v468_v30 = vmax.f32 %v436_v21, 0.0  ;;  %v396_v32 = vmul.f32 %v1036_v40, %v352_v23 }
  0x3a   : > { %v833_v34 = vpack.c.bf16 %v466_v26, %v465_v25  ;;  %v469_v35 = vmax.f32 %v437_v27, 0.0  ;;  %v439_v44 = vadd.f32 %v1038_v41, %v395_v31  ;;  %v354_v46 = vunpack.c.h.bf16 %v329_v24  ;;  %v336_v27 = vld [vmem:[%s1019_s6 + $0x78] sm:$0xff] }
  0x3b   : > { %v470_v36 = vmax.f32 %v438_v28, 0.0  ;;  %v834_v43 = vpack.c.bf16 %v468_v30, %v467_v29  ;;  %v440_v45 = vadd.f32 %v1040_v42, %v396_v32  ;;  %v397_v48 = vmul.f32 %v1034_v39, %v353_v37 }
  0x3c   : > { %589 = vst [vmem:[%s1064_s18 + $0x20] sm:$0xff] %v833_v34  ;;  %v355_v49 = vunpack.c.l.bf16 %v330_v33  ;;  %v356_v50 = vunpack.c.h.bf16 %v330_v33  ;;  %v471_v52 = vmax.f32 %v439_v44, 0.0  ;;  %v398_v54 = vmul.f32 %v1036_v40, %v354_v46 }
  0x3d   : > { %v835_v47 = vpack.c.bf16 %v470_v36, %v469_v35  ;;  %590 = vst [vmem:[%s1064_s18 + $0x28] sm:$0xff] %v834_v43  ;;  %v472_v53 = vmax.f32 %v440_v45, 0.0  ;;  %v357_v55 = vunpack.c.l.bf16 %v331_v38  ;;  %v441_v56 = vadd.f32 %v1038_v41, %v397_v48 }
  0x3e   : > { %v399_v57 = vmul.f32 %v1034_v39, %v355_v49  ;;  %v400_v58 = vmul.f32 %v1036_v40, %v356_v50  ;;  %v358_v59 = vunpack.c.h.bf16 %v331_v38  ;;  %v442_v61 = vadd.f32 %v1040_v42, %v398_v54 }
  0x3f   : > { %591 = vst [vmem:[%s1064_s18 + $0x30] sm:$0xff] %v835_v47  ;;  %v836_v60 = vpack.c.bf16 %v472_v53, %v471_v52  ;;  %v401_v62 = vmul.f32 %v1034_v39, %v357_v55  ;;  %v359_v63 = vunpack.c.l.bf16 %v332_v51  ;;  %v473_v1 = vmax.f32 %v441_v56, 0.0 }
  0x40   : > { %v443_v2 = vadd.f32 %v1038_v41, %v399_v57  ;;  %v444_v3 = vadd.f32 %v1040_v42, %v400_v58  ;;  %v402_v4 = vmul.f32 %v1036_v40, %v358_v59  ;;  %v474_v5 = vmax.f32 %v442_v61, 0.0 }
  0x41   : > { %592 = vst [vmem:[%s1064_s18 + $0x38] sm:$0xff] %v836_v60  ;;  %v445_v6 = vadd.f32 %v1038_v41, %v401_v62  ;;  %v360_v7 = vunpack.c.h.bf16 %v332_v51  ;;  %v403_v8 = vmul.f32 %v1034_v39, %v359_v63  ;;  %v361_v12 = vunpack.c.l.bf16 %v333_v0 }
  0x42   : > { %v475_v9 = vmax.f32 %v443_v2, 0.0  ;;  %v476_v10 = vmax.f32 %v444_v3, 0.0  ;;  %v446_v11 = vadd.f32 %v1040_v42, %v402_v4  ;;  %v837_v14 = vpack.c.bf16 %v474_v5, %v473_v1  ;;  %v677_v1 = vld [vmem:[%s1064_s18 + $0x18] sm:$0xff] (%p981_p6) }
  0x43   : > { %v477_v15 = vmax.f32 %v445_v6, 0.0  ;;  %v404_v16 = vmul.f32 %v1036_v40, %v360_v7  ;;  %v447_v17 = vadd.f32 %v1038_v41, %v403_v8  ;;  %v362_v21 = vunpack.c.h.bf16 %v333_v0  ;;  %v679_v2 = vld [vmem:[%s1064_s18 + $0x20] sm:$0xff] (%p981_p6)  ;;  %678 = vst [vmem:[%s613_s24 + $0x30] sm:$0xff] (%p981_p6), %v677_v1 }
  0x44   : > { %v838_v19 = vpack.c.bf16 %v476_v10, %v475_v9  ;;  %v478_v20 = vmax.f32 %v446_v11, 0.0  ;;  %v405_v22 = vmul.f32 %v1034_v39, %v361_v12  ;;  %593 = vst [vmem:[%s1064_s18 + $0x40] sm:$0xff] %v837_v14  ;;  %v363_v25 = vunpack.c.l.bf16 %v334_v13  ;;  %v681_v3 = vld [vmem:[%s1064_s18 + $0x28] sm:$0xff] (%p981_p6)  ;;  %680 = vst [vmem:[%s613_s24 + $0x40] sm:$0xff] (%p981_p6), %v679_v2 }
  0x45   : > { %v448_v23 = vadd.f32 %v1040_v42, %v404_v16  ;;  %v479_v24 = vmax.f32 %v447_v17, 0.0  ;;  %v364_v26 = vunpack.c.h.bf16 %v334_v13  ;;  %v406_v29 = vmul.f32 %v1036_v40, %v362_v21  ;;  %682 = vst [vmem:[%s613_s24 + $0x50] sm:$0xff] (%p981_p6), %v681_v3 }
  0x46   : > { %594 = vst [vmem:[%s1064_s18 + $0x48] sm:$0xff] %v838_v19  ;;  %v839_v28 = vpack.c.bf16 %v478_v20, %v477_v15  ;;  %v449_v30 = vadd.f32 %v1038_v41, %v405_v22  ;;  %v365_v31 = vunpack.c.l.bf16 %v335_v18  ;;  %v407_v33 = vmul.f32 %v1034_v39, %v363_v25  ;;  %v683_v4 = vld [vmem:[%s1064_s18 + $0x30] sm:$0xff] (%p981_p6) }
  0x47   : > { %v480_v32 = vmax.f32 %v448_v23, 0.0  ;;  %v408_v34 = vmul.f32 %v1036_v40, %v364_v26  ;;  %v366_v35 = vunpack.c.h.bf16 %v335_v18  ;;  %v450_v36 = vadd.f32 %v1040_v42, %v406_v29  ;;  %684 = vst [vmem:[%s613_s24 + $0x60] sm:$0xff] (%p981_p6), %v683_v4 }
  0x48   : > { %595 = vst [vmem:[%s1064_s18 + $0x50] sm:$0xff] %v839_v28  ;;  %v481_v37 = vmax.f32 %v449_v30, 0.0  ;;  %v409_v38 = vmul.f32 %v1034_v39, %v365_v31  ;;  %v367_v43 = vunpack.c.l.bf16 %v336_v27  ;;  %v451_v45 = vadd.f32 %v1038_v41, %v407_v33  ;;  %v685_v5 = vld [vmem:[%s1064_s18 + $0x38] sm:$0xff] (%p981_p6) }
  0x49   : > { %v840_v44 = vpack.c.bf16 %v480_v32, %v479_v24  ;;  %v452_v46 = vadd.f32 %v1040_v42, %v408_v34  ;;  %v410_v47 = vmul.f32 %v1036_v40, %v366_v35  ;;  %v482_v48 = vmax.f32 %v450_v36, 0.0  ;;  %686 = vst [vmem:[%s613_s24 + $0x70] sm:$0xff] (%p981_p6), %v685_v5 }
  0x4a   : > { %v453_v49 = vadd.f32 %v1038_v41, %v409_v38  ;;  %v368_v50 = vunpack.c.h.bf16 %v336_v27  ;;  %v411_v51 = vmul.f32 %v1034_v39, %v367_v43  ;;  %v483_v52 = vmax.f32 %v451_v45, 0.0 }
  0x4b   : > { %596 = vst [vmem:[%s1064_s18 + $0x58] sm:$0xff] %v840_v44  ;;  %v484_v53 = vmax.f32 %v452_v46, 0.0  ;;  %v454_v54 = vadd.f32 %v1040_v42, %v410_v47  ;;  %v841_v55 = vpack.c.bf16 %v482_v48, %v481_v37  ;;  %v687_v6 = vld [vmem:[%s1064_s18 + $0x40] sm:$0xff] (%p981_p6) }
  0x4c   : > { %v485_v56 = vmax.f32 %v453_v49, 0.0  ;;  %v412_v57 = vmul.f32 %v1036_v40, %v368_v50  ;;  %v455_v58 = vadd.f32 %v1038_v41, %v411_v51  ;;  %v671_v40 = vld [vmem:[%s1064_s18] sm:$0xff] (%p981_p6)  ;;  %v673_v41 = vld [vmem:[%s1064_s18 + $0x8] sm:$0xff] (%p981_p6)  ;;  %688 = vst [vmem:[%s613_s24 + $0x80] sm:$0xff] (%p981_p6), %v687_v6 }
  0x4d   : > { %v842_v59 = vpack.c.bf16 %v484_v53, %v483_v52  ;;  %v486_v60 = vmax.f32 %v454_v54, 0.0  ;;  %597 = vst [vmem:[%s1064_s18 + $0x60] sm:$0xff] %v841_v55  ;;  %672 = vst [vmem:[%s613_s24] sm:$0xff] (%p981_p6), %v671_v40  ;;  %v689_v7 = vld [vmem:[%s1064_s18 + $0x48] sm:$0xff] (%p981_p6) }
  0x4e   : > { %v456_v61 = vadd.f32 %v1040_v42, %v412_v57  ;;  %v487_v62 = vmax.f32 %v455_v58, 0.0  ;;  %607 = sbr.rel (!%p981_p6) target bundleno = 93 (0x5d), region = 74  ;;  %v675_v42 = vld [vmem:[%s1064_s18 + $0x10] sm:$0xff] (%p981_p6)  ;;  %674 = vst [vmem:[%s613_s24 + $0x10] sm:$0xff] (%p981_p6), %v673_v41  ;;  %690 = vst [vmem:[%s613_s24 + $0x90] sm:$0xff] (%p981_p6), %v689_v7 }
  0x4f   : > { %598 = vst [vmem:[%s1064_s18 + $0x68] sm:$0xff] %v842_v59  ;;  %v843_v39 = vpack.c.bf16 %v486_v60, %v485_v56  ;;  %676 = vst [vmem:[%s613_s24 + $0x20] sm:$0xff] (%p981_p6), %v675_v42  ;;  %v691_v8 = vld [vmem:[%s1064_s18 + $0x50] sm:$0xff] (%p981_p6) }
  0x50   : > { %v488_v63 = vmax.f32 %v456_v61, 0.0  ;;  %692 = vst [vmem:[%s613_s24 + $0xa0] sm:$0xff] (%p981_p6), %v691_v8 }
  0x51   : > { %599 = vst [vmem:[%s1064_s18 + $0x70] sm:$0xff] %v843_v39 }
  0x52   : > { %v844_v0 = vpack.c.bf16 %v488_v63, %v487_v62  ;;  %v693_v9 = vld [vmem:[%s1064_s18 + $0x58] sm:$0xff] (%p981_p6) }
  0x53   : > { %694 = vst [vmem:[%s613_s24 + $0xb0] sm:$0xff] (%p981_p6), %v693_v9 }
  0x54   : > { %600 = vst [vmem:[%s1064_s18 + $0x78] sm:$0xff] %v844_v0  ;;  %v695_v10 = vld [vmem:[%s1064_s18 + $0x60] sm:$0xff] (%p981_p6) }
  0x55   : > { %696 = vst [vmem:[%s613_s24 + $0xc0] sm:$0xff] %v695_v10 }
  0x56   : > { %v697_v11 = vld [vmem:[%s1064_s18 + $0x68] sm:$0xff] }
  0x57   : > { %698 = vst [vmem:[%s613_s24 + $0xd0] sm:$0xff] %v697_v11 }
  0x58   : > { %v699_v12 = vld [vmem:[%s1064_s18 + $0x70] sm:$0xff] }
  0x59   : > { %700 = vst [vmem:[%s613_s24 + $0xe0] sm:$0xff] %v699_v12 }
  0x5b   : > { %v701_v13 = vld [vmem:[%s1064_s18 + $0x78] sm:$0xff] }
  0x5c   : > { %702 = vst [vmem:[%s613_s24 + $0xf0] sm:$0xff] %v701_v13 }
  0x5d PF: > { %s13_s16 = sadd.s32 1, %s924_s16   ;;  %s1176_s12 = smov %s912_s13 }
  0x5e   : > { %p10_p12 = scmp.ge.s32.totalorder %s13_s16, 4   ;;  %s1177_s13 = smov %s986_s22 }
  0x5f   : > { %s1178_s14 = smov %s920_s15  ;;  %s1179_s15 = smov %s1181_s17 }
  0x60   :  { %12 = sbr.rel (!%p10_p12) target bundleno = 3 (0x3), region = 149 }

// kernel: g_basic_forward.13
= control target key start
LH: loop header
LB: loop body
LE: loop exit
PB: predicated region body
PF: predicated region fallthrough
CT: control target
= control target key end

     0   :  { %s2282_s12 = smov 0   ;;  %s2284_s13 = smov 0   ;;  %s2645_s0 = inlined_call_operand.vmem [shape: bf16[192,2048], index: 0, kind: input, shape index: {}]   ;;  %s2646_s1 = inlined_call_operand.vmem [shape: bf16[2048,128], index: 1, kind: input, shape index: {}]   ;;  %s2647_s2 = inlined_call_operand.vmem [shape: f32[1,128], index: 2, kind: input, shape index: {}]   ;;  %s2648_s3 = inlined_call_operand.vmem [shape: f32[192,128], index: 3, kind: output, shape index: {}]  }
   0x1   :  { %s2286_s14 = smov 0   ;;  %s2288_s15 = smov 0  }
   0x2   :  { %s2290_s16 = smov 0   ;;  %s2292_s17 = smov 0  }
   0x3   :  { %s2294_s18 = smov 0  }
   0x4 LB: > { %s25_s19 = sadd.s32 1, %s2251_s16  ;;  %s32_s20 = sadd.s32 1, %s2255_s17  ;;  %s2259_s18 = sphi %s2294_s18, %s13_s18   ;;  %s2255_s17 = sphi %s2292_s17, %s2654_s17   ;;  %s2251_s16 = sphi %s2290_s16, %s2653_s16   ;;  %s2247_s15 = sphi %s2288_s15, %s2652_s15   ;;  %s2243_s14 = sphi %s2286_s14, %s2651_s14   ;;  %s2239_s13 = sphi %s2284_s13, %s2650_s13   ;;  %s2235_s12 = sphi %s2282_s12, %s2649_s12  }
   0x5   : > { %p26_p0 = scmp.ge.s32.totalorder %s25_s19, 2  ;;  %p48_p1 = scmp.ne.s32.totalorder %s2239_s13, %s2235_s12 }
   0x6   : > { %p49_p2 = scmp.eq.s32.totalorder %s2259_s18, 0  ;;  %s41_s24 = sadd.s32 1, %s2239_s13 }
   0x7   : > { %s2656_s19 = smov (%p26_p0, %s25_s19), 0  ;;  %s2658_s20 = smov (!%p26_p0, %s32_s20), %s2255_s17 }
   0x8   : > { %p50_p3 = por %p49_p2, %p48_p1  ;;  %p34_p4 = scmp.ge.s32.totalorder %s2658_s20, 2 }
   0x9   : > { %s37_s21 = ssub.s32 %s2251_s16, %s2656_s19  ;;  %p1724_p6 = scmp.ge.s32.totalorder %s2259_s18, 4 }
   0xa   : > { %s2660_s20 = smov (%p34_p4, %s2658_s20), 0 }
   0xb   : > { %s36_s22 = ssub.s32 %s2255_s17, %s2660_s20  ;;  %162 = sbr.rel (%p1724_p6) target bundleno = 50 (0x32), region = 20 }
   0xc   : > { %s38_s23 = sor.u32 %s37_s21, %s36_s22 }
   0xd   : > { %p39_p5 = scmp.eq.s32.totalorder %s38_s23, 0 }
   0xf   : > { %s2333_s25 = scalar_select %p39_p5, %s2239_s13, %s41_s24  }
  0x12   : > { %165 = sbr.rel (!%p50_p3) target bundleno = 50 (0x32), region = 24  ;;  %s167_s26 = sand.u32 (%p50_p3), 1, %s2239_s13  }
  0x13   : > { %s2058_s27 = smul.u32 (%p50_p3), 384, %s167_s26  ;;  %s1725_s28 = sshll.u32 (%p50_p3), %s2251_s16, 3 }
  0x14   : > { %s1849_s29 = smul.u32 (%p50_p3), 192, %s2255_s17 }
  0x15   : > { %s2347_s8 = scalar_lea.vmem (%p50_p3), [#allocation3], %s2058_s27 }
  0x16   : > { %s173_s30 = sadd.s32 (%p50_p3), %s1849_s29, %s1725_s28 }
  0x17   : > { %s1727_s4 = sshll.u32 (%p50_p3), %s173_s30, 2 }
  0x18   : > { %s2342_s7 = scalar_lea.vmem (%p50_p3), %s2645_s0, %s1727_s4 }
  0x19   : > { %v188_v0 = vld [vmem:[%s2342_s7] sm:$0xff]  ;;  %v190_v1 = vld [vmem:[%s2342_s7 + $0x8] sm:$0xff]  ;;  %v192_v2 = vld [vmem:[%s2342_s7 + $0x10] sm:$0xff] }
  0x1a   : > { %189 = vst [vmem:[%s2347_s8] sm:$0xff] %v188_v0  ;;  %191 = vst [vmem:[%s2347_s8 + $0x8] sm:$0xff] %v190_v1  ;;  %v194_v3 = vld [vmem:[%s2342_s7 + $0x18] sm:$0xff]  ;;  %v196_v4 = vld [vmem:[%s2342_s7 + $0x40] sm:$0xff] }
  0x1b   : > { %193 = vst [vmem:[%s2347_s8 + $0x10] sm:$0xff] %v192_v2  ;;  %v198_v5 = vld [vmem:[%s2342_s7 + $0x48] sm:$0xff]  ;;  %195 = vst [vmem:[%s2347_s8 + $0x18] sm:$0xff] %v194_v3  ;;  %v200_v6 = vld [vmem:[%s2342_s7 + $0x50] sm:$0xff] }
  0x1c   : > { %197 = vst [vmem:[%s2347_s8 + $0x20] sm:$0xff] %v196_v4  ;;  %199 = vst [vmem:[%s2347_s8 + $0x28] sm:$0xff] %v198_v5  ;;  %v202_v7 = vld [vmem:[%s2342_s7 + $0x58] sm:$0xff]  ;;  %v204_v8 = vld [vmem:[%s2342_s7 + $0x80] sm:$0xff] }
  0x1d   : > { %201 = vst [vmem:[%s2347_s8 + $0x30] sm:$0xff] %v200_v6  ;;  %203 = vst [vmem:[%s2347_s8 + $0x38] sm:$0xff] %v202_v7  ;;  %v206_v9 = vld [vmem:[%s2342_s7 + $0x88] sm:$0xff]  ;;  %v208_v10 = vld [vmem:[%s2342_s7 + $0x90] sm:$0xff] }
  0x1e   : > { %205 = vst [vmem:[%s2347_s8 + $0x40] sm:$0xff] %v204_v8  ;;  %v210_v11 = vld [vmem:[%s2342_s7 + $0x98] sm:$0xff]  ;;  %207 = vst [vmem:[%s2347_s8 + $0x48] sm:$0xff] %v206_v9  ;;  %v212_v12 = vld [vmem:[%s2342_s7 + $0xc0] sm:$0xff] }
  0x1f   : > { %209 = vst [vmem:[%s2347_s8 + $0x50] sm:$0xff] %v208_v10  ;;  %211 = vst [vmem:[%s2347_s8 + $0x58] sm:$0xff] %v210_v11  ;;  %v214_v13 = vld [vmem:[%s2342_s7 + $0xc8] sm:$0xff]  ;;  %v216_v14 = vld [vmem:[%s2342_s7 + $0xd0] sm:$0xff] }
  0x20   : > { %213 = vst [vmem:[%s2347_s8 + $0x60] sm:$0xff] %v212_v12  ;;  %215 = vst [vmem:[%s2347_s8 + $0x68] sm:$0xff] %v214_v13  ;;  %v218_v15 = vld [vmem:[%s2342_s7 + $0xd8] sm:$0xff]  ;;  %v220_v16 = vld [vmem:[%s2342_s7 + $0x100] sm:$0xff] }
  0x21   : > { %217 = vst [vmem:[%s2347_s8 + $0x70] sm:$0xff] %v216_v14  ;;  %v222_v17 = vld [vmem:[%s2342_s7 + $0x108] sm:$0xff]  ;;  %219 = vst [vmem:[%s2347_s8 + $0x78] sm:$0xff] %v218_v15  ;;  %v224_v18 = vld [vmem:[%s2342_s7 + $0x110] sm:$0xff] }
  0x22   : > { %221 = vst [vmem:[%s2347_s8 + $0x80] sm:$0xff] %v220_v16  ;;  %223 = vst [vmem:[%s2347_s8 + $0x88] sm:$0xff] %v222_v17  ;;  %v226_v19 = vld [vmem:[%s2342_s7 + $0x118] sm:$0xff]  ;;  %v228_v20 = vld [vmem:[%s2342_s7 + $0x140] sm:$0xff] }
  0x23   : > { %225 = vst [vmem:[%s2347_s8 + $0x90] sm:$0xff] %v224_v18  ;;  %227 = vst [vmem:[%s2347_s8 + $0x98] sm:$0xff] %v226_v19  ;;  %v230_v21 = vld [vmem:[%s2342_s7 + $0x148] sm:$0xff]  ;;  %v232_v22 = vld [vmem:[%s2342_s7 + $0x150] sm:$0xff] }
  0x24   : > { %229 = vst [vmem:[%s2347_s8 + $0xa0] sm:$0xff] %v228_v20  ;;  %v234_v23 = vld [vmem:[%s2342_s7 + $0x158] sm:$0xff]  ;;  %231 = vst [vmem:[%s2347_s8 + $0xa8] sm:$0xff] %v230_v21  ;;  %v236_v24 = vld [vmem:[%s2342_s7 + $0x180] sm:$0xff] }
  0x25   : > { %233 = vst [vmem:[%s2347_s8 + $0xb0] sm:$0xff] %v232_v22  ;;  %235 = vst [vmem:[%s2347_s8 + $0xb8] sm:$0xff] %v234_v23  ;;  %v238_v25 = vld [vmem:[%s2342_s7 + $0x188] sm:$0xff]  ;;  %v240_v26 = vld [vmem:[%s2342_s7 + $0x190] sm:$0xff] }
  0x26   : > { %237 = vst [vmem:[%s2347_s8 + $0xc0] sm:$0xff] %v236_v24  ;;  %239 = vst [vmem:[%s2347_s8 + $0xc8] sm:$0xff] %v238_v25  ;;  %v242_v27 = vld [vmem:[%s2342_s7 + $0x198] sm:$0xff]  ;;  %v244_v28 = vld [vmem:[%s2342_s7 + $0x1c0] sm:$0xff] }
  0x27   : > { %241 = vst [vmem:[%s2347_s8 + $0xd0] sm:$0xff] %v240_v26  ;;  %v246_v29 = vld [vmem:[%s2342_s7 + $0x1c8] sm:$0xff]  ;;  %243 = vst [vmem:[%s2347_s8 + $0xd8] sm:$0xff] %v242_v27  ;;  %v248_v30 = vld [vmem:[%s2342_s7 + $0x1d0] sm:$0xff] }
  0x28   : > { %245 = vst [vmem:[%s2347_s8 + $0xe0] sm:$0xff] %v244_v28  ;;  %247 = vst [vmem:[%s2347_s8 + $0xe8] sm:$0xff] %v246_v29  ;;  %v250_v31 = vld [vmem:[%s2342_s7 + $0x1d8] sm:$0xff]  ;;  %v252_v32 = vld [vmem:[%s2342_s7 + $0x200] sm:$0xff] }
  0x29   : > { %249 = vst [vmem:[%s2347_s8 + $0xf0] sm:$0xff] %v248_v30  ;;  %251 = vst [vmem:[%s2347_s8 + $0xf8] sm:$0xff] %v250_v31  ;;  %v254_v33 = vld [vmem:[%s2342_s7 + $0x208] sm:$0xff]  ;;  %v256_v34 = vld [vmem:[%s2342_s7 + $0x210] sm:$0xff] }
  0x2a   : > { %253 = vst [vmem:[%s2347_s8 + $0x100] sm:$0xff] %v252_v32  ;;  %v258_v35 = vld [vmem:[%s2342_s7 + $0x218] sm:$0xff]  ;;  %255 = vst [vmem:[%s2347_s8 + $0x108] sm:$0xff] %v254_v33  ;;  %v260_v36 = vld [vmem:[%s2342_s7 + $0x240] sm:$0xff] }
  0x2b   : > { %257 = vst [vmem:[%s2347_s8 + $0x110] sm:$0xff] %v256_v34  ;;  %259 = vst [vmem:[%s2347_s8 + $0x118] sm:$0xff] %v258_v35  ;;  %v262_v37 = vld [vmem:[%s2342_s7 + $0x248] sm:$0xff]  ;;  %v264_v38 = vld [vmem:[%s2342_s7 + $0x250] sm:$0xff] }
  0x2c   : > { %261 = vst [vmem:[%s2347_s8 + $0x120] sm:$0xff] %v260_v36  ;;  %263 = vst [vmem:[%s2347_s8 + $0x128] sm:$0xff] %v262_v37  ;;  %v266_v39 = vld [vmem:[%s2342_s7 + $0x258] sm:$0xff]  ;;  %v268_v40 = vld [vmem:[%s2342_s7 + $0x280] sm:$0xff] }
  0x2d   : > { %265 = vst [vmem:[%s2347_s8 + $0x130] sm:$0xff] %v264_v38  ;;  %v270_v41 = vld [vmem:[%s2342_s7 + $0x288] sm:$0xff]  ;;  %267 = vst [vmem:[%s2347_s8 + $0x138] sm:$0xff] %v266_v39  ;;  %v272_v42 = vld [vmem:[%s2342_s7 + $0x290] sm:$0xff] }
  0x2e   : > { %269 = vst [vmem:[%s2347_s8 + $0x140] sm:$0xff] %v268_v40  ;;  %271 = vst [vmem:[%s2347_s8 + $0x148] sm:$0xff] %v270_v41  ;;  %v274_v43 = vld [vmem:[%s2342_s7 + $0x298] sm:$0xff]  ;;  %v276_v44 = vld [vmem:[%s2342_s7 + $0x2c0] sm:$0xff] }
  0x2f   : > { %273 = vst [vmem:[%s2347_s8 + $0x150] sm:$0xff] %v272_v42  ;;  %275 = vst [vmem:[%s2347_s8 + $0x158] sm:$0xff] %v274_v43  ;;  %v278_v45 = vld [vmem:[%s2342_s7 + $0x2c8] sm:$0xff]  ;;  %v280_v46 = vld [vmem:[%s2342_s7 + $0x2d0] sm:$0xff] }
  0x30   : > { %277 = vst [vmem:[%s2347_s8 + $0x160] sm:$0xff] %v276_v44  ;;  %v282_v47 = vld [vmem:[%s2342_s7 + $0x2d8] sm:$0xff]  ;;  %279 = vst [vmem:[%s2347_s8 + $0x168] sm:$0xff] %v278_v45 }
  0x31   : > { %281 = vst [vmem:[%s2347_s8 + $0x170] sm:$0xff] %v280_v46  ;;  %283 = vst [vmem:[%s2347_s8 + $0x178] sm:$0xff] %v282_v47 }
  0x32 PF: > { %p1728_p7 = scmp.ge.s32.totalorder %s2259_s18, 1  ;;  %p300_p8 = scmp.lt.s32.totalorder %s2259_s18, 5 }
  0x34   : > { %p301_p9 = pnand %p1728_p7, %p300_p8 }
  0x35   : > { %s307_s9 = sand.u32 (!%p301_p9), 1, %s2235_s12   ;;  %s1729_s10 = sshll.u32 (!%p301_p9), %s2243_s14, 7 }
  0x36   : > { %304 = sbr.rel (%p301_p9) target bundleno = 438 (0x1b6), region = 51  ;;  %p347_p10 = scmp.lt.s32.totalorder (!%p301_p9), %s1729_s10, 255 }
  0x37   : > { %s2059_s11 = smul.u32 (!%p301_p9), 384, %s307_s9  ;;  %p1732_p12 = scmp.ne.s32.totalorder (!%p301_p9), %s2243_s14, 0 }
  0x38   : > { %s358_s21 = smul.u32 (!%p301_p9), 12, %s2247_s15 }
  0x39   : > { %s2457_s12 = scalar_lea.vmem (!%p301_p9), [#allocation3], %s2059_s11 }
  0x3a   : > { %p359_p11 = scmp.lt.s32.totalorder (!%p301_p9), %s358_s21, 23 }
  0x3d   : > { %s2662_s10 = smov (!%p347_p10, %s1729_s10), 255  ;;  %s2664_s21 = smov (!%p359_p11, %s358_s21), 23 }
  0x3e   : > { %s1730_s22 = sshll.u32 %s2662_s10, 2  ;;  %s1731_s27 = sshll.u32 %s2664_s21, 3  ;;  %v2261_v48 = vmov (!%p1732_p12), 0.0  }
  0x3f   : > { %s2450_s26 = scalar_lea.vmem %s2646_s1, %s1730_s22  ;;  %s2455_s30 = scalar_lea.vmem %s2648_s3, %s1731_s27  ;;  %372 = vst [vmem:[#allocation2] sm:$0xff] (!%p1732_p12), %v2261_v48  ;;  %373 = vst [vmem:[#allocation2 + $0x8] sm:$0xff] (!%p1732_p12), %v2261_v48 }
  0x40   : > { %371 = sbr.rel (%p1732_p12) target bundleno = 71 (0x47), region = 59  ;;  %374 = vst [vmem:[#allocation2 + $0x10] sm:$0xff] (!%p1732_p12), %v2261_v48  ;;  %375 = vst [vmem:[#allocation2 + $0x18] sm:$0xff] (!%p1732_p12), %v2261_v48 }
  0x41   : > { %376 = vst [vmem:[#allocation2 + $0x20] sm:$0xff] (!%p1732_p12), %v2261_v48  ;;  %377 = vst [vmem:[#allocation2 + $0x28] sm:$0xff] (!%p1732_p12), %v2261_v48 }
  0x42   : > { %378 = vst [vmem:[#allocation2 + $0x30] sm:$0xff] (!%p1732_p12), %v2261_v48  ;;  %379 = vst [vmem:[#allocation2 + $0x38] sm:$0xff] (!%p1732_p12), %v2261_v48 }
  0x43   : > { %380 = vst [vmem:[#allocation2 + $0x40] sm:$0xff] (!%p1732_p12), %v2261_v48  ;;  %381 = vst [vmem:[#allocation2 + $0x48] sm:$0xff] (!%p1732_p12), %v2261_v48 }
  0x44   : > { %382 = vst [vmem:[#allocation2 + $0x50] sm:$0xff] (!%p1732_p12), %v2261_v48  ;;  %383 = vst [vmem:[#allocation2 + $0x58] sm:$0xff] (!%p1732_p12), %v2261_v48 }
  0x47 PF: > { %v2117_v49 = vld [vmem:[%s2450_s26 + $0x40] sm:$0xff]   ;;  %v2121_v53 = vld [vmem:[%s2450_s26 + $0x48] sm:$0xff]   ;;  %v2125_v57 = vld [vmem:[%s2450_s26 + $0x50] sm:$0xff]   ;;  %p1845_p13 = scmp.ne.s32.totalorder %s2243_s14, 1 }
  0x48   : > { %v2118_v50 = vld [vmem:[%s2450_s26 + $0xc0] sm:$0xff]   ;;  %1850 = vmatprep.subr.bf16.mxu0 %v2117_v49  ;;  %v2122_v54 = vld [vmem:[%s2450_s26 + $0xc8] sm:$0xff]   ;;  %v2126_v58 = vld [vmem:[%s2450_s26 + $0xd0] sm:$0xff]  }
  0x49   : > { %v2119_v51 = vld [vmem:[%s2450_s26] sm:$0xff]   ;;  %1902 = vmatprep.subr.bf16.mxu1 %v2118_v50  ;;  %v2123_v55 = vld [vmem:[%s2450_s26 + $0x8] sm:$0xff]   ;;  %v2127_v59 = vld [vmem:[%s2450_s26 + $0x10] sm:$0xff]  }
  0x4a   : > { %v2120_v52 = vld [vmem:[%s2450_s26 + $0x80] sm:$0xff]   ;;  %1851 = vmatpush3.bf16.msra.mxu0 %v2119_v51  ;;  %v2124_v56 = vld [vmem:[%s2450_s26 + $0x88] sm:$0xff]   ;;  %v2128_v60 = vld [vmem:[%s2450_s26 + $0x90] sm:$0xff]  }
  0x4b   : > { %1903 = vmatpush3.bf16.msra.mxu1 %v2120_v52  ;;  %1852 = vmatprep.subr.bf16.mxu0 %v2121_v53  ;;  %v2129_v61 = vld [vmem:[%s2450_s26 + $0x58] sm:$0xff]   ;;  %v2133_v1 = vld [vmem:[%s2450_s26 + $0x60] sm:$0xff]   ;;  %v2137_v5 = vld [vmem:[%s2450_s26 + $0x68] sm:$0xff]  }
  0x4c   : > { %1904 = vmatprep.subr.bf16.mxu1 %v2122_v54  ;;  %v2130_v62 = vld [vmem:[%s2450_s26 + $0xd8] sm:$0xff]   ;;  %v2134_v2 = vld [vmem:[%s2450_s26 + $0xe0] sm:$0xff]   ;;  %v2138_v6 = vld [vmem:[%s2450_s26 + $0xe8] sm:$0xff]  }
  0x4d   : > { %v2131_v63 = vld [vmem:[%s2450_s26 + $0x18] sm:$0xff]   ;;  %v2135_v3 = vld [vmem:[%s2450_s26 + $0x20] sm:$0xff]   ;;  %v2139_v7 = vld [vmem:[%s2450_s26 + $0x28] sm:$0xff]  }
  0x4e   : > { %1853 = vmatpush3.bf16.msra.mxu0 %v2123_v55  ;;  %v2132_v0 = vld [vmem:[%s2450_s26 + $0x98] sm:$0xff]   ;;  %v2136_v4 = vld [vmem:[%s2450_s26 + $0xa0] sm:$0xff]   ;;  %v2140_v8 = vld [vmem:[%s2450_s26 + $0xa8] sm:$0xff]  }
  0x4f   : > { %1905 = vmatpush3.bf16.msra.mxu1 %v2124_v56  ;;  %1854 = vmatprep.subr.bf16.mxu0 %v2125_v57  ;;  %v2141_v9 = vld [vmem:[%s2450_s26 + $0x70] sm:$0xff]   ;;  %v2145_v13 = vld [vmem:[%s2450_s26 + $0x78] sm:$0xff]   ;;  %v396_v17 = vld [vmem:[%s2457_s12] sm:$0xff] }
  0x50   : > { %1906 = vmatprep.subr.bf16.mxu1 %v2126_v58  ;;  %v2142_v10 = vld [vmem:[%s2450_s26 + $0xf0] sm:$0xff]   ;;  %v2146_v14 = vld [vmem:[%s2450_s26 + $0xf8] sm:$0xff]   ;;  %v400_v18 = vld [vmem:[%s2457_s12 + $0x20] sm:$0xff] }
  0x51   : > { %v2143_v11 = vld [vmem:[%s2450_s26 + $0x30] sm:$0xff]   ;;  %v2147_v15 = vld [vmem:[%s2450_s26 + $0x38] sm:$0xff]   ;;  %v397_v19 = vld [vmem:[%s2457_s12 + $0x8] sm:$0xff]  ;;  %v1733_v20 = vcombine.low %v396_v17, %v400_v18  ;;  %v1734_v21 = vcombine.high %v396_v17, %v400_v18 }
  0x52   : > { %1855 = vmatpush3.bf16.msra.mxu0 %v2127_v59  ;;  %v2144_v12 = vld [vmem:[%s2450_s26 + $0xb0] sm:$0xff]   ;;  %v2148_v16 = vld [vmem:[%s2450_s26 + $0xb8] sm:$0xff]   ;;  %v401_v22 = vld [vmem:[%s2457_s12 + $0x28] sm:$0xff] }
  0x53   : > { %1907 = vmatpush3.bf16.msra.mxu1 %v2128_v60  ;;  %1856 = vmatprep.subr.bf16.mxu0 %v2129_v61  ;;  %v1735_v23 = vcombine.low %v397_v19, %v401_v22  ;;  %v1736_v24 = vcombine.high %v397_v19, %v401_v22  ;;  %v2149_v25 = vld [vmem:[%s2450_s26 + $0x140] sm:$0xff]   ;;  %v2153_v29 = vld [vmem:[%s2450_s26 + $0x148] sm:$0xff]   ;;  %v2157_v41 = vld [vmem:[%s2450_s26 + $0x150] sm:$0xff]  }
  0x54   : > { %1908 = vmatprep.subr.bf16.mxu1 %v2130_v62  ;;  %1228 = vmatprep.mubr.bf16.mxu0 %v1734_v21  ;;  %v2150_v26 = vld [vmem:[%s2450_s26 + $0x100] sm:$0xff]   ;;  %v405_v33 = vld [vmem:[%s2457_s12 + $0x48] sm:$0xff]  ;;  %v2158_v42 = vld [vmem:[%s2450_s26 + $0x110] sm:$0xff]  }
  0x55   : > { %1309 = vmatprep.mubr.bf16.mxu1 %v1736_v24  ;;  %v2151_v27 = vld [vmem:[%s2450_s26 + $0x1c0] sm:$0xff]   ;;  %v409_v34 = vld [vmem:[%s2457_s12 + $0x68] sm:$0xff]  ;;  %v2159_v43 = vld [vmem:[%s2450_s26 + $0x1d0] sm:$0xff]  }
  0x56   : > { %1857 = vmatpush3.bf16.msra.mxu0 %v2131_v63  ;;  %v2152_v28 = vld [vmem:[%s2450_s26 + $0x180] sm:$0xff]   ;;  %v1744_v35 = vcombine.high %v405_v33, %v409_v34  ;;  %v2154_v36 = vld [vmem:[%s2450_s26 + $0x108] sm:$0xff]   ;;  %v1743_v38 = vcombine.low %v405_v33, %v409_v34  ;;  %v2160_v50 = vld [vmem:[%s2450_s26 + $0x190] sm:$0xff]  }
  0x57   : > { %1909 = vmatpush3.bf16.msra.mxu1 %v2132_v0  ;;  %1858 = vmatprep.subr.bf16.mxu0 %v2133_v1  ;;  %v404_v30 = vld [vmem:[%s2457_s12 + $0x40] sm:$0xff]  ;;  %v2155_v39 = vld [vmem:[%s2450_s26 + $0x1c8] sm:$0xff]   ;;  %v2161_v52 = vld [vmem:[%s2450_s26 + $0x158] sm:$0xff]  }
  0x58   : > { %1910 = vmatprep.subr.bf16.mxu1 %v2134_v2  ;;  %v408_v31 = vld [vmem:[%s2457_s12 + $0x60] sm:$0xff]  ;;  %v2156_v40 = vld [vmem:[%s2450_s26 + $0x188] sm:$0xff]   ;;  %v2162_v54 = vld [vmem:[%s2450_s26 + $0x118] sm:$0xff]  }
  0x59   : > { %v1742_v32 = vcombine.high %v404_v30, %v408_v31  ;;  %v1741_v37 = vcombine.low %v404_v30, %v408_v31  ;;  %v412_v44 = vld [vmem:[%s2457_s12 + $0x80] sm:$0xff]  ;;  %v413_v46 = vld [vmem:[%s2457_s12 + $0x88] sm:$0xff]  ;;  %v2163_v55 = vld [vmem:[%s2450_s26 + $0x1d8] sm:$0xff]  }
  0x5a   : > { %1859 = vmatpush3.bf16.msra.mxu0 %v2135_v3  ;;  %v416_v45 = vld [vmem:[%s2457_s12 + $0xa0] sm:$0xff]  ;;  %v417_v47 = vld [vmem:[%s2457_s12 + $0xa8] sm:$0xff]  ;;  %v2164_v56 = vld [vmem:[%s2450_s26 + $0x198] sm:$0xff]  }
  0x5b   : > { %1911 = vmatpush3.bf16.msra.mxu1 %v2136_v4  ;;  %1860 = vmatprep.subr.bf16.mxu0 %v2137_v5  ;;  %v1750_v48 = vcombine.high %v412_v44, %v416_v45  ;;  %v1752_v49 = vcombine.high %v413_v46, %v417_v47  ;;  %v1749_v51 = vcombine.low %v412_v44, %v416_v45  ;;  %v420_v57 = vld [vmem:[%s2457_s12 + $0xc0] sm:$0xff]  ;;  %v421_v59 = vld [vmem:[%s2457_s12 + $0xc8] sm:$0xff]  ;;  %v2174_v17 = vld [vmem:[%s2450_s26 + $0x130] sm:$0xff]  }
  0x5c   : > { %1912 = vmatprep.subr.bf16.mxu1 %v2138_v6  ;;  %v1751_v53 = vcombine.low %v413_v46, %v417_v47  ;;  %v424_v58 = vld [vmem:[%s2457_s12 + $0xe0] sm:$0xff]  ;;  %v425_v61 = vld [vmem:[%s2457_s12 + $0xe8] sm:$0xff]  ;;  %v2175_v19 = vld [vmem:[%s2450_s26 + $0x1f0] sm:$0xff]  }
  0x5d   : > { %v1758_v60 = vcombine.high %v420_v57, %v424_v58  ;;  %v1760_v62 = vcombine.high %v421_v59, %v425_v61  ;;  %v2165_v63 = vld [vmem:[%s2450_s26 + $0x160] sm:$0xff]   ;;  %v1757_v1 = vcombine.low %v420_v57, %v424_v58  ;;  %v1759_v3 = vcombine.low %v421_v59, %v425_v61  ;;  %v2169_v5 = vld [vmem:[%s2450_s26 + $0x168] sm:$0xff]   ;;  %v2180_v30 = vld [vmem:[%s2450_s26 + $0x1b8] sm:$0xff]  }
  0x5e   : > { %1861 = vmatpush3.bf16.msra.mxu0 %v2139_v7  ;;  %v2166_v0 = vld [vmem:[%s2450_s26 + $0x120] sm:$0xff]   ;;  %v437_v22 = vld [vmem:[%s2457_s12 + $0x148] sm:$0xff]  ;;  %v402_v33 = vld [vmem:[%s2457_s12 + $0x30] sm:$0xff] }
  0x5f   : > { %1913 = vmatpush3.bf16.msra.mxu1 %v2140_v8  ;;  %1862 = vmatprep.subr.bf16.mxu0 %v2141_v9  ;;  %v2167_v2 = vld [vmem:[%s2450_s26 + $0x1e0] sm:$0xff]   ;;  %v429_v9 = vld [vmem:[%s2457_s12 + $0x108] sm:$0xff]  ;;  %v399_v34 = vld [vmem:[%s2457_s12 + $0x18] sm:$0xff] }
  0x60   : > { %1914 = vmatprep.subr.bf16.mxu1 %v2142_v10  ;;  %v2168_v4 = vld [vmem:[%s2450_s26 + $0x1a0] sm:$0xff]   ;;  %v433_v10 = vld [vmem:[%s2457_s12 + $0x128] sm:$0xff]  ;;  %v414_v47 = vld [vmem:[%s2457_s12 + $0x90] sm:$0xff] }
  0x61   : > { %v428_v6 = vld [vmem:[%s2457_s12 + $0x100] sm:$0xff]  ;;  %v1767_v18 = vcombine.low %v429_v9, %v433_v10  ;;  %v423_v57 = vld [vmem:[%s2457_s12 + $0xd8] sm:$0xff] }
  0x62   : > { %1863 = vmatpush3.bf16.msra.mxu0 %v2143_v11  ;;  %v432_v7 = vld [vmem:[%s2457_s12 + $0x120] sm:$0xff]  ;;  %v1768_v11 = vcombine.high %v429_v9, %v433_v10  ;;  %v427_v58 = vld [vmem:[%s2457_s12 + $0xf8] sm:$0xff] }
  0x63   : > { %1915 = vmatpush3.bf16.msra.mxu1 %v2144_v12  ;;  %1864 = vmatprep.subr.bf16.mxu0 %v2145_v13  ;;  %v1766_v8 = vcombine.high %v428_v6, %v432_v7  ;;  %v2170_v12 = vld [vmem:[%s2450_s26 + $0x128] sm:$0xff]   ;;  %v440_v21 = vld [vmem:[%s2457_s12 + $0x160] sm:$0xff]  ;;  %v439_v9 = vld [vmem:[%s2457_s12 + $0x158] sm:$0xff] }
  0x64   : > { %1916 = vmatprep.subr.bf16.mxu1 %v2146_v14  ;;  %v2171_v13 = vld [vmem:[%s2450_s26 + $0x1e8] sm:$0xff]   ;;  %v443_v10 = vld [vmem:[%s2457_s12 + $0x178] sm:$0xff] }
  0x65   : > { %v2172_v14 = vld [vmem:[%s2450_s26 + $0x1a8] sm:$0xff]  }
  0x66   : > { %1865 = vmatpush3.bf16.msra.mxu0 %v2147_v15  ;;  %v2173_v15 = vld [vmem:[%s2450_s26 + $0x170] sm:$0xff]  }
  0x67   : > { %1917 = vmatpush3.bf16.msra.mxu1 %v2148_v16  ;;  %1954 = vmatprep.subr.bf16.mxu0 %v2149_v25  ;;  %v1765_v16 = vcombine.low %v428_v6, %v432_v7  ;;  %v438_v7 = vld [vmem:[%s2457_s12 + $0x150] sm:$0xff] }
  0x68   : > { %2006 = vmatprep.subr.bf16.mxu1 %v2151_v27  ;;  %v2177_v27 = vld [vmem:[%s2450_s26 + $0x178] sm:$0xff]  }
  0x69   : > { %1229 = vmatmul.mubr.bf16.vlgmr.msra.gmra.mrb[0].mxu0 %v1733_v20  ;;  %v436_v20 = vld [vmem:[%s2457_s12 + $0x140] sm:$0xff] }
  0x6a   : > { %1310 = vmatmul.mubr.bf16.vlgmr.msra.gmra.mrb[0].mxu1 %v1735_v23  ;;  %1955 = vmatpush3.bf16.msra.mxu0 %v2150_v26  ;;  %v441_v23 = vld [vmem:[%s2457_s12 + $0x168] sm:$0xff]  ;;  %v1774_v24 = vcombine.high %v436_v20, %v440_v21  ;;  %v2176_v26 = vld [vmem:[%s2450_s26 + $0x1b0] sm:$0xff]   ;;  %v1773_v31 = vcombine.low %v436_v20, %v440_v21 }
  0x6b   : > { %2007 = vmatpush3.bf16.msra.mxu1 %v2152_v28  ;;  %1956 = vmatprep.subr.bf16.mxu0 %v2153_v29  ;;  %v1776_v25 = vcombine.high %v437_v22, %v441_v23  ;;  %v2178_v28 = vld [vmem:[%s2450_s26 + $0x138] sm:$0xff]  }
  0x6c   : > { %1236 = vmatprep.mubr.bf16.mxu0 %v1742_v32  ;;  %1317 = vmatprep.mubr.bf16.mxu1 %v1744_v35  ;;  %v2179_v29 = vld [vmem:[%s2450_s26 + $0x1f8] sm:$0xff]   ;;  %v398_v32 = vld [vmem:[%s2457_s12 + $0x10] sm:$0xff]  ;;  %v1775_v35 = vcombine.low %v437_v22, %v441_v23 }
  0x6d   : > { %2008 = vmatprep.subr.bf16.mxu1 %v2155_v39  ;;  %v406_v39 = vld [vmem:[%s2457_s12 + $0x50] sm:$0xff] }
  0x6e   : > { %1957 = vmatpush3.bf16.msra.mxu0 %v2154_v36  ;;  %v1738_v36 = vcombine.high %v398_v32, %v402_v33 }
  0x6f   : > { %2009 = vmatpush3.bf16.msra.mxu1 %v2156_v40  ;;  %1958 = vmatprep.subr.bf16.mxu0 %v2157_v41  ;;  %v410_v40 = vld [vmem:[%s2457_s12 + $0x70] sm:$0xff]  ;;  %v407_v41 = vld [vmem:[%s2457_s12 + $0x58] sm:$0xff] }
  0x70   : > { %2010 = vmatprep.subr.bf16.mxu1 %v2159_v43  ;;  %v1737_v43 = vcombine.low %v398_v32, %v402_v33  ;;  %v1746_v45 = vcombine.high %v406_v39, %v410_v40 }
  0x71   : > { %1237 = vmatmul.mubr.bf16.gmra.mrb[4].mxu0 %v1741_v37  ;;  %v403_v37 = vld [vmem:[%s2457_s12 + $0x38] sm:$0xff] }
  0x72   : > { %1318 = vmatmul.mubr.bf16.gmra.mrb[4].mxu1 %v1743_v38  ;;  %1959 = vmatpush3.bf16.msra.mxu0 %v2158_v42  ;;  %v1740_v38 = vcombine.high %v399_v34, %v403_v37  ;;  %v411_v42 = vld [vmem:[%s2457_s12 + $0x78] sm:$0xff]  ;;  %v1739_v44 = vcombine.low %v399_v34, %v403_v37 }
  0x73   : > { %1244 = vmatprep.mubr.bf16.mxu0 %v1750_v48  ;;  %1325 = vmatprep.mubr.bf16.mxu1 %v1752_v49  ;;  %v1748_v46 = vcombine.high %v407_v41, %v411_v42  ;;  %v418_v48 = vld [vmem:[%s2457_s12 + $0xb0] sm:$0xff]  ;;  %v415_v49 = vld [vmem:[%s2457_s12 + $0x98] sm:$0xff] }
  0x74   : > { %2011 = vmatpush3.bf16.msra.mxu1 %v2160_v50  ;;  %1960 = vmatprep.subr.bf16.mxu0 %v2161_v52  ;;  %v419_v50 = vld [vmem:[%s2457_s12 + $0xb8] sm:$0xff]  ;;  %v1747_v52 = vcombine.low %v407_v41, %v411_v42  ;;  %v1753_v59 = vcombine.low %v414_v47, %v418_v48 }
  0x75   : > { %2012 = vmatprep.subr.bf16.mxu1 %v2163_v55  ;;  %v422_v55 = vld [vmem:[%s2457_s12 + $0xd0] sm:$0xff] }
  0x76   : > { %1961 = vmatpush3.bf16.msra.mxu0 %v2162_v54  ;;  %v1756_v54 = vcombine.high %v415_v49, %v419_v50 }
  0x77   : > { %1962 = vmatprep.subr.bf16.mxu0 %v2165_v63  ;;  %v430_v63 = vld [vmem:[%s2457_s12 + $0x110] sm:$0xff] }
  0x78   : > { %2013 = vmatpush3.bf16.msra.mxu1 %v2164_v56  ;;  %v426_v56 = vld [vmem:[%s2457_s12 + $0xf0] sm:$0xff] }
  0x79   : > { %1245 = vmatmul.mubr.bf16.gmra.mrb[8].mxu0 %v1749_v51  ;;  %2014 = vmatprep.subr.bf16.mxu1 %v2167_v2  ;;  %v1745_v51 = vcombine.low %v406_v39, %v410_v40  ;;  %v1762_v61 = vcombine.high %v422_v55, %v426_v56  ;;  %v435_v2 = vld [vmem:[%s2457_s12 + $0x138] sm:$0xff] }
  0x7a   : > { %1326 = vmatmul.mubr.bf16.gmra.mrb[8].mxu1 %v1751_v53  ;;  %1252 = vmatprep.mubr.bf16.mxu0 %v1758_v60  ;;  %v1754_v53 = vcombine.high %v414_v47, %v418_v48  ;;  %v1755_v60 = vcombine.low %v415_v49, %v419_v50 }
  0x7b   : > { %1333 = vmatprep.mubr.bf16.mxu1 %v1760_v62  ;;  %1963 = vmatpush3.bf16.msra.mxu0 %v2166_v0  ;;  %v1764_v62 = vcombine.high %v423_v57, %v427_v58  ;;  %v434_v0 = vld [vmem:[%s2457_s12 + $0x130] sm:$0xff] }
  0x7c   : > { %2015 = vmatpush3.bf16.msra.mxu1 %v2168_v4  ;;  %1964 = vmatprep.subr.bf16.mxu0 %v2169_v5  ;;  %v1763_v4 = vcombine.low %v423_v57, %v427_v58  ;;  %v1770_v5 = vcombine.high %v430_v63, %v434_v0 }
  0x7d   : > { %2016 = vmatprep.subr.bf16.mxu1 %v2171_v13 }
  0x7f   : > { %1965 = vmatpush3.bf16.msra.mxu0 %v2170_v12 }
  0x80   : > { %2017 = vmatpush3.bf16.msra.mxu1 %v2172_v14  ;;  %1966 = vmatprep.subr.bf16.mxu0 %v2173_v15  ;;  %v1780_v14 = vcombine.high %v439_v9, %v443_v10 }
  0x81   : > { %1253 = vmatmul.mubr.bf16.gmra.mrb[12].mxu0 %v1757_v1  ;;  %2018 = vmatprep.subr.bf16.mxu1 %v2175_v19  ;;  %v431_v1 = vld [vmem:[%s2457_s12 + $0x118] sm:$0xff] }
  0x82   : > { %1334 = vmatmul.mubr.bf16.gmra.mrb[12].mxu1 %v1759_v3  ;;  %1260 = vmatprep.mubr.bf16.mxu0 %v1766_v8  ;;  %v1761_v3 = vcombine.low %v422_v55, %v426_v56  ;;  %v1772_v6 = vcombine.high %v431_v1, %v435_v2  ;;  %v442_v8 = vld [vmem:[%s2457_s12 + $0x170] sm:$0xff]  ;;  %v1771_v12 = vcombine.low %v431_v1, %v435_v2 }
  0x83   : > { %1341 = vmatprep.mubr.bf16.mxu1 %v1768_v11  ;;  %1967 = vmatpush3.bf16.msra.mxu0 %v2174_v17  ;;  %v1769_v11 = vcombine.low %v430_v63, %v434_v0  ;;  %v1778_v13 = vcombine.high %v438_v7, %v442_v8  ;;  %v1777_v15 = vcombine.low %v438_v7, %v442_v8 }
  0x84   : > { %2019 = vmatpush3.bf16.msra.mxu1 %v2176_v26  ;;  %1968 = vmatprep.subr.bf16.mxu0 %v2177_v27 }
  0x85   : > { %2020 = vmatprep.subr.bf16.mxu1 %v2179_v29 }
  0x87   : > { %1969 = vmatpush3.bf16.msra.mxu0 %v2178_v28 }
  0x88   : > { %2021 = vmatpush3.bf16.msra.mxu1 %v2180_v30 }
  0x89   : > { %1261 = vmatmul.mubr.bf16.gmra.mrb[16].mxu0 %v1765_v16  ;;  %v1779_v16 = vcombine.low %v439_v9, %v443_v10 }
  0x8a   : > { %1342 = vmatmul.mubr.bf16.gmra.mrb[16].mxu1 %v1767_v18  ;;  %1268 = vmatprep.mubr.bf16.mxu0 %v1774_v24 }
  0x8b   : > { %1349 = vmatprep.mubr.bf16.mxu1 %v1776_v25 }
  0x91   : > { %1269 = vmatmul.mubr.bf16.gmra.mrb[20].mxu0 %v1773_v31 }
  0x92   : > { %1350 = vmatmul.mubr.bf16.gmra.mrb[20].mxu1 %v1775_v35  ;;  %1390 = vmatprep.mubr.bf16.mxu0 %v1738_v36 }
  0x93   : > { %1471 = vmatprep.mubr.bf16.mxu1 %v1740_v38 }
  0x99   : > { %1391 = vmatmul.mubr.bf16.vlgmr.msra.gmra.mrb[24].mxu0 %v1737_v43 }
  0x9a   : > { %1472 = vmatmul.mubr.bf16.vlgmr.msra.gmra.mrb[24].mxu1 %v1739_v44  ;;  %1398 = vmatprep.mubr.bf16.mxu0 %v1746_v45 }
  0x9b   : > { %1479 = vmatprep.mubr.bf16.mxu1 %v1748_v46 }
  0xa1   : > { %1399 = vmatmul.mubr.bf16.gmra.mrb[28].mxu0 %v1745_v51 }
  0xa2   : > { %1480 = vmatmul.mubr.bf16.gmra.mrb[28].mxu1 %v1747_v52  ;;  %1406 = vmatprep.mubr.bf16.mxu0 %v1754_v53 }
  0xa3   : > { %1487 = vmatprep.mubr.bf16.mxu1 %v1756_v54 }
  0xa9   : > { %1407 = vmatmul.mubr.bf16.gmra.mrb[32].mxu0 %v1753_v59 }
  0xaa   : > { %1488 = vmatmul.mubr.bf16.gmra.mrb[32].mxu1 %v1755_v60  ;;  %1414 = vmatprep.mubr.bf16.mxu0 %v1762_v61 }
  0xab   : > { %1495 = vmatprep.mubr.bf16.mxu1 %v1764_v62 }
  0xb1   : > { %1415 = vmatmul.mubr.bf16.gmra.mrb[36].mxu0 %v1761_v3 }
  0xb2   : > { %1496 = vmatmul.mubr.bf16.gmra.mrb[36].mxu1 %v1763_v4  ;;  %1422 = vmatprep.mubr.bf16.mxu0 %v1770_v5 }
  0xb3   : > { %1503 = vmatprep.mubr.bf16.mxu1 %v1772_v6 }
  0xb9   : > { %1423 = vmatmul.mubr.bf16.gmra.mrb[40].mxu0 %v1769_v11 }
  0xba   : > { %1504 = vmatmul.mubr.bf16.gmra.mrb[40].mxu1 %v1771_v12  ;;  %1430 = vmatprep.mubr.bf16.mxu0 %v1778_v13 }
  0xbb   : > { %1511 = vmatprep.mubr.bf16.mxu1 %v1780_v14 }
  0xc1   : > { %1431 = vmatmul.mubr.bf16.gmra.mrb[44].mxu0 %v1777_v15 }
  0xc2   : > { %1512 = vmatmul.mubr.bf16.gmra.mrb[44].mxu1 %v1779_v16 }
 0x13c   : > { %v1866_v17 = vpop.f32.mrb[0].mxu0 }
 0x13d   : > { %v1918_v18 = vpop.f32.mrb[0].mxu1  ;;  %v1867_v19 = vpop.f32.mrb[1].mxu0 }
 0x13e   : > { %v1868_v20 = vadd.f32 %v1867_v19, %v1866_v17  ;;  %v1919_v21 = vpop.f32.mrb[1].mxu1  ;;  %v1869_v22 = vpop.f32.mrb[2].mxu0 }
 0x13f   : > { %v1920_v23 = vadd.f32 %v1919_v21, %v1918_v18  ;;  %v1921_v24 = vpop.f32.mrb[2].mxu1  ;;  %v1870_v25 = vpop.f32.mrb[3].mxu0 }
 0x140   : > { %v1871_v26 = vadd.f32 %v1870_v25, %v1869_v22  ;;  %v1922_v27 = vpop.f32.mrb[3].mxu1 }
 0x141   : > { %v2572_v28 = vadd.f32 %v1920_v23, %v1868_v20  ;;  %v1923_v29 = vadd.f32 %v1922_v27, %v1921_v24 }
 0x143   : > { %v2574_v30 = vadd.f32 %v1923_v29, %v1871_v26 }
 0x144   : > { %v1872_v31 = vpop.f32.mrb[4].mxu0 }
 0x145   : > { %v1924_v32 = vpop.f32.mrb[4].mxu1  ;;  %v1873_v33 = vpop.f32.mrb[5].mxu0 }
 0x146   : > { %v1874_v34 = vadd.f32 %v1873_v33, %v1872_v31  ;;  %v1925_v35 = vpop.f32.mrb[5].mxu1  ;;  %v1875_v36 = vpop.f32.mrb[6].mxu0 }
 0x147   : > { %v1926_v37 = vadd.f32 %v1925_v35, %v1924_v32  ;;  %v1927_v38 = vpop.f32.mrb[6].mxu1  ;;  %v1876_v39 = vpop.f32.mrb[7].mxu0 }
 0x148   : > { %v1877_v40 = vadd.f32 %v1876_v39, %v1875_v36  ;;  %v1928_v41 = vpop.f32.mrb[7].mxu1 }
 0x149   : > { %v2576_v42 = vadd.f32 %v1926_v37, %v1874_v34  ;;  %v1929_v43 = vadd.f32 %v1928_v41, %v1927_v38 }
 0x14b   : > { %v2578_v44 = vadd.f32 %v1929_v43, %v1877_v40 }
 0x14c   : > { %v1878_v45 = vpop.f32.mrb[8].mxu0 }
 0x14d   : > { %v1930_v46 = vpop.f32.mrb[8].mxu1  ;;  %v1879_v47 = vpop.f32.mrb[9].mxu0 }
 0x14e   : > { %v1880_v48 = vadd.f32 %v1879_v47, %v1878_v45  ;;  %v1931_v49 = vpop.f32.mrb[9].mxu1  ;;  %v1881_v50 = vpop.f32.mrb[10].mxu0 }
 0x14f   : > { %v1932_v51 = vadd.f32 %v1931_v49, %v1930_v46  ;;  %v1933_v52 = vpop.f32.mrb[10].mxu1  ;;  %v1882_v53 = vpop.f32.mrb[11].mxu0 }
 0x150   : > { %v1883_v54 = vadd.f32 %v1882_v53, %v1881_v50  ;;  %v1934_v55 = vpop.f32.mrb[11].mxu1  ;;  %v384_v53 = vld [vmem:[#allocation2] sm:$0xff] }
 0x151   : > { %v2580_v56 = vadd.f32 %v1932_v51, %v1880_v48  ;;  %v1935_v57 = vadd.f32 %v1934_v55, %v1933_v52 }
 0x153   : > { %v2582_v58 = vadd.f32 %v1935_v57, %v1883_v54 }
 0x154   : > { %v1884_v59 = vpop.f32.mrb[12].mxu0 }
 0x155   : > { %v1936_v60 = vpop.f32.mrb[12].mxu1  ;;  %v1885_v61 = vpop.f32.mrb[13].mxu0 }
 0x156   : > { %v1886_v62 = vadd.f32 %v1885_v61, %v1884_v59  ;;  %v1937_v63 = vpop.f32.mrb[13].mxu1  ;;  %v1887_v0 = vpop.f32.mrb[14].mxu0  ;;  %v385_v59 = vld [vmem:[#allocation2 + $0x8] sm:$0xff] }
 0x157   : > { %v1938_v1 = vadd.f32 %v1937_v63, %v1936_v60  ;;  %v1939_v2 = vpop.f32.mrb[14].mxu1  ;;  %v1888_v3 = vpop.f32.mrb[15].mxu0 }
 0x158   : > { %v1889_v4 = vadd.f32 %v1888_v3, %v1887_v0  ;;  %v1940_v5 = vpop.f32.mrb[15].mxu1 }
 0x159   : > { %v2584_v6 = vadd.f32 %v1938_v1, %v1886_v62  ;;  %v1941_v7 = vadd.f32 %v1940_v5, %v1939_v2 }
 0x15b   : > { %v2586_v8 = vadd.f32 %v1941_v7, %v1889_v4 }
 0x15c   : > { %v1890_v9 = vpop.f32.mrb[16].mxu0 }
 0x15d   : > { %v1942_v10 = vpop.f32.mrb[16].mxu1  ;;  %v1891_v11 = vpop.f32.mrb[17].mxu0 }
 0x15e   : > { %v1892_v12 = vadd.f32 %v1891_v11, %v1890_v9  ;;  %v1943_v13 = vpop.f32.mrb[17].mxu1  ;;  %v1893_v14 = vpop.f32.mrb[18].mxu0 }
 0x15f   : > { %v1944_v15 = vadd.f32 %v1943_v13, %v1942_v10  ;;  %v1945_v16 = vpop.f32.mrb[18].mxu1  ;;  %v1894_v17 = vpop.f32.mrb[19].mxu0 }
 0x160   : > { %v1895_v18 = vadd.f32 %v1894_v17, %v1893_v14  ;;  %v1946_v19 = vpop.f32.mrb[19].mxu1 }
 0x161   : > { %v2588_v20 = vadd.f32 %v1944_v15, %v1892_v12  ;;  %v1947_v21 = vadd.f32 %v1946_v19, %v1945_v16  ;;  %v387_v15 = vld [vmem:[#allocation2 + $0x18] sm:$0xff] }
 0x163   : > { %v2590_v22 = vadd.f32 %v1947_v21, %v1895_v18 }
 0x164   : > { %v1896_v23 = vpop.f32.mrb[20].mxu0 }
 0x165   : > { %v1948_v24 = vpop.f32.mrb[20].mxu1  ;;  %v1897_v25 = vpop.f32.mrb[21].mxu0 }
 0x166   : > { %v1898_v26 = vadd.f32 %v1897_v25, %v1896_v23  ;;  %v1949_v27 = vpop.f32.mrb[21].mxu1  ;;  %v1899_v29 = vpop.f32.mrb[22].mxu0 }
 0x167   : > { %v1950_v31 = vadd.f32 %v1949_v27, %v1948_v24  ;;  %v1951_v32 = vpop.f32.mrb[22].mxu1  ;;  %v1900_v33 = vpop.f32.mrb[23].mxu0 }
 0x168   : > { %v1901_v34 = vadd.f32 %v1900_v33, %v1899_v29  ;;  %v1952_v35 = vpop.f32.mrb[23].mxu1 }
 0x169   : > { %v2592_v36 = vadd.f32 %v1950_v31, %v1898_v26  ;;  %v1953_v37 = vadd.f32 %v1952_v35, %v1951_v32 }
 0x16b   : > { %v2594_v38 = vadd.f32 %v1953_v37, %v1901_v34 }
 0x16c   : > { %v1970_v39 = vpop.f32.mrb[24].mxu0 }
 0x16d   : > { %v2022_v40 = vpop.f32.mrb[24].mxu1  ;;  %v1971_v41 = vpop.f32.mrb[25].mxu0 }
 0x16e   : > { %v1972_v43 = vadd.f32 %v1971_v41, %v1970_v39  ;;  %v2023_v45 = vpop.f32.mrb[25].mxu1  ;;  %v1973_v46 = vpop.f32.mrb[26].mxu0  ;;  %v389_v39 = vld [vmem:[#allocation2 + $0x28] sm:$0xff] }
 0x16f   : > { %v2024_v47 = vadd.f32 %v2023_v45, %v2022_v40  ;;  %v2025_v48 = vpop.f32.mrb[26].mxu1  ;;  %v1974_v49 = vpop.f32.mrb[27].mxu0 }
 0x170   : > { %v1393_v50 = vadd.f32 %v1972_v43, %v2572_v28  ;;  %v1975_v51 = vadd.f32 %v1974_v49, %v1973_v46  ;;  %v2026_v52 = vpop.f32.mrb[27].mxu1 }
 0x171   : > { %v2027_v54 = vadd.f32 %v2026_v52, %v2025_v48 }
 0x172   : > { %v1474_v55 = vadd.f32 %v2024_v47, %v1393_v50  ;;  %v1396_v57 = vadd.f32 %v1975_v51, %v2574_v30  ;;  %v386_v30 = vld [vmem:[#allocation2 + $0x10] sm:$0xff] }
 0x174   : > { %v1520_v60 = vadd.f32 %v1474_v55, %v384_v53  ;;  %v1477_v61 = vadd.f32 %v2027_v54, %v1396_v57  ;;  %v1976_v62 = vpop.f32.mrb[28].mxu0 }
 0x175   : > { %v2028_v63 = vpop.f32.mrb[28].mxu1  ;;  %v1977_v0 = vpop.f32.mrb[29].mxu0 }
 0x176   : > { %1532 = vst [vmem:[#allocation2] sm:$0xff] %v1520_v60  ;;  %v1521_v1 = vadd.f32 %v1477_v61, %v385_v59  ;;  %v1978_v2 = vadd.f32 %v1977_v0, %v1976_v62  ;;  %v2029_v3 = vpop.f32.mrb[29].mxu1  ;;  %v1979_v4 = vpop.f32.mrb[30].mxu0  ;;  %v391_v61 = vld [vmem:[#allocation2 + $0x38] sm:$0xff] }
 0x177   : > { %v2030_v5 = vadd.f32 %v2029_v3, %v2028_v63  ;;  %v2031_v28 = vpop.f32.mrb[30].mxu1  ;;  %v1980_v7 = vpop.f32.mrb[31].mxu0 }
 0x178   : > { %1533 = vst [vmem:[#allocation2 + $0x8] sm:$0xff] %v1521_v1  ;;  %v1401_v9 = vadd.f32 %v1978_v2, %v2576_v42  ;;  %v1981_v10 = vadd.f32 %v1980_v7, %v1979_v4  ;;  %v2032_v11 = vpop.f32.mrb[31].mxu1 }
 0x179   : > { %v2033_v12 = vadd.f32 %v2032_v11, %v2031_v28 }
 0x17a   : > { %v1482_v13 = vadd.f32 %v2030_v5, %v1401_v9  ;;  %v1404_v14 = vadd.f32 %v1981_v10, %v2578_v44  ;;  %v388_v44 = vld [vmem:[#allocation2 + $0x20] sm:$0xff] }
 0x17c   : > { %v1522_v16 = vadd.f32 %v1482_v13, %v386_v30  ;;  %v1485_v17 = vadd.f32 %v2033_v12, %v1404_v14  ;;  %v1982_v18 = vpop.f32.mrb[32].mxu0 }
 0x17d   : > { %v2034_v19 = vpop.f32.mrb[32].mxu1  ;;  %v1983_v21 = vpop.f32.mrb[33].mxu0 }
 0x17e   : > { %1534 = vst [vmem:[#allocation2 + $0x10] sm:$0xff] %v1522_v16  ;;  %v1523_v23 = vadd.f32 %v1485_v17, %v387_v15  ;;  %v1984_v24 = vadd.f32 %v1983_v21, %v1982_v18  ;;  %v2035_v25 = vpop.f32.mrb[33].mxu1  ;;  %v1985_v26 = vpop.f32.mrb[34].mxu0  ;;  %v393_v15 = vld [vmem:[#allocation2 + $0x48] sm:$0xff] }
 0x17f   : > { %v2036_v27 = vadd.f32 %v2035_v25, %v2034_v19  ;;  %v2037_v42 = vpop.f32.mrb[34].mxu1  ;;  %v1986_v29 = vpop.f32.mrb[35].mxu0 }
 0x180   : > { %1535 = vst [vmem:[#allocation2 + $0x18] sm:$0xff] %v1523_v23  ;;  %v1409_v31 = vadd.f32 %v1984_v24, %v2580_v56  ;;  %v1987_v32 = vadd.f32 %v1986_v29, %v1985_v26  ;;  %v2038_v33 = vpop.f32.mrb[35].mxu1 }
 0x181   : > { %v2039_v34 = vadd.f32 %v2038_v33, %v2037_v42 }
 0x182   : > { %v1490_v35 = vadd.f32 %v2036_v27, %v1409_v31  ;;  %v1412_v37 = vadd.f32 %v1987_v32, %v2582_v58  ;;  %v390_v58 = vld [vmem:[#allocation2 + $0x30] sm:$0xff] }
 0x184   : > { %v1524_v40 = vadd.f32 %v1490_v35, %v388_v44  ;;  %v1493_v41 = vadd.f32 %v2039_v34, %v1412_v37  ;;  %v1988_v43 = vpop.f32.mrb[36].mxu0  ;;  %v395_v35 = vld [vmem:[#allocation2 + $0x58] sm:$0xff] }
 0x185   : > { %v2040_v45 = vpop.f32.mrb[36].mxu1  ;;  %v1989_v46 = vpop.f32.mrb[37].mxu0 }
 0x186   : > { %1536 = vst [vmem:[#allocation2 + $0x20] sm:$0xff] %v1524_v40  ;;  %v1525_v47 = vadd.f32 %v1493_v41, %v389_v39  ;;  %v1990_v48 = vadd.f32 %v1989_v46, %v1988_v43  ;;  %v2041_v49 = vpop.f32.mrb[37].mxu1  ;;  %v1991_v50 = vpop.f32.mrb[38].mxu0  ;;  %v1548_v41 = vld [vmem:[#allocation2] sm:$0xff] (!%p1845_p13)  ;;  %v1549_v43 = vld [vmem:[#allocation2 + $0x8] sm:$0xff] (!%p1845_p13) }
 0x187   : > { %v2042_v51 = vadd.f32 %v2041_v49, %v2040_v45  ;;  %v2043_v56 = vpop.f32.mrb[38].mxu1  ;;  %v1992_v52 = vpop.f32.mrb[39].mxu0 }
 0x188   : > { %1537 = vst [vmem:[#allocation2 + $0x28] sm:$0xff] %v1525_v47  ;;  %v1417_v53 = vadd.f32 %v1990_v48, %v2584_v6  ;;  %v1993_v54 = vadd.f32 %v1992_v52, %v1991_v50  ;;  %v2044_v55 = vpop.f32.mrb[39].mxu1  ;;  %v1550_v47 = vld [vmem:[#allocation2 + $0x10] sm:$0xff] (!%p1845_p13)  ;;  %v1551_v48 = vld [vmem:[#allocation2 + $0x18] sm:$0xff] (!%p1845_p13) }
 0x189   : > { %v2045_v57 = vadd.f32 %v2044_v55, %v2043_v56 }
 0x18a   : > { %v1498_v59 = vadd.f32 %v2042_v51, %v1417_v53  ;;  %v1420_v60 = vadd.f32 %v1993_v54, %v2586_v8  ;;  %v392_v8 = vld [vmem:[#allocation2 + $0x40] sm:$0xff] }
 0x18c   : > { %v1526_v62 = vadd.f32 %v1498_v59, %v390_v58  ;;  %v1501_v63 = vadd.f32 %v2045_v57, %v1420_v60  ;;  %v1994_v0 = vpop.f32.mrb[40].mxu0 }
 0x18d   : > { %v2046_v1 = vpop.f32.mrb[40].mxu1  ;;  %v1995_v2 = vpop.f32.mrb[41].mxu0 }
 0x18e   : > { %1538 = vst [vmem:[#allocation2 + $0x30] sm:$0xff] %v1526_v62  ;;  %v1527_v3 = vadd.f32 %v1501_v63, %v391_v61  ;;  %v1996_v4 = vadd.f32 %v1995_v2, %v1994_v0  ;;  %v2047_v5 = vpop.f32.mrb[41].mxu1  ;;  %v1997_v28 = vpop.f32.mrb[42].mxu0 }
 0x18f   : > { %v2048_v7 = vadd.f32 %v2047_v5, %v2046_v1  ;;  %v2049_v6 = vpop.f32.mrb[42].mxu1  ;;  %v1998_v9 = vpop.f32.mrb[43].mxu0  ;;  %v1553_v51 = vld [vmem:[#allocation2 + $0x28] sm:$0xff] (!%p1845_p13) }
 0x190   : > { %1539 = vst [vmem:[#allocation2 + $0x38] sm:$0xff] %v1527_v3  ;;  %v1425_v10 = vadd.f32 %v1996_v4, %v2588_v20  ;;  %v1999_v11 = vadd.f32 %v1998_v9, %v1997_v28  ;;  %v2050_v30 = vpop.f32.mrb[43].mxu1 }
 0x191   : > { %v2051_v12 = vadd.f32 %v2050_v30, %v2049_v6 }
 0x192   : > { %v1506_v13 = vadd.f32 %v2048_v7, %v1425_v10  ;;  %v1428_v14 = vadd.f32 %v1999_v11, %v2590_v22  ;;  %v394_v22 = vld [vmem:[#allocation2 + $0x50] sm:$0xff] }
 0x194   : > { %v1528_v16 = vadd.f32 %v1506_v13, %v392_v8  ;;  %v1509_v17 = vadd.f32 %v2051_v12, %v1428_v14  ;;  %v2000_v18 = vpop.f32.mrb[44].mxu0 }
 0x195   : > { %v2052_v19 = vpop.f32.mrb[44].mxu1  ;;  %v2001_v21 = vpop.f32.mrb[45].mxu0  ;;  %v1554_v56 = vld [vmem:[#allocation2 + $0x30] sm:$0xff] (!%p1845_p13) }
 0x196   : > { %1540 = vst [vmem:[#allocation2 + $0x40] sm:$0xff] %v1528_v16  ;;  %v1529_v23 = vadd.f32 %v1509_v17, %v393_v15  ;;  %v2002_v24 = vadd.f32 %v2001_v21, %v2000_v18  ;;  %v2053_v25 = vpop.f32.mrb[45].mxu1  ;;  %v2003_v26 = vpop.f32.mrb[46].mxu0 }
 0x197   : > { %v2054_v27 = vadd.f32 %v2053_v25, %v2052_v19  ;;  %v2055_v20 = vpop.f32.mrb[46].mxu1  ;;  %v2004_v42 = vpop.f32.mrb[47].mxu0  ;;  %v1555_v53 = vld [vmem:[#allocation2 + $0x38] sm:$0xff] (!%p1845_p13) }
 0x198   : > { %1541 = vst [vmem:[#allocation2 + $0x48] sm:$0xff] %v1529_v23  ;;  %v1433_v29 = vadd.f32 %v2002_v24, %v2592_v36  ;;  %v2005_v31 = vadd.f32 %v2004_v42, %v2003_v26  ;;  %v2056_v32 = vpop.f32.mrb[47].mxu1  ;;  %v1846_v36 = vld [vmem:[%s2647_s2] ss:$0 sm:$0xff] (!%p1845_p13) }
 0x199   : > { %v2057_v33 = vadd.f32 %v2056_v32, %v2055_v20  ;;  %v1567_v45 = vadd.f32 (!%p1845_p13), %v1846_v36, %v1548_v41  ;;  %v1568_v46 = vadd.f32 (!%p1845_p13), %v1846_v36, %v1549_v43  ;;  %v1569_v49 = vadd.f32 (!%p1845_p13), %v1846_v36, %v1550_v47 }
 0x19a   : > { %v1514_v44 = vadd.f32 %v2054_v27, %v1433_v29  ;;  %v1436_v34 = vadd.f32 %v2005_v31, %v2594_v38  ;;  %1547 = sbr.rel (%p1845_p13) target bundleno = 438 (0x1b6), region = 63  ;;  %v1552_v38 = vld [vmem:[#allocation2 + $0x20] sm:$0xff] (!%p1845_p13)  ;;  %v1570_v50 = vadd.f32 (!%p1845_p13), %v1846_v36, %v1551_v48  ;;  %v1572_v54 = vadd.f32 (!%p1845_p13), %v1846_v36, %v1553_v51 }
 0x19b   : > { %2181 = vtanh.f32 (!%p1845_p13), %v1567_v45  ;;  %v1571_v52 = vadd.f32 (!%p1845_p13), %v1846_v36, %v1552_v38  ;;  %v1573_v58 = vadd.f32 (!%p1845_p13), %v1846_v36, %v1554_v56  ;;  %v1574_v59 = vadd.f32 (!%p1845_p13), %v1846_v36, %v1555_v53 }
 0x19c   : > { %v1530_v37 = vadd.f32 %v1514_v44, %v394_v22  ;;  %v1517_v39 = vadd.f32 %v2057_v33, %v1436_v34  ;;  %2183 = vtanh.f32 (!%p1845_p13), %v1568_v46 }
 0x19d   : > { %v1556_v55 = vld [vmem:[#allocation2 + $0x40] sm:$0xff] (!%p1845_p13)  ;;  %2185 = vtanh.f32 (!%p1845_p13), %v1569_v49 }
 0x19e   : > { %1542 = vst [vmem:[#allocation2 + $0x50] sm:$0xff] %v1530_v37  ;;  %v1531_v40 = vadd.f32 %v1517_v39, %v395_v35  ;;  %2187 = vtanh.f32 (!%p1845_p13), %v1570_v50  ;;  %v1575_v61 = vadd.f32 (!%p1845_p13), %v1846_v36, %v1556_v55 }
 0x19f   : > { %v1557_v57 = vld [vmem:[#allocation2 + $0x48] sm:$0xff] (!%p1845_p13)  ;;  %2189 = vtanh.f32 (!%p1845_p13), %v1571_v52 }
 0x1a0   : > { %1543 = vst [vmem:[#allocation2 + $0x58] sm:$0xff] %v1531_v40  ;;  %2191 = vtanh.f32 (!%p1845_p13), %v1572_v54  ;;  %v1576_v63 = vadd.f32 (!%p1845_p13), %v1846_v36, %v1557_v57 }
 0x1a1   : > { %2193 = vtanh.f32 %v1573_v58 }
 0x1a2   : > { %2195 = vtanh.f32 %v1574_v59 }
 0x1a3   : > { %2197 = vtanh.f32 %v1575_v61 }
 0x1a4   : > { %2199 = vtanh.f32 %v1576_v63 }
 0x1a5   : > { %v1558_v60 = vld [vmem:[#allocation2 + $0x50] sm:$0xff]  ;;  %v2182_v2 = vpop.eup %2181 }
 0x1a6   : > { %v1577_v0 = vadd.f32 %v1846_v36, %v1558_v60  ;;  %v2184_v3 = vpop.eup %2183  ;;  %1591 = vst [vmem:[%s2455_s30] sm:$0xff] %v2182_v2 }
 0x1a7   : > { %v1559_v62 = vld [vmem:[#allocation2 + $0x58] sm:$0xff]  ;;  %v2186_v4 = vpop.eup %2185  ;;  %1592 = vst [vmem:[%s2455_s30 + $0x8] sm:$0xff] %v2184_v3 }
 0x1a8   : > { %v1578_v1 = vadd.f32 %v1846_v36, %v1559_v62  ;;  %2201 = vtanh.f32 %v1577_v0  ;;  %v2188_v5 = vpop.eup %2187  ;;  %1593 = vst [vmem:[%s2455_s30 + $0x10] sm:$0xff] %v2186_v4 }
 0x1a9   : > { %v2190_v28 = vpop.eup %2189  ;;  %1594 = vst [vmem:[%s2455_s30 + $0x18] sm:$0xff] %v2188_v5 }
 0x1aa   : > { %2203 = vtanh.f32 %v1578_v1  ;;  %v2192_v7 = vpop.eup %2191  ;;  %1595 = vst [vmem:[%s2455_s30 + $0x20] sm:$0xff] %v2190_v28 }
 0x1ab   : > { %v2194_v6 = vpop.eup %2193  ;;  %1596 = vst [vmem:[%s2455_s30 + $0x28] sm:$0xff] %v2192_v7 }
 0x1ac   : > { %v2196_v9 = vpop.eup %2195  ;;  %1597 = vst [vmem:[%s2455_s30 + $0x30] sm:$0xff] %v2194_v6 }
 0x1ad   : > { %v2198_v10 = vpop.eup %2197  ;;  %1598 = vst [vmem:[%s2455_s30 + $0x38] sm:$0xff] %v2196_v9 }
 0x1ae   : > { %v2200_v11 = vpop.eup %2199  ;;  %1599 = vst [vmem:[%s2455_s30 + $0x40] sm:$0xff] %v2198_v10 }
 0x1af   : > { %1600 = vst [vmem:[%s2455_s30 + $0x48] sm:$0xff] %v2200_v11 }
 0x1b2   : > { %v2202_v30 = vpop.eup %2201 }
 0x1b3   : > { %1601 = vst [vmem:[%s2455_s30 + $0x50] sm:$0xff] %v2202_v30 }
 0x1b4   : > { %v2204_v8 = vpop.eup %2203 }
 0x1b5   : > { %1602 = vst [vmem:[%s2455_s30 + $0x58] sm:$0xff] %v2204_v8 }
 0x1b6 PF: > { %s13_s18 = sadd.s32 1, %s2259_s18   ;;  %s2649_s12 = smov %s2239_s13 }
 0x1b7   : > { %p10_p0 = scmp.ge.s32.totalorder %s13_s18, 6   ;;  %s2650_s13 = smov %s2333_s25 }
 0x1b8   : > { %s2651_s14 = smov %s2251_s16  ;;  %s2652_s15 = smov %s2255_s17 }
 0x1b9   : > { %s2653_s16 = smov %s2656_s19  ;;  %s2654_s17 = smov %s2660_s20 }
 0x1ba   :  { %12 = sbr.rel (!%p10_p0) target bundleno = 4 (0x4), region = 104 }

</bundles_post_ra>
